<compile_context>
chip_gen: v5e
topology: v5e:2x2
jax: 0.10.0
libtpu: 0.0.40
codegen_flags: <defaults>
</compile_context>

<pallas_src>
import functools

import jax
import jax.numpy as jnp
from jax.experimental import pallas as pl
from jax.experimental.pallas import tpu as pltpu


# ---------------------------------------------------------------------------
# Helpers
# ---------------------------------------------------------------------------

_VMEM_LIMIT_BYTES = 64 * 1024 * 1024   # raise toward ~100 MiB on v5e/v6e only


def _round_up(x, m):
    return ((x + m - 1) // m) * m


def _cparams(sem):
    return pltpu.CompilerParams(dimension_semantics=sem,
                                vmem_limit_bytes=_VMEM_LIMIT_BYTES)


def _fill_halo(pad_ref, x_f32, P, HW):
    # pad_ref: (HW + 2P, C) f32 VMEM scratch; zero halo rows + image rows.
    C = pad_ref.shape[1]
    zeros = jnp.zeros((P, C), jnp.float32)
    pad_ref[pl.ds(0, P), :] = zeros
    pad_ref[pl.ds(P + HW, P), :] = zeros
    pad_ref[pl.ds(P, HW), :] = x_f32


def _tap(pad_ref, cmask_ref, t, P, W, HW):
    # Read the shifted window for tap t (= 3*ky + kx) and apply the column
    # mask that kills the dx wrap-around; rows out of range hit the zero halo.
    ky, kx = divmod(t, 3)
    off = (ky - 1) * W + (kx - 1)
    xs = pad_ref[pl.ds(P + off, HW), :]
    if kx == 0:
        xs = xs * cmask_ref[0]
    elif kx == 2:
        xs = xs * cmask_ref[1]
    return xs.astype(jnp.bfloat16)


# ---------------------------------------------------------------------------
# Pallas kernels
# ---------------------------------------------------------------------------

def _conv3x3_kernel(H, W, x_ref, cmask_ref, w_ref, b_ref, o_ref, pad_ref):
    # x_ref : (1, HW, Cin) bf16      w_ref : (9, Cin, Cout) bf16
    # b_ref : (1, Cout) f32          o_ref : (1, HW, Cout) bf16
    HW = H * W
    P = _round_up(W + 1, 8)
    Cout = o_ref.shape[2]
    _fill_halo(pad_ref, x_ref[0].astype(jnp.float32), P, HW)
    acc = jnp.zeros((HW, Cout), jnp.float32)
    for t in range(9):                           # static unroll over the taps
        xs = _tap(pad_ref, cmask_ref, t, P, W, HW)
        acc = acc + jnp.dot(xs, w_ref[t], preferred_element_type=jnp.float32)
    o_ref[0] = (acc + b_ref[...]).astype(o_ref.dtype)


def _attention_kernel(H, W, x_ref, y_ref, cmask_ref, wq_ref, wkv_ref, wp_ref,
                      temp_ref, hmask_ref, o_ref, xpad_ref, ypad_ref):
    # Fused: q = (1x1∘dw3x3)(x), [k|v] = (1x1∘dw3x3)(y), per-head normalized
    # attention over HW, project_out, "+ x" residual.
    # x/y   : (1, HW, C) bf16        wq : (9, C, C) bf16   wkv : (9, C, 2C) bf16
    # wp    : (C, C) bf16            temp : (1, C) f32     hmask: (C, C) f32
    # o_ref : (1, HW, C) bf16
    HW = H * W
    P = _round_up(W + 1, 8)
    C = x_ref.shape[2]
    _fill_halo(xpad_ref, x_ref[0].astype(jnp.float32), P, HW)
    _fill_halo(ypad_ref, y_ref[0].astype(jnp.float32), P, HW)

    acc_q = jnp.zeros((HW, C), jnp.float32)
    acc_kv = jnp.zeros((HW, 2 * C), jnp.float32)
    for t in range(9):
        xs = _tap(xpad_ref, cmask_ref, t, P, W, HW)
        ys = _tap(ypad_ref, cmask_ref, t, P, W, HW)
        acc_q = acc_q + jnp.dot(xs, wq_ref[t], preferred_element_type=jnp.float32)
        acc_kv = acc_kv + jnp.dot(ys, wkv_ref[t], preferred_element_type=jnp.float32)

    q = acc_q
    k = acc_kv[:, :C]
    v = acc_kv[:, C:]
    eps2 = jnp.float32(1e-24)            # (torch F.normalize eps=1e-12) ** 2
    # L2-normalise every channel over the spatial axis (f32; rsqrt -> EUP).
    qn = q * jax.lax.rsqrt(jnp.maximum(jnp.sum(q * q, axis=0, keepdims=True), eps2))
    kn = k * jax.lax.rsqrt(jnp.maximum(jnp.sum(k * k, axis=0, keepdims=True), eps2))
    qn = qn * temp_ref[...]              # fold per-head temperature into q
    # All heads in one matmul, contracting the HW axis of both operands
    # directly (no explicit transpose relayout): s[cq, ck] = sum_p qn kn.
    s = jax.lax.dot_general(qn.astype(jnp.bfloat16), kn.astype(jnp.bfloat16),
                            (((0,), (0,)), ((), ())),
                            preferred_element_type=jnp.float32)       # (C, C)
    s = jnp.where(hmask_ref[...] > 0.0, s, jnp.float32(-1e30))
    s = s - jnp.max(s, axis=-1, keepdims=True)
    e = jnp.exp(s)                                    # masked entries -> ~0
    a = e / jnp.sum(e, axis=-1, keepdims=True)        # exact f32 softmax
    # o[p, cq] = sum_ck v[p, ck] * a[cq, ck]   (a is block-diagonal per head)
    av = jax.lax.dot_general(v.astype(jnp.bfloat16), a.astype(jnp.bfloat16),
                             (((1,), (1,)), ((), ())),
                             preferred_element_type=jnp.float32)      # (HW, C)
    out = jnp.dot(av.astype(jnp.bfloat16), wp_ref[...],
                  preferred_element_type=jnp.float32)
    o_ref[0] = (out + x_ref[0].astype(jnp.float32)).astype(o_ref.dtype)


def _fuse_gate_kernel(H, W, fre_ref, spa_ref, cmask_ref, w1_ref, b1_ref,
                      w2_ref, b2_ref, o_ref, cat_pad_ref, g_pad_ref):
    # Fused fuse[0] (conv3x3 2C->C over [fre|spa]) + fuse[1] (conv3x3 C->2C)
    # + Sigmoid + gating + add + nan_to_num; g and the 2C gate stay in VMEM.
    # fre/spa : (1, HW, C) bf16      w1 : (9, 2C, C) bf16   b1 : (1, C) f32
    # w2 : (9, C, 2C) bf16           b2 : (1, 2C) f32       o_ref : (1, HW, C) f32
    HW = H * W
    P = _round_up(W + 1, 8)
    C = fre_ref.shape[2]
    fre_f32 = fre_ref[0].astype(jnp.float32)
    spa_f32 = spa_ref[0].astype(jnp.float32)
    _fill_halo(cat_pad_ref, jnp.concatenate([fre_f32, spa_f32], axis=-1), P, HW)

    acc1 = jnp.zeros((HW, C), jnp.float32)
    for t in range(9):
        xs = _tap(cat_pad_ref, cmask_ref, t, P, W, HW)          # (HW, 2C), K=2C
        acc1 = acc1 + jnp.dot(xs, w1_ref[t], preferred_element_type=jnp.float32)
    g = acc1 + b1_ref[...]

    _fill_halo(g_pad_ref, g, P, HW)
    acc2 = jnp.zeros((HW, 2 * C), jnp.float32)
    for t in range(9):
        gs = _tap(g_pad_ref, cmask_ref, t, P, W, HW)
        acc2 = acc2 + jnp.dot(gs, w2_ref[t], preferred_element_type=jnp.float32)
    gate = jax.nn.sigmoid(acc2 + b2_ref[...])                   # f32
    fre_a = gate[:, :C]
    spa_a = gate[:, C:]
    res = fre_f32 * fre_a + spa_a * spa_f32
    # nan_to_num(nan=1e-5, posinf=1e-5, neginf=1e-5)
    o_ref[0] = jnp.where(jnp.isfinite(res), res, jnp.float32(1e-5))


# ---------------------------------------------------------------------------
# Pallas wrappers
# ---------------------------------------------------------------------------

def conv3x3(x, w9, b, cmask, H, W):
    N, HW, Cin = x.shape
    Cout = w9.shape[2]
    P = _round_up(W + 1, 8)
    return pl.pallas_call(
        functools.partial(_conv3x3_kernel, H, W),
        out_shape=jax.ShapeDtypeStruct((N, HW, Cout), jnp.bfloat16),
        grid=(N,),
        in_specs=[
            pl.BlockSpec((1, HW, Cin), lambda n: (n, 0, 0)),
            pl.BlockSpec((2, HW, 1), lambda n: (0, 0, 0)),
            pl.BlockSpec((9, Cin, Cout), lambda n: (0, 0, 0)),
            pl.BlockSpec((1, Cout), lambda n: (0, 0)),
        ],
        out_specs=pl.BlockSpec((1, HW, Cout), lambda n: (n, 0, 0)),
        scratch_shapes=[pltpu.VMEM((HW + 2 * P, Cin), jnp.float32)],
        compiler_params=_cparams(("parallel",)),
    )(x, cmask, w9, b)


def attention(x, y, att, cmask, H, W):
    # q from x, k/v from y; returns project_out(attn) + x (residual fused in).
    N, HW, C = x.shape
    P = _round_up(W + 1, 8)
    return pl.pallas_call(
        functools.partial(_attention_kernel, H, W),
        out_shape=jax.ShapeDtypeStruct((N, HW, C), jnp.bfloat16),
        grid=(N,),
        in_specs=[
            pl.BlockSpec((1, HW, C), lambda n: (n, 0, 0)),       # x (query + residual)
            pl.BlockSpec((1, HW, C), lambda n: (n, 0, 0)),       # y (kv source)
            pl.BlockSpec((2, HW, 1), lambda n: (0, 0, 0)),       # column masks
            pl.BlockSpec((9, C, C), lambda n: (0, 0, 0)),        # fused q weights
            pl.BlockSpec((9, C, 2 * C), lambda n: (0, 0, 0)),    # fused kv weights
            pl.BlockSpec((C, C), lambda n: (0, 0)),              # project_out
            pl.BlockSpec((1, C), lambda n: (0, 0)),              # temperature
            pl.BlockSpec((C, C), lambda n: (0, 0)),              # head mask
        ],
        out_specs=pl.BlockSpec((1, HW, C), lambda n: (n, 0, 0)),
        scratch_shapes=[pltpu.VMEM((HW + 2 * P, C), jnp.float32),
                        pltpu.VMEM((HW + 2 * P, C), jnp.float32)],
        compiler_params=_cparams(("parallel",)),
    )(x, y, cmask, att["q_w9"], att["kv_w9"], att["proj_w"],
      att["temp_row"], att["head_mask"])


def fuse_gate(fre, spa, pp, cmask, H, W):
    N, HW, C = fre.shape
    P = _round_up(W + 1, 8)
    return pl.pallas_call(
        functools.partial(_fuse_gate_kernel, H, W),
        out_shape=jax.ShapeDtypeStruct((N, HW, C), jnp.float32),
        grid=(N,),
        in_specs=[
            pl.BlockSpec((1, HW, C), lambda n: (n, 0, 0)),
            pl.BlockSpec((1, HW, C), lambda n: (n, 0, 0)),
            pl.BlockSpec((2, HW, 1), lambda n: (0, 0, 0)),
            pl.BlockSpec((9, 2 * C, C), lambda n: (0, 0, 0)),
            pl.BlockSpec((1, C), lambda n: (0, 0)),
            pl.BlockSpec((9, C, 2 * C), lambda n: (0, 0, 0)),
            pl.BlockSpec((1, 2 * C), lambda n: (0, 0)),
        ],
        out_specs=pl.BlockSpec((1, HW, C), lambda n: (n, 0, 0)),
        scratch_shapes=[pltpu.VMEM((HW + 2 * P, 2 * C), jnp.float32),
                        pltpu.VMEM((HW + 2 * P, C), jnp.float32)],
        compiler_params=_cparams(("parallel",)),
    )(fre, spa, cmask, pp["fuse1_w9"], pp["fuse1_b"], pp["fuse2_w9"], pp["fuse2_b"])


# ---------------------------------------------------------------------------
# Weight preparation (wrapper-side, tiny; constant-folded under jit)
# ---------------------------------------------------------------------------

def _dense_taps(w):
    # torch (Cout, Cin, 3, 3) -> (9, Cin, Cout), tap t = 3*ky + kx
    cout, cin = w.shape[0], w.shape[1]
    return jnp.transpose(w, (2, 3, 1, 0)).reshape(9, cin, cout)


def _pw_dw_taps(w1, dw):
    # Fold 1x1 conv (Cmid, Cin, 1, 1) with depthwise 3x3 (Cmid, 1, 3, 3)
    # (both bias-free) into per-tap (9, Cin, Cmid) weights:
    #   W[t][ci, co] = w1[co, ci] * dw[co, 0, ky, kx]
    cmid = w1.shape[0]
    w1m = jnp.transpose(w1[:, :, 0, 0], (1, 0))               # (Cin, Cmid)
    dwt = jnp.transpose(dw[:, 0].reshape(cmid, 9), (1, 0))    # (9, Cmid)
    return w1m[None, :, :] * dwt[:, None, :]


def prepare_params(params, C, num_heads=8):
    bf16, f32 = jnp.bfloat16, jnp.float32
    ch = C // num_heads
    a = params["fre_att"]
    head = jnp.arange(C) // ch
    att = {
        "q_w9": _pw_dw_taps(a["q_w"], a["q_dw_w"]).astype(bf16),        # (9, C, C)
        "kv_w9": _pw_dw_taps(a["kv_w"], a["kv_dw_w"]).astype(bf16),     # (9, C, 2C)
        "proj_w": jnp.transpose(a["proj_w"][:, :, 0, 0], (1, 0)).astype(bf16),
        "temp_row": jnp.repeat(a["temperature"].reshape(-1), ch).reshape(1, C).astype(f32),
        "head_mask": (head[:, None] == head[None, :]).astype(f32),
    }
    return {
        "fre_w9": _dense_taps(params["fre_w"]).astype(bf16),
        "fre_b": params["fre_b"].reshape(1, C).astype(f32),
        "spa_w9": _dense_taps(params["spa_w"]).astype(bf16),
        "spa_b": params["spa_b"].reshape(1, C).astype(f32),
        "att": att,
        "fuse1_w9": _dense_taps(params["fuse1_w"]).astype(bf16),        # (9, 2C, C)
        "fuse1_b": params["fuse1_b"].reshape(1, C).astype(f32),
        "fuse2_w9": _dense_taps(params["fuse2_w"]).astype(bf16),        # (9, C, 2C)
        "fuse2_b": params["fuse2_b"].reshape(1, 2 * C).astype(f32),
    }


# ---------------------------------------------------------------------------
# FuseBlock forward
# ---------------------------------------------------------------------------

def fuse_block_forward(spa_nchw, fre_nchw, params, num_heads=8):
    N, C, H, W = spa_nchw.shape
    HW = H * W
    pp = prepare_params(params, C, num_heads)

    # Column-wrap masks for the flat halo shifts (dx = -1 / +1).
    w_idx = jnp.arange(HW, dtype=jnp.int32) % W
    cmask = jnp.stack([(w_idx > 0), (w_idx < W - 1)], axis=0).astype(jnp.float32)[:, :, None]

    # NCHW -> flat NHWC bf16 (single XLA transpose/cast per input at the boundary).
    spa0 = jnp.transpose(spa_nchw, (0, 2, 3, 1)).reshape(N, HW, C).astype(jnp.bfloat16)
    fre0 = jnp.transpose(fre_nchw, (0, 2, 3, 1)).reshape(N, HW, C).astype(jnp.bfloat16)

    fre = conv3x3(fre0, pp["fre_w9"], pp["fre_b"], cmask, H, W)   # (N, HW, C) bf16
    spa = conv3x3(spa0, pp["spa_w9"], pp["spa_b"], cmask, H, W)

    # NOTE: the reference module calls self.fre_att for BOTH lines (spa_att unused).
    fre = attention(fre, spa, pp["att"], cmask, H, W)   # includes "+ fre" residual
    spa = attention(spa, fre, pp["att"], cmask, H, W)   # includes "+ spa" residual

    res = fuse_gate(fre, spa, pp, cmask, H, W)           # (N, HW, C) f32
    return jnp.transpose(res.reshape(N, H, W, C), (0, 3, 1, 2))   # back to NCHW


# ---------------------------------------------------------------------------
# Deterministic parameter init (synthetic; torch-layout shapes of the module)
# ---------------------------------------------------------------------------

def init_params(key, C, num_heads=8):
    ks = iter(jax.random.split(key, 32))

    def w(shape, scale=0.1):
        return jax.random.normal(next(ks), shape, jnp.float32) * scale

    def att_params():
        return {
            "temperature": jnp.ones((num_heads, 1, 1), jnp.float32),
            "kv_w": w((2 * C, C, 1, 1)),
            "kv_dw_w": w((2 * C, 1, 3, 3)),
            "q_w": w((C, C, 1, 1)),
            "q_dw_w": w((C, 1, 3, 3)),
            "proj_w": w((C, C, 1, 1)),
        }

    return {
        "fre_w": w((C, C, 3, 3)), "fre_b": w((C,)),
        "spa_w": w((C, C, 3, 3)), "spa_b": w((C,)),
        "fre_att": att_params(),
        "spa_att": att_params(),   # present in the module but never used in forward
        "fuse1_w": w((C, 2 * C, 3, 3)), "fuse1_b": w((C,)),
        "fuse2_w": w((2 * C, C, 3, 3)), "fuse2_b": w((2 * C,)),
    }


# ---------------------------------------------------------------------------

if __name__ == "__main__":
    N, C, H, W = 2, 16, 8, 8   # C must be divisible by num_heads=8
    key = jax.random.PRNGKey(0)
    k_spa, k_fre, k_par = jax.random.split(key, 3)

    spa = jax.random.normal(k_spa, (N, C, H, W), jnp.float32)
    fre = jax.random.normal(k_fre, (N, C, H, W), jnp.float32)
    params = init_params(k_par, C)

    fwd = jax.jit(functools.partial(fuse_block_forward, params=params))
    out = fwd(spa, fre)
    jax.block_until_ready(out)

    assert out.shape == (N, C, H, W), out.shape
    assert out.dtype == jnp.float32
    assert bool(jnp.all(jnp.isfinite(out)))
    print("KERNEL_OK")
</pallas_src>

<mosaic_0001>
module attributes {stable_mosaic.version = 11 : i64} {
  func.func @_conv3x3_kernel(%arg0: i32, %arg1: memref<1x64x16xbf16, #tpu.memory_space<vmem>>, %arg2: memref<2x64x1xf32, #tpu.memory_space<vmem>>, %arg3: memref<9x16x16xbf16, #tpu.memory_space<vmem>>, %arg4: memref<1x16xf32, #tpu.memory_space<vmem>>, %arg5: memref<1x64x16xbf16, #tpu.memory_space<vmem>>, %arg6: memref<96x16xf32, #tpu.memory_space<vmem>>) attributes {dimension_semantics = [#tpu.dimension_semantics<parallel>], iteration_bounds = array<i64: 2>, scalar_prefetch = 0 : i64, scratch_operands = 1 : i64, tpu.core_type = #tpu.core_type<tc>, window_params = [{transform_indices = @transform_0, window_bounds = array<i64: 1, 64, 16>}, {pipeline_mode = #tpu.pipeline_mode<synchronous>, transform_indices = @transform_1, window_bounds = array<i64: 2, 64, 1>}, {pipeline_mode = #tpu.pipeline_mode<synchronous>, transform_indices = @transform_2, window_bounds = array<i64: 9, 16, 16>}, {pipeline_mode = #tpu.pipeline_mode<synchronous>, transform_indices = @transform_3, window_bounds = array<i64: 1, 16>}, {transform_indices = @transform_4, window_bounds = array<i64: 1, 64, 16>}]} {
    %c0 = arith.constant 0 : index
    %c0_0 = arith.constant 0 : index
    %c0_1 = arith.constant 0 : index
    %0 = vector.load %arg1[%c0, %c0_0, %c0_1] : memref<1x64x16xbf16, #tpu.memory_space<vmem>>, vector<1x64x16xbf16>
    %1 = vector.shape_cast %0 : vector<1x64x16xbf16> to vector<64x16xbf16>
    %2 = arith.extf %1 : vector<64x16xbf16> to vector<64x16xf32>
    %cst = arith.constant 0.000000e+00 : f32
    %3 = vector.broadcast %cst : f32 to vector<16x16xf32>
    %c0_2 = arith.constant 0 : index
    %c0_3 = arith.constant 0 : index
    %4 = vector.load %arg6[%c0_2, %c0_3] : memref<96x16xf32, #tpu.memory_space<vmem>>, vector<16x16xf32>
    tpu.vector_store %arg6[%c0_2, %c0_3], %3 {strides = array<i32>} : memref<96x16xf32, #tpu.memory_space<vmem>>, vector<16x16xf32>,
    %c80 = arith.constant 80 : index
    %c0_4 = arith.constant 0 : index
    %5 = vector.load %arg6[%c80, %c0_4] : memref<96x16xf32, #tpu.memory_space<vmem>>, vector<16x16xf32>
    tpu.vector_store %arg6[%c80, %c0_4], %3 {strides = array<i32>} : memref<96x16xf32, #tpu.memory_space<vmem>>, vector<16x16xf32>,
    %c16 = arith.constant 16 : index
    %c0_5 = arith.constant 0 : index
    %6 = vector.load %arg6[%c16, %c0_5] : memref<96x16xf32, #tpu.memory_space<vmem>>, vector<64x16xf32>
    tpu.vector_store %arg6[%c16, %c0_5], %2 {strides = array<i32>} : memref<96x16xf32, #tpu.memory_space<vmem>>, vector<64x16xf32>,
    %cst_6 = arith.constant 0.000000e+00 : f32
    %7 = vector.broadcast %cst_6 : f32 to vector<64x16xf32>
    %c7 = arith.constant 7 : index
    %c0_7 = arith.constant 0 : index
    %8 = vector.load %arg6[%c7, %c0_7] : memref<96x16xf32, #tpu.memory_space<vmem>>, vector<64x16xf32>
    %c0_8 = arith.constant 0 : index
    %c0_9 = arith.constant 0 : index
    %c0_10 = arith.constant 0 : index
    %9 = vector.load %arg2[%c0_8, %c0_9, %c0_10] : memref<2x64x1xf32, #tpu.memory_space<vmem>>, vector<1x64x1xf32>
    %10 = vector.shape_cast %9 : vector<1x64x1xf32> to vector<64x1xf32>
    %11 = vector.broadcast %10 : vector<64x1xf32> to vector<64x16xf32>
    %12 = arith.mulf %8, %11 : vector<64x16xf32>
    %13 = arith.truncf %12 : vector<64x16xf32> to vector<64x16xbf16>
    %c0_11 = arith.constant 0 : index
    %c0_12 = arith.constant 0 : index
    %c0_13 = arith.constant 0 : index
    %14 = vector.load %arg3[%c0_11, %c0_12, %c0_13] : memref<9x16x16xbf16, #tpu.memory_space<vmem>>, vector<1x16x16xbf16>
    %15 = vector.shape_cast %14 : vector<1x16x16xbf16> to vector<16x16xbf16>
    %cst_14 = arith.constant dense<0.000000e+00> : vector<64x16xf32>
    %16 = tpu.matmul %13, %15, %cst_14 {dimension_numbers = #tpu.dot_dimension_numbers<[1], [0], [0], [1], [0, 0, 1, 1], [], []>} : vector<64x16xbf16>, vector<16x16xbf16>, vector<64x16xf32> -> vector<64x16xf32>
    %17 = arith.addf %7, %16 : vector<64x16xf32>
    %c8 = arith.constant 8 : index
    %c0_15 = arith.constant 0 : index
    %18 = vector.load %arg6[%c8, %c0_15] : memref<96x16xf32, #tpu.memory_space<vmem>>, vector<64x16xf32>
    %19 = arith.truncf %18 : vector<64x16xf32> to vector<64x16xbf16>
    %c1 = arith.constant 1 : index
    %c0_16 = arith.constant 0 : index
    %c0_17 = arith.constant 0 : index
    %20 = vector.load %arg3[%c1, %c0_16, %c0_17] : memref<9x16x16xbf16, #tpu.memory_space<vmem>>, vector<1x16x16xbf16>
    %21 = vector.shape_cast %20 : vector<1x16x16xbf16> to vector<16x16xbf16>
    %cst_18 = arith.constant dense<0.000000e+00> : vector<64x16xf32>
    %22 = tpu.matmul %19, %21, %cst_18 {dimension_numbers = #tpu.dot_dimension_numbers<[1], [0], [0], [1], [0, 0, 1, 1], [], []>} : vector<64x16xbf16>, vector<16x16xbf16>, vector<64x16xf32> -> vector<64x16xf32>
    %23 = arith.addf %17, %22 : vector<64x16xf32>
    %c9 = arith.constant 9 : index
    %c0_19 = arith.constant 0 : index
    %24 = vector.load %arg6[%c9, %c0_19] : memref<96x16xf32, #tpu.memory_space<vmem>>, vector<64x16xf32>
    %c1_20 = arith.constant 1 : index
    %c0_21 = arith.constant 0 : index
    %c0_22 = arith.constant 0 : index
    %25 = vector.load %arg2[%c1_20, %c0_21, %c0_22] : memref<2x64x1xf32, #tpu.memory_space<vmem>>, vector<1x64x1xf32>
    %26 = vector.shape_cast %25 : vector<1x64x1xf32> to vector<64x1xf32>
    %27 = vector.broadcast %26 : vector<64x1xf32> to vector<64x16xf32>
    %28 = arith.mulf %24, %27 : vector<64x16xf32>
    %29 = arith.truncf %28 : vector<64x16xf32> to vector<64x16xbf16>
    %c2 = arith.constant 2 : index
    %c0_23 = arith.constant 0 : index
    %c0_24 = arith.constant 0 : index
    %30 = vector.load %arg3[%c2, %c0_23, %c0_24] : memref<9x16x16xbf16, #tpu.memory_space<vmem>>, vector<1x16x16xbf16>
    %31 = vector.shape_cast %30 : vector<1x16x16xbf16> to vector<16x16xbf16>
    %cst_25 = arith.constant dense<0.000000e+00> : vector<64x16xf32>
    %32 = tpu.matmul %29, %31, %cst_25 {dimension_numbers = #tpu.dot_dimension_numbers<[1], [0], [0], [1], [0, 0, 1, 1], [], []>} : vector<64x16xbf16>, vector<16x16xbf16>, vector<64x16xf32> -> vector<64x16xf32>
    %33 = arith.addf %23, %32 : vector<64x16xf32>
    %c15 = arith.constant 15 : index
    %c0_26 = arith.constant 0 : index
    %34 = vector.load %arg6[%c15, %c0_26] : memref<96x16xf32, #tpu.memory_space<vmem>>, vector<64x16xf32>
    %c0_27 = arith.constant 0 : index
    %c0_28 = arith.constant 0 : index
    %c0_29 = arith.constant 0 : index
    %35 = vector.load %arg2[%c0_27, %c0_28, %c0_29] : memref<2x64x1xf32, #tpu.memory_space<vmem>>, vector<1x64x1xf32>
    %36 = vector.shape_cast %35 : vector<1x64x1xf32> to vector<64x1xf32>
    %37 = vector.broadcast %36 : vector<64x1xf32> to vector<64x16xf32>
    %38 = arith.mulf %34, %37 : vector<64x16xf32>
    %39 = arith.truncf %38 : vector<64x16xf32> to vector<64x16xbf16>
    %c3 = arith.constant 3 : index
    %c0_30 = arith.constant 0 : index
    %c0_31 = arith.constant 0 : index
    %40 = vector.load %arg3[%c3, %c0_30, %c0_31] : memref<9x16x16xbf16, #tpu.memory_space<vmem>>, vector<1x16x16xbf16>
    %41 = vector.shape_cast %40 : vector<1x16x16xbf16> to vector<16x16xbf16>
    %cst_32 = arith.constant dense<0.000000e+00> : vector<64x16xf32>
    %42 = tpu.matmul %39, %41, %cst_32 {dimension_numbers = #tpu.dot_dimension_numbers<[1], [0], [0], [1], [0, 0, 1, 1], [], []>} : vector<64x16xbf16>, vector<16x16xbf16>, vector<64x16xf32> -> vector<64x16xf32>
    %43 = arith.addf %33, %42 : vector<64x16xf32>
    %c16_33 = arith.constant 16 : index
    %c0_34 = arith.constant 0 : index
    %44 = vector.load %arg6[%c16_33, %c0_34] : memref<96x16xf32, #tpu.memory_space<vmem>>, vector<64x16xf32>
    %45 = arith.truncf %44 : vector<64x16xf32> to vector<64x16xbf16>
    %c4 = arith.constant 4 : index
    %c0_35 = arith.constant 0 : index
    %c0_36 = arith.constant 0 : index
    %46 = vector.load %arg3[%c4, %c0_35, %c0_36] : memref<9x16x16xbf16, #tpu.memory_space<vmem>>, vector<1x16x16xbf16>
    %47 = vector.shape_cast %46 : vector<1x16x16xbf16> to vector<16x16xbf16>
    %cst_37 = arith.constant dense<0.000000e+00> : vector<64x16xf32>
    %48 = tpu.matmul %45, %47, %cst_37 {dimension_numbers = #tpu.dot_dimension_numbers<[1], [0], [0], [1], [0, 0, 1, 1], [], []>} : vector<64x16xbf16>, vector<16x16xbf16>, vector<64x16xf32> -> vector<64x16xf32>
    %49 = arith.addf %43, %48 : vector<64x16xf32>
    %c17 = arith.constant 17 : index
    %c0_38 = arith.constant 0 : index
    %50 = vector.load %arg6[%c17, %c0_38] : memref<96x16xf32, #tpu.memory_space<vmem>>, vector<64x16xf32>
    %c1_39 = arith.constant 1 : index
    %c0_40 = arith.constant 0 : index
    %c0_41 = arith.constant 0 : index
    %51 = vector.load %arg2[%c1_39, %c0_40, %c0_41] : memref<2x64x1xf32, #tpu.memory_space<vmem>>, vector<1x64x1xf32>
    %52 = vector.shape_cast %51 : vector<1x64x1xf32> to vector<64x1xf32>
    %53 = vector.broadcast %52 : vector<64x1xf32> to vector<64x16xf32>
    %54 = arith.mulf %50, %53 : vector<64x16xf32>
    %55 = arith.truncf %54 : vector<64x16xf32> to vector<64x16xbf16>
    %c5 = arith.constant 5 : index
    %c0_42 = arith.constant 0 : index
    %c0_43 = arith.constant 0 : index
    %56 = vector.load %arg3[%c5, %c0_42, %c0_43] : memref<9x16x16xbf16, #tpu.memory_space<vmem>>, vector<1x16x16xbf16>
    %57 = vector.shape_cast %56 : vector<1x16x16xbf16> to vector<16x16xbf16>
    %cst_44 = arith.constant dense<0.000000e+00> : vector<64x16xf32>
    %58 = tpu.matmul %55, %57, %cst_44 {dimension_numbers = #tpu.dot_dimension_numbers<[1], [0], [0], [1], [0, 0, 1, 1], [], []>} : vector<64x16xbf16>, vector<16x16xbf16>, vector<64x16xf32> -> vector<64x16xf32>
    %59 = arith.addf %49, %58 : vector<64x16xf32>
    %c23 = arith.constant 23 : index
    %c0_45 = arith.constant 0 : index
    %60 = vector.load %arg6[%c23, %c0_45] : memref<96x16xf32, #tpu.memory_space<vmem>>, vector<64x16xf32>
    %c0_46 = arith.constant 0 : index
    %c0_47 = arith.constant 0 : index
    %c0_48 = arith.constant 0 : index
    %61 = vector.load %arg2[%c0_46, %c0_47, %c0_48] : memref<2x64x1xf32, #tpu.memory_space<vmem>>, vector<1x64x1xf32>
    %62 = vector.shape_cast %61 : vector<1x64x1xf32> to vector<64x1xf32>
    %63 = vector.broadcast %62 : vector<64x1xf32> to vector<64x16xf32>
    %64 = arith.mulf %60, %63 : vector<64x16xf32>
    %65 = arith.truncf %64 : vector<64x16xf32> to vector<64x16xbf16>
    %c6 = arith.constant 6 : index
    %c0_49 = arith.constant 0 : index
    %c0_50 = arith.constant 0 : index
    %66 = vector.load %arg3[%c6, %c0_49, %c0_50] : memref<9x16x16xbf16, #tpu.memory_space<vmem>>, vector<1x16x16xbf16>
    %67 = vector.shape_cast %66 : vector<1x16x16xbf16> to vector<16x16xbf16>
    %cst_51 = arith.constant dense<0.000000e+00> : vector<64x16xf32>
    %68 = tpu.matmul %65, %67, %cst_51 {dimension_numbers = #tpu.dot_dimension_numbers<[1], [0], [0], [1], [0, 0, 1, 1], [], []>} : vector<64x16xbf16>, vector<16x16xbf16>, vector<64x16xf32> -> vector<64x16xf32>
    %69 = arith.addf %59, %68 : vector<64x16xf32>
    %c24 = arith.constant 24 : index
    %c0_52 = arith.constant 0 : index
    %70 = vector.load %arg6[%c24, %c0_52] : memref<96x16xf32, #tpu.memory_space<vmem>>, vector<64x16xf32>
    %71 = arith.truncf %70 : vector<64x16xf32> to vector<64x16xbf16>
    %c7_53 = arith.constant 7 : index
    %c0_54 = arith.constant 0 : index
    %c0_55 = arith.constant 0 : index
    %72 = vector.load %arg3[%c7_53, %c0_54, %c0_55] : memref<9x16x16xbf16, #tpu.memory_space<vmem>>, vector<1x16x16xbf16>
    %73 = vector.shape_cast %72 : vector<1x16x16xbf16> to vector<16x16xbf16>
    %cst_56 = arith.constant dense<0.000000e+00> : vector<64x16xf32>
    %74 = tpu.matmul %71, %73, %cst_56 {dimension_numbers = #tpu.dot_dimension_numbers<[1], [0], [0], [1], [0, 0, 1, 1], [], []>} : vector<64x16xbf16>, vector<16x16xbf16>, vector<64x16xf32> -> vector<64x16xf32>
    %75 = arith.addf %69, %74 : vector<64x16xf32>
    %c25 = arith.constant 25 : index
    %c0_57 = arith.constant 0 : index
    %76 = vector.load %arg6[%c25, %c0_57] : memref<96x16xf32, #tpu.memory_space<vmem>>, vector<64x16xf32>
    %c1_58 = arith.constant 1 : index
    %c0_59 = arith.constant 0 : index
    %c0_60 = arith.constant 0 : index
    %77 = vector.load %arg2[%c1_58, %c0_59, %c0_60] : memref<2x64x1xf32, #tpu.memory_space<vmem>>, vector<1x64x1xf32>
    %78 = vector.shape_cast %77 : vector<1x64x1xf32> to vector<64x1xf32>
    %79 = vector.broadcast %78 : vector<64x1xf32> to vector<64x16xf32>
    %80 = arith.mulf %76, %79 : vector<64x16xf32>
    %81 = arith.truncf %80 : vector<64x16xf32> to vector<64x16xbf16>
    %c8_61 = arith.constant 8 : index
    %c0_62 = arith.constant 0 : index
    %c0_63 = arith.constant 0 : index
    %82 = vector.load %arg3[%c8_61, %c0_62, %c0_63] : memref<9x16x16xbf16, #tpu.memory_space<vmem>>, vector<1x16x16xbf16>
    %83 = vector.shape_cast %82 : vector<1x16x16xbf16> to vector<16x16xbf16>
    %cst_64 = arith.constant dense<0.000000e+00> : vector<64x16xf32>
    %84 = tpu.matmul %81, %83, %cst_64 {dimension_numbers = #tpu.dot_dimension_numbers<[1], [0], [0], [1], [0, 0, 1, 1], [], []>} : vector<64x16xbf16>, vector<16x16xbf16>, vector<64x16xf32> -> vector<64x16xf32>
    %85 = arith.addf %75, %84 : vector<64x16xf32>
    %c0_65 = arith.constant 0 : index
    %c0_66 = arith.constant 0 : index
    %86 = vector.load %arg4[%c0_65, %c0_66] : memref<1x16xf32, #tpu.memory_space<vmem>>, vector<1x16xf32>
    %87 = vector.broadcast %86 : vector<1x16xf32> to vector<64x16xf32>
    %88 = arith.addf %85, %87 : vector<64x16xf32>
    %89 = arith.truncf %88 : vector<64x16xf32> to vector<64x16xbf16>
    %c0_67 = arith.constant 0 : index
    %c0_68 = arith.constant 0 : index
    %c0_69 = arith.constant 0 : index
    %90 = vector.load %arg5[%c0_67, %c0_68, %c0_69] : memref<1x64x16xbf16, #tpu.memory_space<vmem>>, vector<1x64x16xbf16>
    %91 = vector.shape_cast %90 : vector<1x64x16xbf16> to vector<64x16xbf16>
    %92 = vector.shape_cast %89 : vector<64x16xbf16> to vector<1x64x16xbf16>
    tpu.vector_store %arg5[%c0_67, %c0_68, %c0_69], %92 {strides = array<i32>} : memref<1x64x16xbf16, #tpu.memory_space<vmem>>, vector<1x64x16xbf16>,
    return
  }
  func.func @transform_0(%arg0: i32) -> (i32, i32, i32) {
    %c0_i32 = arith.constant 0 : i32
    %c0_i32_0 = arith.constant 0 : i32
    %c0_i32_1 = arith.constant 0 : i32
    return %arg0, %c0_i32, %c0_i32_0 : i32, i32, i32
  }
  func.func @transform_1(%arg0: i32) -> (i32, i32, i32) {
    %c0_i32 = arith.constant 0 : i32
    %c0_i32_0 = arith.constant 0 : i32
    %c0_i32_1 = arith.constant 0 : i32
    %c0_i32_2 = arith.constant 0 : i32
    return %c0_i32, %c0_i32_0, %c0_i32_1 : i32, i32, i32
  }
  func.func @transform_2(%arg0: i32) -> (i32, i32, i32) {
    %c0_i32 = arith.constant 0 : i32
    %c0_i32_0 = arith.constant 0 : i32
    %c0_i32_1 = arith.constant 0 : i32
    %c0_i32_2 = arith.constant 0 : i32
    return %c0_i32, %c0_i32_0, %c0_i32_1 : i32, i32, i32
  }
  func.func @transform_3(%arg0: i32) -> (i32, i32) {
    %c0_i32 = arith.constant 0 : i32
    %c0_i32_0 = arith.constant 0 : i32
    %c0_i32_1 = arith.constant 0 : i32
    return %c0_i32, %c0_i32_0 : i32, i32
  }
  func.func @transform_4(%arg0: i32) -> (i32, i32, i32) {
    %c0_i32 = arith.constant 0 : i32
    %c0_i32_0 = arith.constant 0 : i32
    %c0_i32_1 = arith.constant 0 : i32
    return %arg0, %c0_i32, %c0_i32_0 : i32, i32, i32
  }
}

module attributes {stable_mosaic.version = 11 : i64} {
  func.func @_fuse_gate_kernel(%arg0: i32, %arg1: memref<1x64x16xbf16, #tpu.memory_space<vmem>>, %arg2: memref<1x64x16xbf16, #tpu.memory_space<vmem>>, %arg3: memref<2x64x1xf32, #tpu.memory_space<vmem>>, %arg4: memref<9x32x16xbf16, #tpu.memory_space<vmem>>, %arg5: memref<1x16xf32, #tpu.memory_space<vmem>>, %arg6: memref<9x16x32xbf16, #tpu.memory_space<vmem>>, %arg7: memref<1x32xf32, #tpu.memory_space<vmem>>, %arg8: memref<1x64x16xf32, #tpu.memory_space<vmem>>, %arg9: memref<96x32xf32, #tpu.memory_space<vmem>>, %arg10: memref<96x16xf32, #tpu.memory_space<vmem>>) attributes {dimension_semantics = [#tpu.dimension_semantics<parallel>], iteration_bounds = array<i64: 2>, scalar_prefetch = 0 : i64, scratch_operands = 2 : i64, tpu.core_type = #tpu.core_type<tc>, window_params = [{transform_indices = @transform_0, window_bounds = array<i64: 1, 64, 16>}, {transform_indices = @transform_1, window_bounds = array<i64: 1, 64, 16>}, {pipeline_mode = #tpu.pipeline_mode<synchronous>, transform_indices = @transform_2, window_bounds = array<i64: 2, 64, 1>}, {pipeline_mode = #tpu.pipeline_mode<synchronous>, transform_indices = @transform_3, window_bounds = array<i64: 9, 32, 16>}, {pipeline_mode = #tpu.pipeline_mode<synchronous>, transform_indices = @transform_4, window_bounds = array<i64: 1, 16>}, {pipeline_mode = #tpu.pipeline_mode<synchronous>, transform_indices = @transform_5, window_bounds = array<i64: 9, 16, 32>}, {pipeline_mode = #tpu.pipeline_mode<synchronous>, transform_indices = @transform_6, window_bounds = array<i64: 1, 32>}, {transform_indices = @transform_7, window_bounds = array<i64: 1, 64, 16>}]} {
    %c0 = arith.constant 0 : index
    %c0_0 = arith.constant 0 : index
    %c0_1 = arith.constant 0 : index
    %0 = vector.load %arg1[%c0, %c0_0, %c0_1] : memref<1x64x16xbf16, #tpu.memory_space<vmem>>, vector<1x64x16xbf16>
    %1 = vector.shape_cast %0 : vector<1x64x16xbf16> to vector<64x16xbf16>
    %2 = arith.extf %1 : vector<64x16xbf16> to vector<64x16xf32>
    %c0_2 = arith.constant 0 : index
    %c0_3 = arith.constant 0 : index
    %c0_4 = arith.constant 0 : index
    %3 = vector.load %arg2[%c0_2, %c0_3, %c0_4] : memref<1x64x16xbf16, #tpu.memory_space<vmem>>, vector<1x64x16xbf16>
    %4 = vector.shape_cast %3 : vector<1x64x16xbf16> to vector<64x16xbf16>
    %5 = arith.extf %4 : vector<64x16xbf16> to vector<64x16xf32>
    %6 = tpu.concatenate %2, %5 in 1 : vector<64x16xf32>, vector<64x16xf32> -> vector<64x32xf32>
    %cst = arith.constant 0.000000e+00 : f32
    %7 = vector.broadcast %cst : f32 to vector<16x32xf32>
    %c0_5 = arith.constant 0 : index
    %c0_6 = arith.constant 0 : index
    %8 = vector.load %arg9[%c0_5, %c0_6] : memref<96x32xf32, #tpu.memory_space<vmem>>, vector<16x32xf32>
    tpu.vector_store %arg9[%c0_5, %c0_6], %7 {strides = array<i32>} : memref<96x32xf32, #tpu.memory_space<vmem>>, vector<16x32xf32>,
    %c80 = arith.constant 80 : index
    %c0_7 = arith.constant 0 : index
    %9 = vector.load %arg9[%c80, %c0_7] : memref<96x32xf32, #tpu.memory_space<vmem>>, vector<16x32xf32>
    tpu.vector_store %arg9[%c80, %c0_7], %7 {strides = array<i32>} : memref<96x32xf32, #tpu.memory_space<vmem>>, vector<16x32xf32>,
    %c16 = arith.constant 16 : index
    %c0_8 = arith.constant 0 : index
    %10 = vector.load %arg9[%c16, %c0_8] : memref<96x32xf32, #tpu.memory_space<vmem>>, vector<64x32xf32>
    tpu.vector_store %arg9[%c16, %c0_8], %6 {strides = array<i32>} : memref<96x32xf32, #tpu.memory_space<vmem>>, vector<64x32xf32>,
    %cst_9 = arith.constant 0.000000e+00 : f32
    %11 = vector.broadcast %cst_9 : f32 to vector<64x16xf32>
    %c7 = arith.constant 7 : index
    %c0_10 = arith.constant 0 : index
    %12 = vector.load %arg9[%c7, %c0_10] : memref<96x32xf32, #tpu.memory_space<vmem>>, vector<64x32xf32>
    %c0_11 = arith.constant 0 : index
    %c0_12 = arith.constant 0 : index
    %c0_13 = arith.constant 0 : index
    %13 = vector.load %arg3[%c0_11, %c0_12, %c0_13] : memref<2x64x1xf32, #tpu.memory_space<vmem>>, vector<1x64x1xf32>
    %14 = vector.shape_cast %13 : vector<1x64x1xf32> to vector<64x1xf32>
    %15 = vector.broadcast %14 : vector<64x1xf32> to vector<64x32xf32>
    %16 = arith.mulf %12, %15 : vector<64x32xf32>
    %17 = arith.truncf %16 : vector<64x32xf32> to vector<64x32xbf16>
    %c0_14 = arith.constant 0 : index
    %c0_15 = arith.constant 0 : index
    %c0_16 = arith.constant 0 : index
    %18 = vector.load %arg4[%c0_14, %c0_15, %c0_16] : memref<9x32x16xbf16, #tpu.memory_space<vmem>>, vector<1x32x16xbf16>
    %19 = vector.shape_cast %18 : vector<1x32x16xbf16> to vector<32x16xbf16>
    %cst_17 = arith.constant dense<0.000000e+00> : vector<64x16xf32>
    %20 = tpu.matmul %17, %19, %cst_17 {dimension_numbers = #tpu.dot_dimension_numbers<[1], [0], [0], [1], [0, 0, 1, 1], [], []>} : vector<64x32xbf16>, vector<32x16xbf16>, vector<64x16xf32> -> vector<64x16xf32>
    %21 = arith.addf %11, %20 : vector<64x16xf32>
    %c8 = arith.constant 8 : index
    %c0_18 = arith.constant 0 : index
    %22 = vector.load %arg9[%c8, %c0_18] : memref<96x32xf32, #tpu.memory_space<vmem>>, vector<64x32xf32>
    %23 = arith.truncf %22 : vector<64x32xf32> to vector<64x32xbf16>
    %c1 = arith.constant 1 : index
    %c0_19 = arith.constant 0 : index
    %c0_20 = arith.constant 0 : index
    %24 = vector.load %arg4[%c1, %c0_19, %c0_20] : memref<9x32x16xbf16, #tpu.memory_space<vmem>>, vector<1x32x16xbf16>
    %25 = vector.shape_cast %24 : vector<1x32x16xbf16> to vector<32x16xbf16>
    %cst_21 = arith.constant dense<0.000000e+00> : vector<64x16xf32>
    %26 = tpu.matmul %23, %25, %cst_21 {dimension_numbers = #tpu.dot_dimension_numbers<[1], [0], [0], [1], [0, 0, 1, 1], [], []>} : vector<64x32xbf16>, vector<32x16xbf16>, vector<64x16xf32> -> vector<64x16xf32>
    %27 = arith.addf %21, %26 : vector<64x16xf32>
    %c9 = arith.constant 9 : index
    %c0_22 = arith.constant 0 : index
    %28 = vector.load %arg9[%c9, %c0_22] : memref<96x32xf32, #tpu.memory_space<vmem>>, vector<64x32xf32>
    %c1_23 = arith.constant 1 : index
    %c0_24 = arith.constant 0 : index
    %c0_25 = arith.constant 0 : index
    %29 = vector.load %arg3[%c1_23, %c0_24, %c0_25] : memref<2x64x1xf32, #tpu.memory_space<vmem>>, vector<1x64x1xf32>
    %30 = vector.shape_cast %29 : vector<1x64x1xf32> to vector<64x1xf32>
    %31 = vector.broadcast %30 : vector<64x1xf32> to vector<64x32xf32>
    %32 = arith.mulf %28, %31 : vector<64x32xf32>
    %33 = arith.truncf %32 : vector<64x32xf32> to vector<64x32xbf16>
    %c2 = arith.constant 2 : index
    %c0_26 = arith.constant 0 : index
    %c0_27 = arith.constant 0 : index
    %34 = vector.load %arg4[%c2, %c0_26, %c0_27] : memref<9x32x16xbf16, #tpu.memory_space<vmem>>, vector<1x32x16xbf16>
    %35 = vector.shape_cast %34 : vector<1x32x16xbf16> to vector<32x16xbf16>
    %cst_28 = arith.constant dense<0.000000e+00> : vector<64x16xf32>
    %36 = tpu.matmul %33, %35, %cst_28 {dimension_numbers = #tpu.dot_dimension_numbers<[1], [0], [0], [1], [0, 0, 1, 1], [], []>} : vector<64x32xbf16>, vector<32x16xbf16>, vector<64x16xf32> -> vector<64x16xf32>
    %37 = arith.addf %27, %36 : vector<64x16xf32>
    %c15 = arith.constant 15 : index
    %c0_29 = arith.constant 0 : index
    %38 = vector.load %arg9[%c15, %c0_29] : memref<96x32xf32, #tpu.memory_space<vmem>>, vector<64x32xf32>
    %c0_30 = arith.constant 0 : index
    %c0_31 = arith.constant 0 : index
    %c0_32 = arith.constant 0 : index
    %39 = vector.load %arg3[%c0_30, %c0_31, %c0_32] : memref<2x64x1xf32, #tpu.memory_space<vmem>>, vector<1x64x1xf32>
    %40 = vector.shape_cast %39 : vector<1x64x1xf32> to vector<64x1xf32>
    %41 = vector.broadcast %40 : vector<64x1xf32> to vector<64x32xf32>
    %42 = arith.mulf %38, %41 : vector<64x32xf32>
    %43 = arith.truncf %42 : vector<64x32xf32> to vector<64x32xbf16>
    %c3 = arith.constant 3 : index
    %c0_33 = arith.constant 0 : index
    %c0_34 = arith.constant 0 : index
    %44 = vector.load %arg4[%c3, %c0_33, %c0_34] : memref<9x32x16xbf16, #tpu.memory_space<vmem>>, vector<1x32x16xbf16>
    %45 = vector.shape_cast %44 : vector<1x32x16xbf16> to vector<32x16xbf16>
    %cst_35 = arith.constant dense<0.000000e+00> : vector<64x16xf32>
    %46 = tpu.matmul %43, %45, %cst_35 {dimension_numbers = #tpu.dot_dimension_numbers<[1], [0], [0], [1], [0, 0, 1, 1], [], []>} : vector<64x32xbf16>, vector<32x16xbf16>, vector<64x16xf32> -> vector<64x16xf32>
    %47 = arith.addf %37, %46 : vector<64x16xf32>
    %c16_36 = arith.constant 16 : index
    %c0_37 = arith.constant 0 : index
    %48 = vector.load %arg9[%c16_36, %c0_37] : memref<96x32xf32, #tpu.memory_space<vmem>>, vector<64x32xf32>
    %49 = arith.truncf %48 : vector<64x32xf32> to vector<64x32xbf16>
    %c4 = arith.constant 4 : index
    %c0_38 = arith.constant 0 : index
    %c0_39 = arith.constant 0 : index
    %50 = vector.load %arg4[%c4, %c0_38, %c0_39] : memref<9x32x16xbf16, #tpu.memory_space<vmem>>, vector<1x32x16xbf16>
    %51 = vector.shape_cast %50 : vector<1x32x16xbf16> to vector<32x16xbf16>
    %cst_40 = arith.constant dense<0.000000e+00> : vector<64x16xf32>
    %52 = tpu.matmul %49, %51, %cst_40 {dimension_numbers = #tpu.dot_dimension_numbers<[1], [0], [0], [1], [0, 0, 1, 1], [], []>} : vector<64x32xbf16>, vector<32x16xbf16>, vector<64x16xf32> -> vector<64x16xf32>
    %53 = arith.addf %47, %52 : vector<64x16xf32>
    %c17 = arith.constant 17 : index
    %c0_41 = arith.constant 0 : index
    %54 = vector.load %arg9[%c17, %c0_41] : memref<96x32xf32, #tpu.memory_space<vmem>>, vector<64x32xf32>
    %c1_42 = arith.constant 1 : index
    %c0_43 = arith.constant 0 : index
    %c0_44 = arith.constant 0 : index
    %55 = vector.load %arg3[%c1_42, %c0_43, %c0_44] : memref<2x64x1xf32, #tpu.memory_space<vmem>>, vector<1x64x1xf32>
    %56 = vector.shape_cast %55 : vector<1x64x1xf32> to vector<64x1xf32>
    %57 = vector.broadcast %56 : vector<64x1xf32> to vector<64x32xf32>
    %58 = arith.mulf %54, %57 : vector<64x32xf32>
    %59 = arith.truncf %58 : vector<64x32xf32> to vector<64x32xbf16>
    %c5 = arith.constant 5 : index
    %c0_45 = arith.constant 0 : index
    %c0_46 = arith.constant 0 : index
    %60 = vector.load %arg4[%c5, %c0_45, %c0_46] : memref<9x32x16xbf16, #tpu.memory_space<vmem>>, vector<1x32x16xbf16>
    %61 = vector.shape_cast %60 : vector<1x32x16xbf16> to vector<32x16xbf16>
    %cst_47 = arith.constant dense<0.000000e+00> : vector<64x16xf32>
    %62 = tpu.matmul %59, %61, %cst_47 {dimension_numbers = #tpu.dot_dimension_numbers<[1], [0], [0], [1], [0, 0, 1, 1], [], []>} : vector<64x32xbf16>, vector<32x16xbf16>, vector<64x16xf32> -> vector<64x16xf32>
    %63 = arith.addf %53, %62 : vector<64x16xf32>
    %c23 = arith.constant 23 : index
    %c0_48 = arith.constant 0 : index
    %64 = vector.load %arg9[%c23, %c0_48] : memref<96x32xf32, #tpu.memory_space<vmem>>, vector<64x32xf32>
    %c0_49 = arith.constant 0 : index
    %c0_50 = arith.constant 0 : index
    %c0_51 = arith.constant 0 : index
    %65 = vector.load %arg3[%c0_49, %c0_50, %c0_51] : memref<2x64x1xf32, #tpu.memory_space<vmem>>, vector<1x64x1xf32>
    %66 = vector.shape_cast %65 : vector<1x64x1xf32> to vector<64x1xf32>
    %67 = vector.broadcast %66 : vector<64x1xf32> to vector<64x32xf32>
    %68 = arith.mulf %64, %67 : vector<64x32xf32>
    %69 = arith.truncf %68 : vector<64x32xf32> to vector<64x32xbf16>
    %c6 = arith.constant 6 : index
    %c0_52 = arith.constant 0 : index
    %c0_53 = arith.constant 0 : index
    %70 = vector.load %arg4[%c6, %c0_52, %c0_53] : memref<9x32x16xbf16, #tpu.memory_space<vmem>>, vector<1x32x16xbf16>
    %71 = vector.shape_cast %70 : vector<1x32x16xbf16> to vector<32x16xbf16>
    %cst_54 = arith.constant dense<0.000000e+00> : vector<64x16xf32>
    %72 = tpu.matmul %69, %71, %cst_54 {dimension_numbers = #tpu.dot_dimension_numbers<[1], [0], [0], [1], [0, 0, 1, 1], [], []>} : vector<64x32xbf16>, vector<32x16xbf16>, vector<64x16xf32> -> vector<64x16xf32>
    %73 = arith.addf %63, %72 : vector<64x16xf32>
    %c24 = arith.constant 24 : index
    %c0_55 = arith.constant 0 : index
    %74 = vector.load %arg9[%c24, %c0_55] : memref<96x32xf32, #tpu.memory_space<vmem>>, vector<64x32xf32>
    %75 = arith.truncf %74 : vector<64x32xf32> to vector<64x32xbf16>
    %c7_56 = arith.constant 7 : index
    %c0_57 = arith.constant 0 : index
    %c0_58 = arith.constant 0 : index
    %76 = vector.load %arg4[%c7_56, %c0_57, %c0_58] : memref<9x32x16xbf16, #tpu.memory_space<vmem>>, vector<1x32x16xbf16>
    %77 = vector.shape_cast %76 : vector<1x32x16xbf16> to vector<32x16xbf16>
    %cst_59 = arith.constant dense<0.000000e+00> : vector<64x16xf32>
    %78 = tpu.matmul %75, %77, %cst_59 {dimension_numbers = #tpu.dot_dimension_numbers<[1], [0], [0], [1], [0, 0, 1, 1], [], []>} : vector<64x32xbf16>, vector<32x16xbf16>, vector<64x16xf32> -> vector<64x16xf32>
    %79 = arith.addf %73, %78 : vector<64x16xf32>
    %c25 = arith.constant 25 : index
    %c0_60 = arith.constant 0 : index
    %80 = vector.load %arg9[%c25, %c0_60] : memref<96x32xf32, #tpu.memory_space<vmem>>, vector<64x32xf32>
    %c1_61 = arith.constant 1 : index
    %c0_62 = arith.constant 0 : index
    %c0_63 = arith.constant 0 : index
    %81 = vector.load %arg3[%c1_61, %c0_62, %c0_63] : memref<2x64x1xf32, #tpu.memory_space<vmem>>, vector<1x64x1xf32>
    %82 = vector.shape_cast %81 : vector<1x64x1xf32> to vector<64x1xf32>
    %83 = vector.broadcast %82 : vector<64x1xf32> to vector<64x32xf32>
    %84 = arith.mulf %80, %83 : vector<64x32xf32>
    %85 = arith.truncf %84 : vector<64x32xf32> to vector<64x32xbf16>
    %c8_64 = arith.constant 8 : index
    %c0_65 = arith.constant 0 : index
    %c0_66 = arith.constant 0 : index
    %86 = vector.load %arg4[%c8_64, %c0_65, %c0_66] : memref<9x32x16xbf16, #tpu.memory_space<vmem>>, vector<1x32x16xbf16>
    %87 = vector.shape_cast %86 : vector<1x32x16xbf16> to vector<32x16xbf16>
    %cst_67 = arith.constant dense<0.000000e+00> : vector<64x16xf32>
    %88 = tpu.matmul %85, %87, %cst_67 {dimension_numbers = #tpu.dot_dimension_numbers<[1], [0], [0], [1], [0, 0, 1, 1], [], []>} : vector<64x32xbf16>, vector<32x16xbf16>, vector<64x16xf32> -> vector<64x16xf32>
    %89 = arith.addf %79, %88 : vector<64x16xf32>
    %c0_68 = arith.constant 0 : index
    %c0_69 = arith.constant 0 : index
    %90 = vector.load %arg5[%c0_68, %c0_69] : memref<1x16xf32, #tpu.memory_space<vmem>>, vector<1x16xf32>
    %91 = vector.broadcast %90 : vector<1x16xf32> to vector<64x16xf32>
    %92 = arith.addf %89, %91 : vector<64x16xf32>
    %cst_70 = arith.constant 0.000000e+00 : f32
    %93 = vector.broadcast %cst_70 : f32 to vector<16x16xf32>
    %c0_71 = arith.constant 0 : index
    %c0_72 = arith.constant 0 : index
    %94 = vector.load %arg10[%c0_71, %c0_72] : memref<96x16xf32, #tpu.memory_space<vmem>>, vector<16x16xf32>
    tpu.vector_store %arg10[%c0_71, %c0_72], %93 {strides = array<i32>} : memref<96x16xf32, #tpu.memory_space<vmem>>, vector<16x16xf32>,
    %c80_73 = arith.constant 80 : index
    %c0_74 = arith.constant 0 : index
    %95 = vector.load %arg10[%c80_73, %c0_74] : memref<96x16xf32, #tpu.memory_space<vmem>>, vector<16x16xf32>
    tpu.vector_store %arg10[%c80_73, %c0_74], %93 {strides = array<i32>} : memref<96x16xf32, #tpu.memory_space<vmem>>, vector<16x16xf32>,
    %c16_75 = arith.constant 16 : index
    %c0_76 = arith.constant 0 : index
    %96 = vector.load %arg10[%c16_75, %c0_76] : memref<96x16xf32, #tpu.memory_space<vmem>>, vector<64x16xf32>
    tpu.vector_store %arg10[%c16_75, %c0_76], %92 {strides = array<i32>} : memref<96x16xf32, #tpu.memory_space<vmem>>, vector<64x16xf32>,
    %cst_77 = arith.constant 0.000000e+00 : f32
    %97 = vector.broadcast %cst_77 : f32 to vector<64x32xf32>
    %c7_78 = arith.constant 7 : index
    %c0_79 = arith.constant 0 : index
    %98 = vector.load %arg10[%c7_78, %c0_79] : memref<96x16xf32, #tpu.memory_space<vmem>>, vector<64x16xf32>
    %c0_80 = arith.constant 0 : index
    %c0_81 = arith.constant 0 : index
    %c0_82 = arith.constant 0 : index
    %99 = vector.load %arg3[%c0_80, %c0_81, %c0_82] : memref<2x64x1xf32, #tpu.memory_space<vmem>>, vector<1x64x1xf32>
    %100 = vector.shape_cast %99 : vector<1x64x1xf32> to vector<64x1xf32>
    %101 = vector.broadcast %100 : vector<64x1xf32> to vector<64x16xf32>
    %102 = arith.mulf %98, %101 : vector<64x16xf32>
    %103 = arith.truncf %102 : vector<64x16xf32> to vector<64x16xbf16>
    %c0_83 = arith.constant 0 : index
    %c0_84 = arith.constant 0 : index
    %c0_85 = arith.constant 0 : index
    %104 = vector.load %arg6[%c0_83, %c0_84, %c0_85] : memref<9x16x32xbf16, #tpu.memory_space<vmem>>, vector<1x16x32xbf16>
    %105 = vector.shape_cast %104 : vector<1x16x32xbf16> to vector<16x32xbf16>
    %cst_86 = arith.constant dense<0.000000e+00> : vector<64x32xf32>
    %106 = tpu.matmul %103, %105, %cst_86 {dimension_numbers = #tpu.dot_dimension_numbers<[1], [0], [0], [1], [0, 0, 1, 1], [], []>} : vector<64x16xbf16>, vector<16x32xbf16>, vector<64x32xf32> -> vector<64x32xf32>
    %107 = arith.addf %97, %106 : vector<64x32xf32>
    %c8_87 = arith.constant 8 : index
    %c0_88 = arith.constant 0 : index
    %108 = vector.load %arg10[%c8_87, %c0_88] : memref<96x16xf32, #tpu.memory_space<vmem>>, vector<64x16xf32>
    %109 = arith.truncf %108 : vector<64x16xf32> to vector<64x16xbf16>
    %c1_89 = arith.constant 1 : index
    %c0_90 = arith.constant 0 : index
    %c0_91 = arith.constant 0 : index
    %110 = vector.load %arg6[%c1_89, %c0_90, %c0_91] : memref<9x16x32xbf16, #tpu.memory_space<vmem>>, vector<1x16x32xbf16>
    %111 = vector.shape_cast %110 : vector<1x16x32xbf16> to vector<16x32xbf16>
    %cst_92 = arith.constant dense<0.000000e+00> : vector<64x32xf32>
    %112 = tpu.matmul %109, %111, %cst_92 {dimension_numbers = #tpu.dot_dimension_numbers<[1], [0], [0], [1], [0, 0, 1, 1], [], []>} : vector<64x16xbf16>, vector<16x32xbf16>, vector<64x32xf32> -> vector<64x32xf32>
    %113 = arith.addf %107, %112 : vector<64x32xf32>
    %c9_93 = arith.constant 9 : index
    %c0_94 = arith.constant 0 : index
    %114 = vector.load %arg10[%c9_93, %c0_94] : memref<96x16xf32, #tpu.memory_space<vmem>>, vector<64x16xf32>
    %c1_95 = arith.constant 1 : index
    %c0_96 = arith.constant 0 : index
    %c0_97 = arith.constant 0 : index
    %115 = vector.load %arg3[%c1_95, %c0_96, %c0_97] : memref<2x64x1xf32, #tpu.memory_space<vmem>>, vector<1x64x1xf32>
    %116 = vector.shape_cast %115 : vector<1x64x1xf32> to vector<64x1xf32>
    %117 = vector.broadcast %116 : vector<64x1xf32> to vector<64x16xf32>
    %118 = arith.mulf %114, %117 : vector<64x16xf32>
    %119 = arith.truncf %118 : vector<64x16xf32> to vector<64x16xbf16>
    %c2_98 = arith.constant 2 : index
    %c0_99 = arith.constant 0 : index
    %c0_100 = arith.constant 0 : index
    %120 = vector.load %arg6[%c2_98, %c0_99, %c0_100] : memref<9x16x32xbf16, #tpu.memory_space<vmem>>, vector<1x16x32xbf16>
    %121 = vector.shape_cast %120 : vector<1x16x32xbf16> to vector<16x32xbf16>
    %cst_101 = arith.constant dense<0.000000e+00> : vector<64x32xf32>
    %122 = tpu.matmul %119, %121, %cst_101 {dimension_numbers = #tpu.dot_dimension_numbers<[1], [0], [0], [1], [0, 0, 1, 1], [], []>} : vector<64x16xbf16>, vector<16x32xbf16>, vector<64x32xf32> -> vector<64x32xf32>
    %123 = arith.addf %113, %122 : vector<64x32xf32>
    %c15_102 = arith.constant 15 : index
    %c0_103 = arith.constant 0 : index
    %124 = vector.load %arg10[%c15_102, %c0_103] : memref<96x16xf32, #tpu.memory_space<vmem>>, vector<64x16xf32>
    %c0_104 = arith.constant 0 : index
    %c0_105 = arith.constant 0 : index
    %c0_106 = arith.constant 0 : index
    %125 = vector.load %arg3[%c0_104, %c0_105, %c0_106] : memref<2x64x1xf32, #tpu.memory_space<vmem>>, vector<1x64x1xf32>
    %126 = vector.shape_cast %125 : vector<1x64x1xf32> to vector<64x1xf32>
    %127 = vector.broadcast %126 : vector<64x1xf32> to vector<64x16xf32>
    %128 = arith.mulf %124, %127 : vector<64x16xf32>
    %129 = arith.truncf %128 : vector<64x16xf32> to vector<64x16xbf16>
    %c3_107 = arith.constant 3 : index
    %c0_108 = arith.constant 0 : index
    %c0_109 = arith.constant 0 : index
    %130 = vector.load %arg6[%c3_107, %c0_108, %c0_109] : memref<9x16x32xbf16, #tpu.memory_space<vmem>>, vector<1x16x32xbf16>
    %131 = vector.shape_cast %130 : vector<1x16x32xbf16> to vector<16x32xbf16>
    %cst_110 = arith.constant dense<0.000000e+00> : vector<64x32xf32>
    %132 = tpu.matmul %129, %131, %cst_110 {dimension_numbers = #tpu.dot_dimension_numbers<[1], [0], [0], [1], [0, 0, 1, 1], [], []>} : vector<64x16xbf16>, vector<16x32xbf16>, vector<64x32xf32> -> vector<64x32xf32>
    %133 = arith.addf %123, %132 : vector<64x32xf32>
    %c16_111 = arith.constant 16 : index
    %c0_112 = arith.constant 0 : index
    %134 = vector.load %arg10[%c16_111, %c0_112] : memref<96x16xf32, #tpu.memory_space<vmem>>, vector<64x16xf32>
    %135 = arith.truncf %134 : vector<64x16xf32> to vector<64x16xbf16>
    %c4_113 = arith.constant 4 : index
    %c0_114 = arith.constant 0 : index
    %c0_115 = arith.constant 0 : index
    %136 = vector.load %arg6[%c4_113, %c0_114, %c0_115] : memref<9x16x32xbf16, #tpu.memory_space<vmem>>, vector<1x16x32xbf16>
    %137 = vector.shape_cast %136 : vector<1x16x32xbf16> to vector<16x32xbf16>
    %cst_116 = arith.constant dense<0.000000e+00> : vector<64x32xf32>
    %138 = tpu.matmul %135, %137, %cst_116 {dimension_numbers = #tpu.dot_dimension_numbers<[1], [0], [0], [1], [0, 0, 1, 1], [], []>} : vector<64x16xbf16>, vector<16x32xbf16>, vector<64x32xf32> -> vector<64x32xf32>
    %139 = arith.addf %133, %138 : vector<64x32xf32>
    %c17_117 = arith.constant 17 : index
    %c0_118 = arith.constant 0 : index
    %140 = vector.load %arg10[%c17_117, %c0_118] : memref<96x16xf32, #tpu.memory_space<vmem>>, vector<64x16xf32>
    %c1_119 = arith.constant 1 : index
    %c0_120 = arith.constant 0 : index
    %c0_121 = arith.constant 0 : index
    %141 = vector.load %arg3[%c1_119, %c0_120, %c0_121] : memref<2x64x1xf32, #tpu.memory_space<vmem>>, vector<1x64x1xf32>
    %142 = vector.shape_cast %141 : vector<1x64x1xf32> to vector<64x1xf32>
    %143 = vector.broadcast %142 : vector<64x1xf32> to vector<64x16xf32>
    %144 = arith.mulf %140, %143 : vector<64x16xf32>
    %145 = arith.truncf %144 : vector<64x16xf32> to vector<64x16xbf16>
    %c5_122 = arith.constant 5 : index
    %c0_123 = arith.constant 0 : index
    %c0_124 = arith.constant 0 : index
    %146 = vector.load %arg6[%c5_122, %c0_123, %c0_124] : memref<9x16x32xbf16, #tpu.memory_space<vmem>>, vector<1x16x32xbf16>
    %147 = vector.shape_cast %146 : vector<1x16x32xbf16> to vector<16x32xbf16>
    %cst_125 = arith.constant dense<0.000000e+00> : vector<64x32xf32>
    %148 = tpu.matmul %145, %147, %cst_125 {dimension_numbers = #tpu.dot_dimension_numbers<[1], [0], [0], [1], [0, 0, 1, 1], [], []>} : vector<64x16xbf16>, vector<16x32xbf16>, vector<64x32xf32> -> vector<64x32xf32>
    %149 = arith.addf %139, %148 : vector<64x32xf32>
    %c23_126 = arith.constant 23 : index
    %c0_127 = arith.constant 0 : index
    %150 = vector.load %arg10[%c23_126, %c0_127] : memref<96x16xf32, #tpu.memory_space<vmem>>, vector<64x16xf32>
    %c0_128 = arith.constant 0 : index
    %c0_129 = arith.constant 0 : index
    %c0_130 = arith.constant 0 : index
    %151 = vector.load %arg3[%c0_128, %c0_129, %c0_130] : memref<2x64x1xf32, #tpu.memory_space<vmem>>, vector<1x64x1xf32>
    %152 = vector.shape_cast %151 : vector<1x64x1xf32> to vector<64x1xf32>
    %153 = vector.broadcast %152 : vector<64x1xf32> to vector<64x16xf32>
    %154 = arith.mulf %150, %153 : vector<64x16xf32>
    %155 = arith.truncf %154 : vector<64x16xf32> to vector<64x16xbf16>
    %c6_131 = arith.constant 6 : index
    %c0_132 = arith.constant 0 : index
    %c0_133 = arith.constant 0 : index
    %156 = vector.load %arg6[%c6_131, %c0_132, %c0_133] : memref<9x16x32xbf16, #tpu.memory_space<vmem>>, vector<1x16x32xbf16>
    %157 = vector.shape_cast %156 : vector<1x16x32xbf16> to vector<16x32xbf16>
    %cst_134 = arith.constant dense<0.000000e+00> : vector<64x32xf32>
    %158 = tpu.matmul %155, %157, %cst_134 {dimension_numbers = #tpu.dot_dimension_numbers<[1], [0], [0], [1], [0, 0, 1, 1], [], []>} : vector<64x16xbf16>, vector<16x32xbf16>, vector<64x32xf32> -> vector<64x32xf32>
    %159 = arith.addf %149, %158 : vector<64x32xf32>
    %c24_135 = arith.constant 24 : index
    %c0_136 = arith.constant 0 : index
    %160 = vector.load %arg10[%c24_135, %c0_136] : memref<96x16xf32, #tpu.memory_space<vmem>>, vector<64x16xf32>
    %161 = arith.truncf %160 : vector<64x16xf32> to vector<64x16xbf16>
    %c7_137 = arith.constant 7 : index
    %c0_138 = arith.constant 0 : index
    %c0_139 = arith.constant 0 : index
    %162 = vector.load %arg6[%c7_137, %c0_138, %c0_139] : memref<9x16x32xbf16, #tpu.memory_space<vmem>>, vector<1x16x32xbf16>
    %163 = vector.shape_cast %162 : vector<1x16x32xbf16> to vector<16x32xbf16>
    %cst_140 = arith.constant dense<0.000000e+00> : vector<64x32xf32>
    %164 = tpu.matmul %161, %163, %cst_140 {dimension_numbers = #tpu.dot_dimension_numbers<[1], [0], [0], [1], [0, 0, 1, 1], [], []>} : vector<64x16xbf16>, vector<16x32xbf16>, vector<64x32xf32> -> vector<64x32xf32>
    %165 = arith.addf %159, %164 : vector<64x32xf32>
    %c25_141 = arith.constant 25 : index
    %c0_142 = arith.constant 0 : index
    %166 = vector.load %arg10[%c25_141, %c0_142] : memref<96x16xf32, #tpu.memory_space<vmem>>, vector<64x16xf32>
    %c1_143 = arith.constant 1 : index
    %c0_144 = arith.constant 0 : index
    %c0_145 = arith.constant 0 : index
    %167 = vector.load %arg3[%c1_143, %c0_144, %c0_145] : memref<2x64x1xf32, #tpu.memory_space<vmem>>, vector<1x64x1xf32>
    %168 = vector.shape_cast %167 : vector<1x64x1xf32> to vector<64x1xf32>
    %169 = vector.broadcast %168 : vector<64x1xf32> to vector<64x16xf32>
    %170 = arith.mulf %166, %169 : vector<64x16xf32>
    %171 = arith.truncf %170 : vector<64x16xf32> to vector<64x16xbf16>
    %c8_146 = arith.constant 8 : index
    %c0_147 = arith.constant 0 : index
    %c0_148 = arith.constant 0 : index
    %172 = vector.load %arg6[%c8_146, %c0_147, %c0_148] : memref<9x16x32xbf16, #tpu.memory_space<vmem>>, vector<1x16x32xbf16>
    %173 = vector.shape_cast %172 : vector<1x16x32xbf16> to vector<16x32xbf16>
    %cst_149 = arith.constant dense<0.000000e+00> : vector<64x32xf32>
    %174 = tpu.matmul %171, %173, %cst_149 {dimension_numbers = #tpu.dot_dimension_numbers<[1], [0], [0], [1], [0, 0, 1, 1], [], []>} : vector<64x16xbf16>, vector<16x32xbf16>, vector<64x32xf32> -> vector<64x32xf32>
    %175 = arith.addf %165, %174 : vector<64x32xf32>
    %c0_150 = arith.constant 0 : index
    %c0_151 = arith.constant 0 : index
    %176 = vector.load %arg7[%c0_150, %c0_151] : memref<1x32xf32, #tpu.memory_space<vmem>>, vector<1x32xf32>
    %177 = vector.broadcast %176 : vector<1x32xf32> to vector<64x32xf32>
    %178 = arith.addf %175, %177 : vector<64x32xf32>
    %179 = arith.negf %178 : vector<64x32xf32>
    %180 = math.exp %179 : vector<64x32xf32>
    %cst_152 = arith.constant 1.000000e+00 : f32
    %181 = vector.broadcast %cst_152 : f32 to vector<64x32xf32>
    %182 = arith.addf %181, %180 : vector<64x32xf32>
    %183 = arith.divf %181, %182 : vector<64x32xf32>
    %184 = vector.extract_strided_slice %183 {offsets = [0, 0], sizes = [64, 16], strides = [1, 1]} : vector<64x32xf32> to vector<64x16xf32>
    %185 = vector.extract_strided_slice %183 {offsets = [0, 16], sizes = [64, 16], strides = [1, 1]} : vector<64x32xf32> to vector<64x16xf32>
    %186 = arith.mulf %2, %184 : vector<64x16xf32>
    %187 = arith.mulf %185, %5 : vector<64x16xf32>
    %188 = arith.addf %186, %187 : vector<64x16xf32>
    %189 = tpu.weird %188 : vector<64x16xf32> -> vector<64x16xi1>
    %cst_153 = arith.constant dense<true> : vector<64x16xi1>
    %190 = arith.xori %189, %cst_153 : vector<64x16xi1>
    %cst_154 = arith.constant 9.99999974E-6 : f32
    %191 = vector.broadcast %cst_154 : f32 to vector<64x16xf32>
    %192 = arith.select %190, %188, %191 : vector<64x16xi1>, vector<64x16xf32>
    %c0_155 = arith.constant 0 : index
    %c0_156 = arith.constant 0 : index
    %c0_157 = arith.constant 0 : index
    %193 = vector.load %arg8[%c0_155, %c0_156, %c0_157] : memref<1x64x16xf32, #tpu.memory_space<vmem>>, vector<1x64x16xf32>
    %194 = vector.shape_cast %193 : vector<1x64x16xf32> to vector<64x16xf32>
    %195 = vector.shape_cast %192 : vector<64x16xf32> to vector<1x64x16xf32>
    tpu.vector_store %arg8[%c0_155, %c0_156, %c0_157], %195 {strides = array<i32>} : memref<1x64x16xf32, #tpu.memory_space<vmem>>, vector<1x64x16xf32>,
    return
  }
  func.func @transform_0(%arg0: i32) -> (i32, i32, i32) {
    %c0_i32 = arith.constant 0 : i32
    %c0_i32_0 = arith.constant 0 : i32
    %c0_i32_1 = arith.constant 0 : i32
    return %arg0, %c0_i32, %c0_i32_0 : i32, i32, i32
  }
  func.func @transform_1(%arg0: i32) -> (i32, i32, i32) {
    %c0_i32 = arith.constant 0 : i32
    %c0_i32_0 = arith.constant 0 : i32
    %c0_i32_1 = arith.constant 0 : i32
    return %arg0, %c0_i32, %c0_i32_0 : i32, i32, i32
  }
  func.func @transform_2(%arg0: i32) -> (i32, i32, i32) {
    %c0_i32 = arith.constant 0 : i32
    %c0_i32_0 = arith.constant 0 : i32
    %c0_i32_1 = arith.constant 0 : i32
    %c0_i32_2 = arith.constant 0 : i32
    return %c0_i32, %c0_i32_0, %c0_i32_1 : i32, i32, i32
  }
  func.func @transform_3(%arg0: i32) -> (i32, i32, i32) {
    %c0_i32 = arith.constant 0 : i32
    %c0_i32_0 = arith.constant 0 : i32
    %c0_i32_1 = arith.constant 0 : i32
    %c0_i32_2 = arith.constant 0 : i32
    return %c0_i32, %c0_i32_0, %c0_i32_1 : i32, i32, i32
  }
  func.func @transform_4(%arg0: i32) -> (i32, i32) {
    %c0_i32 = arith.constant 0 : i32
    %c0_i32_0 = arith.constant 0 : i32
    %c0_i32_1 = arith.constant 0 : i32
    return %c0_i32, %c0_i32_0 : i32, i32
  }
  func.func @transform_5(%arg0: i32) -> (i32, i32, i32) {
    %c0_i32 = arith.constant 0 : i32
    %c0_i32_0 = arith.constant 0 : i32
    %c0_i32_1 = arith.constant 0 : i32
    %c0_i32_2 = arith.constant 0 : i32
    return %c0_i32, %c0_i32_0, %c0_i32_1 : i32, i32, i32
  }
  func.func @transform_6(%arg0: i32) -> (i32, i32) {
    %c0_i32 = arith.constant 0 : i32
    %c0_i32_0 = arith.constant 0 : i32
    %c0_i32_1 = arith.constant 0 : i32
    return %c0_i32, %c0_i32_0 : i32, i32
  }
  func.func @transform_7(%arg0: i32) -> (i32, i32, i32) {
    %c0_i32 = arith.constant 0 : i32
    %c0_i32_0 = arith.constant 0 : i32
    %c0_i32_1 = arith.constant 0 : i32
    return %arg0, %c0_i32, %c0_i32_0 : i32, i32, i32
  }
}

module attributes {stable_mosaic.version = 11 : i64} {
  func.func @_attention_kernel(%arg0: i32, %arg1: memref<1x64x16xbf16, #tpu.memory_space<vmem>>, %arg2: memref<1x64x16xbf16, #tpu.memory_space<vmem>>, %arg3: memref<2x64x1xf32, #tpu.memory_space<vmem>>, %arg4: memref<9x16x16xbf16, #tpu.memory_space<vmem>>, %arg5: memref<9x16x32xbf16, #tpu.memory_space<vmem>>, %arg6: memref<16x16xbf16, #tpu.memory_space<vmem>>, %arg7: memref<1x16xf32, #tpu.memory_space<vmem>>, %arg8: memref<16x16xf32, #tpu.memory_space<vmem>>, %arg9: memref<1x64x16xbf16, #tpu.memory_space<vmem>>, %arg10: memref<96x16xf32, #tpu.memory_space<vmem>>, %arg11: memref<96x16xf32, #tpu.memory_space<vmem>>) attributes {dimension_semantics = [#tpu.dimension_semantics<parallel>], iteration_bounds = array<i64: 2>, scalar_prefetch = 0 : i64, scratch_operands = 2 : i64, tpu.core_type = #tpu.core_type<tc>, window_params = [{transform_indices = @transform_0, window_bounds = array<i64: 1, 64, 16>}, {transform_indices = @transform_1, window_bounds = array<i64: 1, 64, 16>}, {pipeline_mode = #tpu.pipeline_mode<synchronous>, transform_indices = @transform_2, window_bounds = array<i64: 2, 64, 1>}, {pipeline_mode = #tpu.pipeline_mode<synchronous>, transform_indices = @transform_3, window_bounds = array<i64: 9, 16, 16>}, {pipeline_mode = #tpu.pipeline_mode<synchronous>, transform_indices = @transform_4, window_bounds = array<i64: 9, 16, 32>}, {pipeline_mode = #tpu.pipeline_mode<synchronous>, transform_indices = @transform_5, window_bounds = array<i64: 16, 16>}, {pipeline_mode = #tpu.pipeline_mode<synchronous>, transform_indices = @transform_6, window_bounds = array<i64: 1, 16>}, {pipeline_mode = #tpu.pipeline_mode<synchronous>, transform_indices = @transform_7, window_bounds = array<i64: 16, 16>}, {transform_indices = @transform_8, window_bounds = array<i64: 1, 64, 16>}]} {
    %c0 = arith.constant 0 : index
    %c0_0 = arith.constant 0 : index
    %c0_1 = arith.constant 0 : index
    %0 = vector.load %arg1[%c0, %c0_0, %c0_1] : memref<1x64x16xbf16, #tpu.memory_space<vmem>>, vector<1x64x16xbf16>
    %1 = vector.shape_cast %0 : vector<1x64x16xbf16> to vector<64x16xbf16>
    %2 = arith.extf %1 : vector<64x16xbf16> to vector<64x16xf32>
    %cst = arith.constant 0.000000e+00 : f32
    %3 = vector.broadcast %cst : f32 to vector<16x16xf32>
    %c0_2 = arith.constant 0 : index
    %c0_3 = arith.constant 0 : index
    %4 = vector.load %arg10[%c0_2, %c0_3] : memref<96x16xf32, #tpu.memory_space<vmem>>, vector<16x16xf32>
    tpu.vector_store %arg10[%c0_2, %c0_3], %3 {strides = array<i32>} : memref<96x16xf32, #tpu.memory_space<vmem>>, vector<16x16xf32>,
    %c80 = arith.constant 80 : index
    %c0_4 = arith.constant 0 : index
    %5 = vector.load %arg10[%c80, %c0_4] : memref<96x16xf32, #tpu.memory_space<vmem>>, vector<16x16xf32>
    tpu.vector_store %arg10[%c80, %c0_4], %3 {strides = array<i32>} : memref<96x16xf32, #tpu.memory_space<vmem>>, vector<16x16xf32>,
    %c16 = arith.constant 16 : index
    %c0_5 = arith.constant 0 : index
    %6 = vector.load %arg10[%c16, %c0_5] : memref<96x16xf32, #tpu.memory_space<vmem>>, vector<64x16xf32>
    tpu.vector_store %arg10[%c16, %c0_5], %2 {strides = array<i32>} : memref<96x16xf32, #tpu.memory_space<vmem>>, vector<64x16xf32>,
    %c0_6 = arith.constant 0 : index
    %c0_7 = arith.constant 0 : index
    %c0_8 = arith.constant 0 : index
    %7 = vector.load %arg2[%c0_6, %c0_7, %c0_8] : memref<1x64x16xbf16, #tpu.memory_space<vmem>>, vector<1x64x16xbf16>
    %8 = vector.shape_cast %7 : vector<1x64x16xbf16> to vector<64x16xbf16>
    %9 = arith.extf %8 : vector<64x16xbf16> to vector<64x16xf32>
    %cst_9 = arith.constant 0.000000e+00 : f32
    %10 = vector.broadcast %cst_9 : f32 to vector<16x16xf32>
    %c0_10 = arith.constant 0 : index
    %c0_11 = arith.constant 0 : index
    %11 = vector.load %arg11[%c0_10, %c0_11] : memref<96x16xf32, #tpu.memory_space<vmem>>, vector<16x16xf32>
    tpu.vector_store %arg11[%c0_10, %c0_11], %10 {strides = array<i32>} : memref<96x16xf32, #tpu.memory_space<vmem>>, vector<16x16xf32>,
    %c80_12 = arith.constant 80 : index
    %c0_13 = arith.constant 0 : index
    %12 = vector.load %arg11[%c80_12, %c0_13] : memref<96x16xf32, #tpu.memory_space<vmem>>, vector<16x16xf32>
    tpu.vector_store %arg11[%c80_12, %c0_13], %10 {strides = array<i32>} : memref<96x16xf32, #tpu.memory_space<vmem>>, vector<16x16xf32>,
    %c16_14 = arith.constant 16 : index
    %c0_15 = arith.constant 0 : index
    %13 = vector.load %arg11[%c16_14, %c0_15] : memref<96x16xf32, #tpu.memory_space<vmem>>, vector<64x16xf32>
    tpu.vector_store %arg11[%c16_14, %c0_15], %9 {strides = array<i32>} : memref<96x16xf32, #tpu.memory_space<vmem>>, vector<64x16xf32>,
    %cst_16 = arith.constant 0.000000e+00 : f32
    %14 = vector.broadcast %cst_16 : f32 to vector<64x16xf32>
    %cst_17 = arith.constant 0.000000e+00 : f32
    %15 = vector.broadcast %cst_17 : f32 to vector<64x32xf32>
    %c7 = arith.constant 7 : index
    %c0_18 = arith.constant 0 : index
    %16 = vector.load %arg10[%c7, %c0_18] : memref<96x16xf32, #tpu.memory_space<vmem>>, vector<64x16xf32>
    %c0_19 = arith.constant 0 : index
    %c0_20 = arith.constant 0 : index
    %c0_21 = arith.constant 0 : index
    %17 = vector.load %arg3[%c0_19, %c0_20, %c0_21] : memref<2x64x1xf32, #tpu.memory_space<vmem>>, vector<1x64x1xf32>
    %18 = vector.shape_cast %17 : vector<1x64x1xf32> to vector<64x1xf32>
    %19 = vector.broadcast %18 : vector<64x1xf32> to vector<64x16xf32>
    %20 = arith.mulf %16, %19 : vector<64x16xf32>
    %21 = arith.truncf %20 : vector<64x16xf32> to vector<64x16xbf16>
    %c7_22 = arith.constant 7 : index
    %c0_23 = arith.constant 0 : index
    %22 = vector.load %arg11[%c7_22, %c0_23] : memref<96x16xf32, #tpu.memory_space<vmem>>, vector<64x16xf32>
    %c0_24 = arith.constant 0 : index
    %c0_25 = arith.constant 0 : index
    %c0_26 = arith.constant 0 : index
    %23 = vector.load %arg3[%c0_24, %c0_25, %c0_26] : memref<2x64x1xf32, #tpu.memory_space<vmem>>, vector<1x64x1xf32>
    %24 = vector.shape_cast %23 : vector<1x64x1xf32> to vector<64x1xf32>
    %25 = vector.broadcast %24 : vector<64x1xf32> to vector<64x16xf32>
    %26 = arith.mulf %22, %25 : vector<64x16xf32>
    %27 = arith.truncf %26 : vector<64x16xf32> to vector<64x16xbf16>
    %c0_27 = arith.constant 0 : index
    %c0_28 = arith.constant 0 : index
    %c0_29 = arith.constant 0 : index
    %28 = vector.load %arg4[%c0_27, %c0_28, %c0_29] : memref<9x16x16xbf16, #tpu.memory_space<vmem>>, vector<1x16x16xbf16>
    %29 = vector.shape_cast %28 : vector<1x16x16xbf16> to vector<16x16xbf16>
    %cst_30 = arith.constant dense<0.000000e+00> : vector<64x16xf32>
    %30 = tpu.matmul %21, %29, %cst_30 {dimension_numbers = #tpu.dot_dimension_numbers<[1], [0], [0], [1], [0, 0, 1, 1], [], []>} : vector<64x16xbf16>, vector<16x16xbf16>, vector<64x16xf32> -> vector<64x16xf32>
    %31 = arith.addf %14, %30 : vector<64x16xf32>
    %c0_31 = arith.constant 0 : index
    %c0_32 = arith.constant 0 : index
    %c0_33 = arith.constant 0 : index
    %32 = vector.load %arg5[%c0_31, %c0_32, %c0_33] : memref<9x16x32xbf16, #tpu.memory_space<vmem>>, vector<1x16x32xbf16>
    %33 = vector.shape_cast %32 : vector<1x16x32xbf16> to vector<16x32xbf16>
    %cst_34 = arith.constant dense<0.000000e+00> : vector<64x32xf32>
    %34 = tpu.matmul %27, %33, %cst_34 {dimension_numbers = #tpu.dot_dimension_numbers<[1], [0], [0], [1], [0, 0, 1, 1], [], []>} : vector<64x16xbf16>, vector<16x32xbf16>, vector<64x32xf32> -> vector<64x32xf32>
    %35 = arith.addf %15, %34 : vector<64x32xf32>
    %c8 = arith.constant 8 : index
    %c0_35 = arith.constant 0 : index
    %36 = vector.load %arg10[%c8, %c0_35] : memref<96x16xf32, #tpu.memory_space<vmem>>, vector<64x16xf32>
    %37 = arith.truncf %36 : vector<64x16xf32> to vector<64x16xbf16>
    %c8_36 = arith.constant 8 : index
    %c0_37 = arith.constant 0 : index
    %38 = vector.load %arg11[%c8_36, %c0_37] : memref<96x16xf32, #tpu.memory_space<vmem>>, vector<64x16xf32>
    %39 = arith.truncf %38 : vector<64x16xf32> to vector<64x16xbf16>
    %c1 = arith.constant 1 : index
    %c0_38 = arith.constant 0 : index
    %c0_39 = arith.constant 0 : index
    %40 = vector.load %arg4[%c1, %c0_38, %c0_39] : memref<9x16x16xbf16, #tpu.memory_space<vmem>>, vector<1x16x16xbf16>
    %41 = vector.shape_cast %40 : vector<1x16x16xbf16> to vector<16x16xbf16>
    %cst_40 = arith.constant dense<0.000000e+00> : vector<64x16xf32>
    %42 = tpu.matmul %37, %41, %cst_40 {dimension_numbers = #tpu.dot_dimension_numbers<[1], [0], [0], [1], [0, 0, 1, 1], [], []>} : vector<64x16xbf16>, vector<16x16xbf16>, vector<64x16xf32> -> vector<64x16xf32>
    %43 = arith.addf %31, %42 : vector<64x16xf32>
    %c1_41 = arith.constant 1 : index
    %c0_42 = arith.constant 0 : index
    %c0_43 = arith.constant 0 : index
    %44 = vector.load %arg5[%c1_41, %c0_42, %c0_43] : memref<9x16x32xbf16, #tpu.memory_space<vmem>>, vector<1x16x32xbf16>
    %45 = vector.shape_cast %44 : vector<1x16x32xbf16> to vector<16x32xbf16>
    %cst_44 = arith.constant dense<0.000000e+00> : vector<64x32xf32>
    %46 = tpu.matmul %39, %45, %cst_44 {dimension_numbers = #tpu.dot_dimension_numbers<[1], [0], [0], [1], [0, 0, 1, 1], [], []>} : vector<64x16xbf16>, vector<16x32xbf16>, vector<64x32xf32> -> vector<64x32xf32>
    %47 = arith.addf %35, %46 : vector<64x32xf32>
    %c9 = arith.constant 9 : index
    %c0_45 = arith.constant 0 : index
    %48 = vector.load %arg10[%c9, %c0_45] : memref<96x16xf32, #tpu.memory_space<vmem>>, vector<64x16xf32>
    %c1_46 = arith.constant 1 : index
    %c0_47 = arith.constant 0 : index
    %c0_48 = arith.constant 0 : index
    %49 = vector.load %arg3[%c1_46, %c0_47, %c0_48] : memref<2x64x1xf32, #tpu.memory_space<vmem>>, vector<1x64x1xf32>
    %50 = vector.shape_cast %49 : vector<1x64x1xf32> to vector<64x1xf32>
    %51 = vector.broadcast %50 : vector<64x1xf32> to vector<64x16xf32>
    %52 = arith.mulf %48, %51 : vector<64x16xf32>
    %53 = arith.truncf %52 : vector<64x16xf32> to vector<64x16xbf16>
    %c9_49 = arith.constant 9 : index
    %c0_50 = arith.constant 0 : index
    %54 = vector.load %arg11[%c9_49, %c0_50] : memref<96x16xf32, #tpu.memory_space<vmem>>, vector<64x16xf32>
    %c1_51 = arith.constant 1 : index
    %c0_52 = arith.constant 0 : index
    %c0_53 = arith.constant 0 : index
    %55 = vector.load %arg3[%c1_51, %c0_52, %c0_53] : memref<2x64x1xf32, #tpu.memory_space<vmem>>, vector<1x64x1xf32>
    %56 = vector.shape_cast %55 : vector<1x64x1xf32> to vector<64x1xf32>
    %57 = vector.broadcast %56 : vector<64x1xf32> to vector<64x16xf32>
    %58 = arith.mulf %54, %57 : vector<64x16xf32>
    %59 = arith.truncf %58 : vector<64x16xf32> to vector<64x16xbf16>
    %c2 = arith.constant 2 : index
    %c0_54 = arith.constant 0 : index
    %c0_55 = arith.constant 0 : index
    %60 = vector.load %arg4[%c2, %c0_54, %c0_55] : memref<9x16x16xbf16, #tpu.memory_space<vmem>>, vector<1x16x16xbf16>
    %61 = vector.shape_cast %60 : vector<1x16x16xbf16> to vector<16x16xbf16>
    %cst_56 = arith.constant dense<0.000000e+00> : vector<64x16xf32>
    %62 = tpu.matmul %53, %61, %cst_56 {dimension_numbers = #tpu.dot_dimension_numbers<[1], [0], [0], [1], [0, 0, 1, 1], [], []>} : vector<64x16xbf16>, vector<16x16xbf16>, vector<64x16xf32> -> vector<64x16xf32>
    %63 = arith.addf %43, %62 : vector<64x16xf32>
    %c2_57 = arith.constant 2 : index
    %c0_58 = arith.constant 0 : index
    %c0_59 = arith.constant 0 : index
    %64 = vector.load %arg5[%c2_57, %c0_58, %c0_59] : memref<9x16x32xbf16, #tpu.memory_space<vmem>>, vector<1x16x32xbf16>
    %65 = vector.shape_cast %64 : vector<1x16x32xbf16> to vector<16x32xbf16>
    %cst_60 = arith.constant dense<0.000000e+00> : vector<64x32xf32>
    %66 = tpu.matmul %59, %65, %cst_60 {dimension_numbers = #tpu.dot_dimension_numbers<[1], [0], [0], [1], [0, 0, 1, 1], [], []>} : vector<64x16xbf16>, vector<16x32xbf16>, vector<64x32xf32> -> vector<64x32xf32>
    %67 = arith.addf %47, %66 : vector<64x32xf32>
    %c15 = arith.constant 15 : index
    %c0_61 = arith.constant 0 : index
    %68 = vector.load %arg10[%c15, %c0_61] : memref<96x16xf32, #tpu.memory_space<vmem>>, vector<64x16xf32>
    %c0_62 = arith.constant 0 : index
    %c0_63 = arith.constant 0 : index
    %c0_64 = arith.constant 0 : index
    %69 = vector.load %arg3[%c0_62, %c0_63, %c0_64] : memref<2x64x1xf32, #tpu.memory_space<vmem>>, vector<1x64x1xf32>
    %70 = vector.shape_cast %69 : vector<1x64x1xf32> to vector<64x1xf32>
    %71 = vector.broadcast %70 : vector<64x1xf32> to vector<64x16xf32>
    %72 = arith.mulf %68, %71 : vector<64x16xf32>
    %73 = arith.truncf %72 : vector<64x16xf32> to vector<64x16xbf16>
    %c15_65 = arith.constant 15 : index
    %c0_66 = arith.constant 0 : index
    %74 = vector.load %arg11[%c15_65, %c0_66] : memref<96x16xf32, #tpu.memory_space<vmem>>, vector<64x16xf32>
    %c0_67 = arith.constant 0 : index
    %c0_68 = arith.constant 0 : index
    %c0_69 = arith.constant 0 : index
    %75 = vector.load %arg3[%c0_67, %c0_68, %c0_69] : memref<2x64x1xf32, #tpu.memory_space<vmem>>, vector<1x64x1xf32>
    %76 = vector.shape_cast %75 : vector<1x64x1xf32> to vector<64x1xf32>
    %77 = vector.broadcast %76 : vector<64x1xf32> to vector<64x16xf32>
    %78 = arith.mulf %74, %77 : vector<64x16xf32>
    %79 = arith.truncf %78 : vector<64x16xf32> to vector<64x16xbf16>
    %c3 = arith.constant 3 : index
    %c0_70 = arith.constant 0 : index
    %c0_71 = arith.constant 0 : index
    %80 = vector.load %arg4[%c3, %c0_70, %c0_71] : memref<9x16x16xbf16, #tpu.memory_space<vmem>>, vector<1x16x16xbf16>
    %81 = vector.shape_cast %80 : vector<1x16x16xbf16> to vector<16x16xbf16>
    %cst_72 = arith.constant dense<0.000000e+00> : vector<64x16xf32>
    %82 = tpu.matmul %73, %81, %cst_72 {dimension_numbers = #tpu.dot_dimension_numbers<[1], [0], [0], [1], [0, 0, 1, 1], [], []>} : vector<64x16xbf16>, vector<16x16xbf16>, vector<64x16xf32> -> vector<64x16xf32>
    %83 = arith.addf %63, %82 : vector<64x16xf32>
    %c3_73 = arith.constant 3 : index
    %c0_74 = arith.constant 0 : index
    %c0_75 = arith.constant 0 : index
    %84 = vector.load %arg5[%c3_73, %c0_74, %c0_75] : memref<9x16x32xbf16, #tpu.memory_space<vmem>>, vector<1x16x32xbf16>
    %85 = vector.shape_cast %84 : vector<1x16x32xbf16> to vector<16x32xbf16>
    %cst_76 = arith.constant dense<0.000000e+00> : vector<64x32xf32>
    %86 = tpu.matmul %79, %85, %cst_76 {dimension_numbers = #tpu.dot_dimension_numbers<[1], [0], [0], [1], [0, 0, 1, 1], [], []>} : vector<64x16xbf16>, vector<16x32xbf16>, vector<64x32xf32> -> vector<64x32xf32>
    %87 = arith.addf %67, %86 : vector<64x32xf32>
    %c16_77 = arith.constant 16 : index
    %c0_78 = arith.constant 0 : index
    %88 = vector.load %arg10[%c16_77, %c0_78] : memref<96x16xf32, #tpu.memory_space<vmem>>, vector<64x16xf32>
    %89 = arith.truncf %88 : vector<64x16xf32> to vector<64x16xbf16>
    %c16_79 = arith.constant 16 : index
    %c0_80 = arith.constant 0 : index
    %90 = vector.load %arg11[%c16_79, %c0_80] : memref<96x16xf32, #tpu.memory_space<vmem>>, vector<64x16xf32>
    %91 = arith.truncf %90 : vector<64x16xf32> to vector<64x16xbf16>
    %c4 = arith.constant 4 : index
    %c0_81 = arith.constant 0 : index
    %c0_82 = arith.constant 0 : index
    %92 = vector.load %arg4[%c4, %c0_81, %c0_82] : memref<9x16x16xbf16, #tpu.memory_space<vmem>>, vector<1x16x16xbf16>
    %93 = vector.shape_cast %92 : vector<1x16x16xbf16> to vector<16x16xbf16>
    %cst_83 = arith.constant dense<0.000000e+00> : vector<64x16xf32>
    %94 = tpu.matmul %89, %93, %cst_83 {dimension_numbers = #tpu.dot_dimension_numbers<[1], [0], [0], [1], [0, 0, 1, 1], [], []>} : vector<64x16xbf16>, vector<16x16xbf16>, vector<64x16xf32> -> vector<64x16xf32>
    %95 = arith.addf %83, %94 : vector<64x16xf32>
    %c4_84 = arith.constant 4 : index
    %c0_85 = arith.constant 0 : index
    %c0_86 = arith.constant 0 : index
    %96 = vector.load %arg5[%c4_84, %c0_85, %c0_86] : memref<9x16x32xbf16, #tpu.memory_space<vmem>>, vector<1x16x32xbf16>
    %97 = vector.shape_cast %96 : vector<1x16x32xbf16> to vector<16x32xbf16>
    %cst_87 = arith.constant dense<0.000000e+00> : vector<64x32xf32>
    %98 = tpu.matmul %91, %97, %cst_87 {dimension_numbers = #tpu.dot_dimension_numbers<[1], [0], [0], [1], [0, 0, 1, 1], [], []>} : vector<64x16xbf16>, vector<16x32xbf16>, vector<64x32xf32> -> vector<64x32xf32>
    %99 = arith.addf %87, %98 : vector<64x32xf32>
    %c17 = arith.constant 17 : index
    %c0_88 = arith.constant 0 : index
    %100 = vector.load %arg10[%c17, %c0_88] : memref<96x16xf32, #tpu.memory_space<vmem>>, vector<64x16xf32>
    %c1_89 = arith.constant 1 : index
    %c0_90 = arith.constant 0 : index
    %c0_91 = arith.constant 0 : index
    %101 = vector.load %arg3[%c1_89, %c0_90, %c0_91] : memref<2x64x1xf32, #tpu.memory_space<vmem>>, vector<1x64x1xf32>
    %102 = vector.shape_cast %101 : vector<1x64x1xf32> to vector<64x1xf32>
    %103 = vector.broadcast %102 : vector<64x1xf32> to vector<64x16xf32>
    %104 = arith.mulf %100, %103 : vector<64x16xf32>
    %105 = arith.truncf %104 : vector<64x16xf32> to vector<64x16xbf16>
    %c17_92 = arith.constant 17 : index
    %c0_93 = arith.constant 0 : index
    %106 = vector.load %arg11[%c17_92, %c0_93] : memref<96x16xf32, #tpu.memory_space<vmem>>, vector<64x16xf32>
    %c1_94 = arith.constant 1 : index
    %c0_95 = arith.constant 0 : index
    %c0_96 = arith.constant 0 : index
    %107 = vector.load %arg3[%c1_94, %c0_95, %c0_96] : memref<2x64x1xf32, #tpu.memory_space<vmem>>, vector<1x64x1xf32>
    %108 = vector.shape_cast %107 : vector<1x64x1xf32> to vector<64x1xf32>
    %109 = vector.broadcast %108 : vector<64x1xf32> to vector<64x16xf32>
    %110 = arith.mulf %106, %109 : vector<64x16xf32>
    %111 = arith.truncf %110 : vector<64x16xf32> to vector<64x16xbf16>
    %c5 = arith.constant 5 : index
    %c0_97 = arith.constant 0 : index
    %c0_98 = arith.constant 0 : index
    %112 = vector.load %arg4[%c5, %c0_97, %c0_98] : memref<9x16x16xbf16, #tpu.memory_space<vmem>>, vector<1x16x16xbf16>
    %113 = vector.shape_cast %112 : vector<1x16x16xbf16> to vector<16x16xbf16>
    %cst_99 = arith.constant dense<0.000000e+00> : vector<64x16xf32>
    %114 = tpu.matmul %105, %113, %cst_99 {dimension_numbers = #tpu.dot_dimension_numbers<[1], [0], [0], [1], [0, 0, 1, 1], [], []>} : vector<64x16xbf16>, vector<16x16xbf16>, vector<64x16xf32> -> vector<64x16xf32>
    %115 = arith.addf %95, %114 : vector<64x16xf32>
    %c5_100 = arith.constant 5 : index
    %c0_101 = arith.constant 0 : index
    %c0_102 = arith.constant 0 : index
    %116 = vector.load %arg5[%c5_100, %c0_101, %c0_102] : memref<9x16x32xbf16, #tpu.memory_space<vmem>>, vector<1x16x32xbf16>
    %117 = vector.shape_cast %116 : vector<1x16x32xbf16> to vector<16x32xbf16>
    %cst_103 = arith.constant dense<0.000000e+00> : vector<64x32xf32>
    %118 = tpu.matmul %111, %117, %cst_103 {dimension_numbers = #tpu.dot_dimension_numbers<[1], [0], [0], [1], [0, 0, 1, 1], [], []>} : vector<64x16xbf16>, vector<16x32xbf16>, vector<64x32xf32> -> vector<64x32xf32>
    %119 = arith.addf %99, %118 : vector<64x32xf32>
    %c23 = arith.constant 23 : index
    %c0_104 = arith.constant 0 : index
    %120 = vector.load %arg10[%c23, %c0_104] : memref<96x16xf32, #tpu.memory_space<vmem>>, vector<64x16xf32>
    %c0_105 = arith.constant 0 : index
    %c0_106 = arith.constant 0 : index
    %c0_107 = arith.constant 0 : index
    %121 = vector.load %arg3[%c0_105, %c0_106, %c0_107] : memref<2x64x1xf32, #tpu.memory_space<vmem>>, vector<1x64x1xf32>
    %122 = vector.shape_cast %121 : vector<1x64x1xf32> to vector<64x1xf32>
    %123 = vector.broadcast %122 : vector<64x1xf32> to vector<64x16xf32>
    %124 = arith.mulf %120, %123 : vector<64x16xf32>
    %125 = arith.truncf %124 : vector<64x16xf32> to vector<64x16xbf16>
    %c23_108 = arith.constant 23 : index
    %c0_109 = arith.constant 0 : index
    %126 = vector.load %arg11[%c23_108, %c0_109] : memref<96x16xf32, #tpu.memory_space<vmem>>, vector<64x16xf32>
    %c0_110 = arith.constant 0 : index
    %c0_111 = arith.constant 0 : index
    %c0_112 = arith.constant 0 : index
    %127 = vector.load %arg3[%c0_110, %c0_111, %c0_112] : memref<2x64x1xf32, #tpu.memory_space<vmem>>, vector<1x64x1xf32>
    %128 = vector.shape_cast %127 : vector<1x64x1xf32> to vector<64x1xf32>
    %129 = vector.broadcast %128 : vector<64x1xf32> to vector<64x16xf32>
    %130 = arith.mulf %126, %129 : vector<64x16xf32>
    %131 = arith.truncf %130 : vector<64x16xf32> to vector<64x16xbf16>
    %c6 = arith.constant 6 : index
    %c0_113 = arith.constant 0 : index
    %c0_114 = arith.constant 0 : index
    %132 = vector.load %arg4[%c6, %c0_113, %c0_114] : memref<9x16x16xbf16, #tpu.memory_space<vmem>>, vector<1x16x16xbf16>
    %133 = vector.shape_cast %132 : vector<1x16x16xbf16> to vector<16x16xbf16>
    %cst_115 = arith.constant dense<0.000000e+00> : vector<64x16xf32>
    %134 = tpu.matmul %125, %133, %cst_115 {dimension_numbers = #tpu.dot_dimension_numbers<[1], [0], [0], [1], [0, 0, 1, 1], [], []>} : vector<64x16xbf16>, vector<16x16xbf16>, vector<64x16xf32> -> vector<64x16xf32>
    %135 = arith.addf %115, %134 : vector<64x16xf32>
    %c6_116 = arith.constant 6 : index
    %c0_117 = arith.constant 0 : index
    %c0_118 = arith.constant 0 : index
    %136 = vector.load %arg5[%c6_116, %c0_117, %c0_118] : memref<9x16x32xbf16, #tpu.memory_space<vmem>>, vector<1x16x32xbf16>
    %137 = vector.shape_cast %136 : vector<1x16x32xbf16> to vector<16x32xbf16>
    %cst_119 = arith.constant dense<0.000000e+00> : vector<64x32xf32>
    %138 = tpu.matmul %131, %137, %cst_119 {dimension_numbers = #tpu.dot_dimension_numbers<[1], [0], [0], [1], [0, 0, 1, 1], [], []>} : vector<64x16xbf16>, vector<16x32xbf16>, vector<64x32xf32> -> vector<64x32xf32>
    %139 = arith.addf %119, %138 : vector<64x32xf32>
    %c24 = arith.constant 24 : index
    %c0_120 = arith.constant 0 : index
    %140 = vector.load %arg10[%c24, %c0_120] : memref<96x16xf32, #tpu.memory_space<vmem>>, vector<64x16xf32>
    %141 = arith.truncf %140 : vector<64x16xf32> to vector<64x16xbf16>
    %c24_121 = arith.constant 24 : index
    %c0_122 = arith.constant 0 : index
    %142 = vector.load %arg11[%c24_121, %c0_122] : memref<96x16xf32, #tpu.memory_space<vmem>>, vector<64x16xf32>
    %143 = arith.truncf %142 : vector<64x16xf32> to vector<64x16xbf16>
    %c7_123 = arith.constant 7 : index
    %c0_124 = arith.constant 0 : index
    %c0_125 = arith.constant 0 : index
    %144 = vector.load %arg4[%c7_123, %c0_124, %c0_125] : memref<9x16x16xbf16, #tpu.memory_space<vmem>>, vector<1x16x16xbf16>
    %145 = vector.shape_cast %144 : vector<1x16x16xbf16> to vector<16x16xbf16>
    %cst_126 = arith.constant dense<0.000000e+00> : vector<64x16xf32>
    %146 = tpu.matmul %141, %145, %cst_126 {dimension_numbers = #tpu.dot_dimension_numbers<[1], [0], [0], [1], [0, 0, 1, 1], [], []>} : vector<64x16xbf16>, vector<16x16xbf16>, vector<64x16xf32> -> vector<64x16xf32>
    %147 = arith.addf %135, %146 : vector<64x16xf32>
    %c7_127 = arith.constant 7 : index
    %c0_128 = arith.constant 0 : index
    %c0_129 = arith.constant 0 : index
    %148 = vector.load %arg5[%c7_127, %c0_128, %c0_129] : memref<9x16x32xbf16, #tpu.memory_space<vmem>>, vector<1x16x32xbf16>
    %149 = vector.shape_cast %148 : vector<1x16x32xbf16> to vector<16x32xbf16>
    %cst_130 = arith.constant dense<0.000000e+00> : vector<64x32xf32>
    %150 = tpu.matmul %143, %149, %cst_130 {dimension_numbers = #tpu.dot_dimension_numbers<[1], [0], [0], [1], [0, 0, 1, 1], [], []>} : vector<64x16xbf16>, vector<16x32xbf16>, vector<64x32xf32> -> vector<64x32xf32>
    %151 = arith.addf %139, %150 : vector<64x32xf32>
    %c25 = arith.constant 25 : index
    %c0_131 = arith.constant 0 : index
    %152 = vector.load %arg10[%c25, %c0_131] : memref<96x16xf32, #tpu.memory_space<vmem>>, vector<64x16xf32>
    %c1_132 = arith.constant 1 : index
    %c0_133 = arith.constant 0 : index
    %c0_134 = arith.constant 0 : index
    %153 = vector.load %arg3[%c1_132, %c0_133, %c0_134] : memref<2x64x1xf32, #tpu.memory_space<vmem>>, vector<1x64x1xf32>
    %154 = vector.shape_cast %153 : vector<1x64x1xf32> to vector<64x1xf32>
    %155 = vector.broadcast %154 : vector<64x1xf32> to vector<64x16xf32>
    %156 = arith.mulf %152, %155 : vector<64x16xf32>
    %157 = arith.truncf %156 : vector<64x16xf32> to vector<64x16xbf16>
    %c25_135 = arith.constant 25 : index
    %c0_136 = arith.constant 0 : index
    %158 = vector.load %arg11[%c25_135, %c0_136] : memref<96x16xf32, #tpu.memory_space<vmem>>, vector<64x16xf32>
    %c1_137 = arith.constant 1 : index
    %c0_138 = arith.constant 0 : index
    %c0_139 = arith.constant 0 : index
    %159 = vector.load %arg3[%c1_137, %c0_138, %c0_139] : memref<2x64x1xf32, #tpu.memory_space<vmem>>, vector<1x64x1xf32>
    %160 = vector.shape_cast %159 : vector<1x64x1xf32> to vector<64x1xf32>
    %161 = vector.broadcast %160 : vector<64x1xf32> to vector<64x16xf32>
    %162 = arith.mulf %158, %161 : vector<64x16xf32>
    %163 = arith.truncf %162 : vector<64x16xf32> to vector<64x16xbf16>
    %c8_140 = arith.constant 8 : index
    %c0_141 = arith.constant 0 : index
    %c0_142 = arith.constant 0 : index
    %164 = vector.load %arg4[%c8_140, %c0_141, %c0_142] : memref<9x16x16xbf16, #tpu.memory_space<vmem>>, vector<1x16x16xbf16>
    %165 = vector.shape_cast %164 : vector<1x16x16xbf16> to vector<16x16xbf16>
    %cst_143 = arith.constant dense<0.000000e+00> : vector<64x16xf32>
    %166 = tpu.matmul %157, %165, %cst_143 {dimension_numbers = #tpu.dot_dimension_numbers<[1], [0], [0], [1], [0, 0, 1, 1], [], []>} : vector<64x16xbf16>, vector<16x16xbf16>, vector<64x16xf32> -> vector<64x16xf32>
    %167 = arith.addf %147, %166 : vector<64x16xf32>
    %c8_144 = arith.constant 8 : index
    %c0_145 = arith.constant 0 : index
    %c0_146 = arith.constant 0 : index
    %168 = vector.load %arg5[%c8_144, %c0_145, %c0_146] : memref<9x16x32xbf16, #tpu.memory_space<vmem>>, vector<1x16x32xbf16>
    %169 = vector.shape_cast %168 : vector<1x16x32xbf16> to vector<16x32xbf16>
    %cst_147 = arith.constant dense<0.000000e+00> : vector<64x32xf32>
    %170 = tpu.matmul %163, %169, %cst_147 {dimension_numbers = #tpu.dot_dimension_numbers<[1], [0], [0], [1], [0, 0, 1, 1], [], []>} : vector<64x16xbf16>, vector<16x32xbf16>, vector<64x32xf32> -> vector<64x32xf32>
    %171 = arith.addf %151, %170 : vector<64x32xf32>
    %172 = vector.extract_strided_slice %171 {offsets = [0, 0], sizes = [64, 16], strides = [1, 1]} : vector<64x32xf32> to vector<64x16xf32>
    %173 = vector.extract_strided_slice %171 {offsets = [0, 16], sizes = [64, 16], strides = [1, 1]} : vector<64x32xf32> to vector<64x16xf32>
    %174 = arith.mulf %167, %167 : vector<64x16xf32>
    %cst_148 = arith.constant dense<0.000000e+00> : vector<16xf32>
    %175 = vector.multi_reduction <add>, %174, %cst_148 [0] : vector<64x16xf32> to vector<16xf32>
    %176 = vector.shape_cast %175 : vector<16xf32> to vector<1x16xf32>
    %cst_149 = arith.constant 1.000000e-24 : f32
    %177 = vector.broadcast %cst_149 : f32 to vector<1x16xf32>
    %178 = arith.maximumf %176, %177 : vector<1x16xf32>
    %179 = math.rsqrt %178 : vector<1x16xf32>
    %180 = vector.broadcast %179 : vector<1x16xf32> to vector<64x16xf32>
    %181 = arith.mulf %167, %180 : vector<64x16xf32>
    %182 = arith.mulf %172, %172 : vector<64x16xf32>
    %cst_150 = arith.constant dense<0.000000e+00> : vector<16xf32>
    %183 = vector.multi_reduction <add>, %182, %cst_150 [0] : vector<64x16xf32> to vector<16xf32>
    %184 = vector.shape_cast %183 : vector<16xf32> to vector<1x16xf32>
    %cst_151 = arith.constant 1.000000e-24 : f32
    %185 = vector.broadcast %cst_151 : f32 to vector<1x16xf32>
    %186 = arith.maximumf %184, %185 : vector<1x16xf32>
    %187 = math.rsqrt %186 : vector<1x16xf32>
    %188 = vector.broadcast %187 : vector<1x16xf32> to vector<64x16xf32>
    %189 = arith.mulf %172, %188 : vector<64x16xf32>
    %c0_152 = arith.constant 0 : index
    %c0_153 = arith.constant 0 : index
    %190 = vector.load %arg7[%c0_152, %c0_153] : memref<1x16xf32, #tpu.memory_space<vmem>>, vector<1x16xf32>
    %191 = vector.broadcast %190 : vector<1x16xf32> to vector<64x16xf32>
    %192 = arith.mulf %181, %191 : vector<64x16xf32>
    %193 = arith.truncf %192 : vector<64x16xf32> to vector<64x16xbf16>
    %194 = arith.truncf %189 : vector<64x16xf32> to vector<64x16xbf16>
    %cst_154 = arith.constant dense<0.000000e+00> : vector<16x16xf32>
    %195 = tpu.matmul %193, %194, %cst_154 {dimension_numbers = #tpu.dot_dimension_numbers<[0], [0], [1], [1], [0, 1, 1, 1], [], []>} : vector<64x16xbf16>, vector<64x16xbf16>, vector<16x16xf32> -> vector<16x16xf32>
    %c0_155 = arith.constant 0 : index
    %c0_156 = arith.constant 0 : index
    %196 = vector.load %arg8[%c0_155, %c0_156] : memref<16x16xf32, #tpu.memory_space<vmem>>, vector<16x16xf32>
    %cst_157 = arith.constant 0.000000e+00 : f32
    %197 = vector.broadcast %cst_157 : f32 to vector<16x16xf32>
    %198 = arith.cmpf ogt, %196, %197 : vector<16x16xf32>
    %cst_158 = arith.constant -1.000000e+30 : f32
    %199 = vector.broadcast %cst_158 : f32 to vector<16x16xf32>
    %200 = arith.select %198, %195, %199 : vector<16x16xi1>, vector<16x16xf32>
    %cst_159 = arith.constant dense<0xFF800000> : vector<16xf32>
    %201 = vector.multi_reduction <maximumf>, %200, %cst_159 [1] : vector<16x16xf32> to vector<16xf32>
    %202 = vector.shape_cast %201 : vector<16xf32> to vector<16x1xf32>
    %203 = vector.broadcast %202 : vector<16x1xf32> to vector<16x16xf32>
    %204 = arith.subf %200, %203 : vector<16x16xf32>
    %205 = math.exp %204 : vector<16x16xf32>
    %cst_160 = arith.constant dense<0.000000e+00> : vector<16xf32>
    %206 = vector.multi_reduction <add>, %205, %cst_160 [1] : vector<16x16xf32> to vector<16xf32>
    %207 = vector.shape_cast %206 : vector<16xf32> to vector<16x1xf32>
    %208 = vector.broadcast %207 : vector<16x1xf32> to vector<16x16xf32>
    %209 = arith.divf %205, %208 : vector<16x16xf32>
    %210 = arith.truncf %173 : vector<64x16xf32> to vector<64x16xbf16>
    %211 = arith.truncf %209 : vector<16x16xf32> to vector<16x16xbf16>
    %cst_161 = arith.constant dense<0.000000e+00> : vector<64x16xf32>
    %212 = tpu.matmul %210, %211, %cst_161 {dimension_numbers = #tpu.dot_dimension_numbers<[1], [1], [0], [0], [0, 0, 1, 0], [], []>} : vector<64x16xbf16>, vector<16x16xbf16>, vector<64x16xf32> -> vector<64x16xf32>
    %213 = arith.truncf %212 : vector<64x16xf32> to vector<64x16xbf16>
    %c0_162 = arith.constant 0 : index
    %c0_163 = arith.constant 0 : index
    %214 = vector.load %arg6[%c0_162, %c0_163] : memref<16x16xbf16, #tpu.memory_space<vmem>>, vector<16x16xbf16>
    %cst_164 = arith.constant dense<0.000000e+00> : vector<64x16xf32>
    %215 = tpu.matmul %213, %214, %cst_164 {dimension_numbers = #tpu.dot_dimension_numbers<[1], [0], [0], [1], [0, 0, 1, 1], [], []>} : vector<64x16xbf16>, vector<16x16xbf16>, vector<64x16xf32> -> vector<64x16xf32>
    %c0_165 = arith.constant 0 : index
    %c0_166 = arith.constant 0 : index
    %c0_167 = arith.constant 0 : index
    %216 = vector.load %arg1[%c0_165, %c0_166, %c0_167] : memref<1x64x16xbf16, #tpu.memory_space<vmem>>, vector<1x64x16xbf16>
    %217 = vector.shape_cast %216 : vector<1x64x16xbf16> to vector<64x16xbf16>
    %218 = arith.extf %217 : vector<64x16xbf16> to vector<64x16xf32>
    %219 = arith.addf %215, %218 : vector<64x16xf32>
    %220 = arith.truncf %219 : vector<64x16xf32> to vector<64x16xbf16>
    %c0_168 = arith.constant 0 : index
    %c0_169 = arith.constant 0 : index
    %c0_170 = arith.constant 0 : index
    %221 = vector.load %arg9[%c0_168, %c0_169, %c0_170] : memref<1x64x16xbf16, #tpu.memory_space<vmem>>, vector<1x64x16xbf16>
    %222 = vector.shape_cast %221 : vector<1x64x16xbf16> to vector<64x16xbf16>
    %223 = vector.shape_cast %220 : vector<64x16xbf16> to vector<1x64x16xbf16>
    tpu.vector_store %arg9[%c0_168, %c0_169, %c0_170], %223 {strides = array<i32>} : memref<1x64x16xbf16, #tpu.memory_space<vmem>>, vector<1x64x16xbf16>,
    return
  }
  func.func @transform_0(%arg0: i32) -> (i32, i32, i32) {
    %c0_i32 = arith.constant 0 : i32
    %c0_i32_0 = arith.constant 0 : i32
    %c0_i32_1 = arith.constant 0 : i32
    return %arg0, %c0_i32, %c0_i32_0 : i32, i32, i32
  }
  func.func @transform_1(%arg0: i32) -> (i32, i32, i32) {
    %c0_i32 = arith.constant 0 : i32
    %c0_i32_0 = arith.constant 0 : i32
    %c0_i32_1 = arith.constant 0 : i32
    return %arg0, %c0_i32, %c0_i32_0 : i32, i32, i32
  }
  func.func @transform_2(%arg0: i32) -> (i32, i32, i32) {
    %c0_i32 = arith.constant 0 : i32
    %c0_i32_0 = arith.constant 0 : i32
    %c0_i32_1 = arith.constant 0 : i32
    %c0_i32_2 = arith.constant 0 : i32
    return %c0_i32, %c0_i32_0, %c0_i32_1 : i32, i32, i32
  }
  func.func @transform_3(%arg0: i32) -> (i32, i32, i32) {
    %c0_i32 = arith.constant 0 : i32
    %c0_i32_0 = arith.constant 0 : i32
    %c0_i32_1 = arith.constant 0 : i32
    %c0_i32_2 = arith.constant 0 : i32
    return %c0_i32, %c0_i32_0, %c0_i32_1 : i32, i32, i32
  }
  func.func @transform_4(%arg0: i32) -> (i32, i32, i32) {
    %c0_i32 = arith.constant 0 : i32
    %c0_i32_0 = arith.constant 0 : i32
    %c0_i32_1 = arith.constant 0 : i32
    %c0_i32_2 = arith.constant 0 : i32
    return %c0_i32, %c0_i32_0, %c0_i32_1 : i32, i32, i32
  }
  func.func @transform_5(%arg0: i32) -> (i32, i32) {
    %c0_i32 = arith.constant 0 : i32
    %c0_i32_0 = arith.constant 0 : i32
    %c0_i32_1 = arith.constant 0 : i32
    return %c0_i32, %c0_i32_0 : i32, i32
  }
  func.func @transform_6(%arg0: i32) -> (i32, i32) {
    %c0_i32 = arith.constant 0 : i32
    %c0_i32_0 = arith.constant 0 : i32
    %c0_i32_1 = arith.constant 0 : i32
    return %c0_i32, %c0_i32_0 : i32, i32
  }
  func.func @transform_7(%arg0: i32) -> (i32, i32) {
    %c0_i32 = arith.constant 0 : i32
    %c0_i32_0 = arith.constant 0 : i32
    %c0_i32_1 = arith.constant 0 : i32
    return %c0_i32, %c0_i32_0 : i32, i32
  }
  func.func @transform_8(%arg0: i32) -> (i32, i32, i32) {
    %c0_i32 = arith.constant 0 : i32
    %c0_i32_0 = arith.constant 0 : i32
    %c0_i32_1 = arith.constant 0 : i32
    return %arg0, %c0_i32, %c0_i32_0 : i32, i32, i32
  }
}

</mosaic_0001>

<bundles_post_ra>
// kernel: fuse_block_forward.6
= control target key start
LH: loop header
LB: loop body
LE: loop exit
PB: predicated region body
PF: predicated region fallthrough
CT: control target
= control target key end

     0   :  { %s1259_s15 = smov 0   ;;  %s1596_s0 = inlined_call_operand.vmem [shape: bf16[2,64,16], index: 0, kind: input, shape index: {}]   ;;  %s1597_s1 = inlined_call_operand.vmem [shape: f32[2,64,1], index: 1, kind: input, shape index: {}]   ;;  %s1598_s2 = inlined_call_operand.vmem [shape: bf16[9,16,16], index: 2, kind: input, shape index: {}]   ;;  %s1599_s3 = inlined_call_operand.vmem [shape: f32[1,16], index: 3, kind: input, shape index: {}]   ;;  %s1600_s4 = inlined_call_operand.vmem [shape: bf16[2,64,16], index: 4, kind: output, shape index: {}]  }
   0x1 LB: > { %s1070_s16 = sadd.s32 4294967295, %s1230_s15   ;;  %p1074_p0 = scmp.ge.s32.totalorder %s1230_s15, 1  ;;  %s1230_s15 = sphi %s1259_s15, %s14_s15  }
   0x2   : > { %p162_p1 = scmp.lt.s32.totalorder %s1230_s15, 3 }
   0x4   : > { %p163_p2 = pnand %p1074_p0, %p162_p1 }
   0x5   : > { %p188_p3 = scmp.lt.s32.totalorder (!%p163_p2), %s1070_s16, 1 }
   0x6   : > { %166 = sbr.rel (%p163_p2) target bundleno = 403 (0x193), region = 36 }
   0xb   : > { %v1097_v0 = vld [vmem:[%s1597_s1 + $0x40] sm:$0xff]  ;;  %v1232_v2 = vmov 0   ;;  %v1099_v3 = vld [vmem:[%s1597_s1 + $0x50] sm:$0xff]  ;;  %s1602_s16 = smov (!%p188_p3, %s1070_s16), 1  ;;  %vm215_vm0 = vcmask 130048   ;;  %v1098_v5 = vld [vmem:[%s1597_s1 + $0x48] sm:$0xff] }
   0xc   : > { %v236_v1 = vld [vmem:[%s1597_s1] sm:$0xff]  ;;  %1221 = vset.pattern.permute.xlu1 %v1232_v2  ;;  %1220 = vset.pattern.permute.xlu0 %v1232_v2  ;;  %s1177_s23 = sshll.u32 %s1602_s16, 5  ;;  %v237_v6 = vld [vmem:[%s1597_s1 + $0x8] sm:$0xff]  ;;  %v1233_v8 = vmov 0.0   ;;  %v1100_v9 = vld [vmem:[%s1597_s1 + $0x58] sm:$0xff]  ;;  %vm1006_vm1 = vcmask 125952  }
   0xd   : > { %426 = vperm.xlu0 %1220, %v1097_v0   ;;  %246 = vperm.xlu1 %1221, %v236_v1   ;;  %s1284_s26 = scalar_lea.vmem %s1596_s0, %s1177_s23  ;;  %217 = vst.msk [vmem:[#allocation2 + $0x8] sm:$0xff] %vm215_vm0, %v1233_v8  ;;  %v1180_v10 = vld [vmem:[%s1598_s2 + $0x8] sm:$0xff]  ;;  %v1183_v12 = vld [vmem:[%s1598_s2 + $0x20] sm:$0xff]  ;;  %v238_v17 = vld [vmem:[%s1597_s1 + $0x10] sm:$0xff]  ;;  %s1546_s30 = scalar_lea.vmem %s1600_s4, %s1177_s23 }
   0xe   : > { %1222 = vset.pattern.permute.xlu2 %v1232_v2  ;;  %v1189_v4 = vld [vmem:[%s1284_s26] sm:$0xff]   ;;  %216 = vst.msk [vmem:[#allocation2] sm:$0xff] %vm215_vm0, %v1233_v8  ;;  %v1204_v13 = vld [vmem:[%s1284_s26 + $0x8] sm:$0xff]   ;;  %338 = vmatpush.bf16.msra.mxu0 %v1180_v10  ;;  %v239_v18 = vld [vmem:[%s1597_s1 + $0x18] sm:$0xff] }
   0xf   : > { %436 = vperm.xlu2 %1222, %v1099_v3   ;;  %v1190_v7 = vunpack.c.l.bf16 %v1189_v4  ;;  %v1191_v11 = vunpack.c.h.bf16 %v1189_v4  ;;  %218 = vst.msk [vmem:[#allocation2 + $0x50] sm:$0xff] %vm215_vm0, %v1233_v8  ;;  %v1194_v14 = vunpack.c.l.bf16 %v1204_v13  ;;  %v1195_v15 = vunpack.c.h.bf16 %v1204_v13  ;;  %1208 = vmatpush.bf16.msra.mxu2 %v1180_v10  ;;  %v1101_v20 = vld [vmem:[%s1597_s1 + $0x60] sm:$0xff]  ;;  %v1205_v22 = vld [vmem:[%s1284_s26 + $0x10] sm:$0xff]   ;;  %v1102_v25 = vld [vmem:[%s1597_s1 + $0x68] sm:$0xff] }
  0x10   : > { %219 = vst.msk [vmem:[#allocation2 + $0x58] sm:$0xff] %vm215_vm0, %v1233_v8  ;;  %1209 = vmatpush.bf16.msra.mxu3 %v1180_v10  ;;  %1207 = vmatpush.bf16.msra.mxu1 %v1180_v10  ;;  %v1198_v23 = vunpack.c.l.bf16 %v1205_v22  ;;  %v1199_v24 = vunpack.c.h.bf16 %v1205_v22  ;;  %v240_v26 = vld [vmem:[%s1597_s1 + $0x20] sm:$0xff]  ;;  %v241_v27 = vld [vmem:[%s1597_s1 + $0x28] sm:$0xff]  ;;  %v1103_v29 = vld [vmem:[%s1597_s1 + $0x70] sm:$0xff] }
  0x11   : > { %220 = vst.msk [vmem:[#allocation2 + $0x10] sm:$0xff] %vm215_vm0, %v1190_v7  ;;  %v1104_v30 = vld [vmem:[%s1597_s1 + $0x78] sm:$0xff]  ;;  %v242_v32 = vld [vmem:[%s1597_s1 + $0x30] sm:$0xff]  ;;  %v1179_v51 = vld [vmem:[%s1598_s2] sm:$0xff] }
  0x12   : > { %221 = vst.msk [vmem:[#allocation2 + $0x18] sm:$0xff] %vm215_vm0, %v1191_v11  ;;  %652 = vmatpush.bf16.msrb.mxu0 %v1183_v12  ;;  %v243_v33 = vld [vmem:[%s1597_s1 + $0x38] sm:$0xff]  ;;  %v1181_v45 = vld [vmem:[%s1598_s2 + $0x10] sm:$0xff]  ;;  %v1187_v52 = vld [vmem:[%s1598_s2 + $0x40] sm:$0xff] }
  0x13   : > { %222 = vst.msk [vmem:[#allocation2 + $0x20] sm:$0xff] %vm215_vm0, %v1194_v14  ;;  %v1206_v39 = vld [vmem:[%s1284_s26 + $0x18] sm:$0xff]   ;;  %504 = vmatpush.bf16.msrb.mxu2 %v1181_v45  ;;  %v1185_v56 = vld [vmem:[%s1598_s2 + $0x30] sm:$0xff]  ;;  %v1184_v60 = vld [vmem:[%s1598_s2 + $0x28] sm:$0xff] }
  0x14   : > { %v298_v16 = vld [vmem:[#allocation2 + $0x8] sm:$0xff]  ;;  %223 = vst.msk [vmem:[#allocation2 + $0x28] sm:$0xff] %vm215_vm0, %v1195_v15  ;;  %v1202_v42 = vunpack.c.l.bf16 %v1206_v39  ;;  %v1203_v43 = vunpack.c.h.bf16 %v1206_v39  ;;  %v1182_v46 = vld [vmem:[%s1598_s2 + $0x18] sm:$0xff]  ;;  %385 = vmatpush.bf16.msrb.mxu1 %v1179_v51 }
  0x15   : > { %431 = vperm.xlu0 %1220, %v1098_v5   ;;  %251 = vperm.xlu1 %1221, %v237_v6   ;;  %224 = vst.msk [vmem:[#allocation2 + $0x30] sm:$0xff] %vm215_vm0, %v1198_v23  ;;  %v1186_v57 = vld [vmem:[%s1598_s2 + $0x38] sm:$0xff]  ;;  %v228_v8 = vld [vmem:[#allocation2 + $0x7] sm:$0xff] }
  0x16   : > { %225 = vst.msk [vmem:[#allocation2 + $0x38] sm:$0xff] %vm215_vm0, %v1199_v24  ;;  %582 = vmatpush.bf16.msrb.mxu3 %v1182_v46 }
  0x17   : > { %441 = vperm.xlu2 %1222, %v1100_v9   ;;  %226 = vst.msk [vmem:[#allocation2 + $0x40] sm:$0xff] %vm215_vm0, %v1202_v42 }
  0x18   : > { %v299_v19 = vld [vmem:[#allocation2 + $0x10] sm:$0xff]  ;;  %227 = vst.msk [vmem:[#allocation2 + $0x48] sm:$0xff] %vm215_vm0, %v1203_v43 }
  0x19   : > { %v306_v21 = vpack.c.bf16 %v299_v19, %v298_v16  ;;  %v613_v28 = vld [vmem:[#allocation2 + $0x18] sm:$0xff]  ;;  %v407_v7 = vld [vmem:[#allocation2 + $0x9] sm:$0xff] }
  0x1a   : > { %v620_v31 = vpack.c.bf16 %v613_v28, %v299_v19  ;;  %v614_v34 = vld [vmem:[#allocation2 + $0x20] sm:$0xff]  ;;  %v682_v2 = vld [vmem:[#allocation2 + $0x11] sm:$0xff] }
  0x1b   : > { %1085 = vmatmul.msk.bf16.vlgmr.msra.gmra.mxu0 %vm215_vm0, %v306_v21  ;;  %v615_v35 = vld [vmem:[#allocation2 + $0x28] sm:$0xff]  ;;  %v1354_v44 = vpack.c.bf16 %v614_v34, %v613_v28  ;;  %v409_v6 = vld [vmem:[#allocation2 + $0x19] sm:$0xff] }
  0x1c   : > { %v621_v36 = vpack.c.bf16 %v615_v35, %v614_v34  ;;  %v616_v37 = vld [vmem:[#allocation2 + $0x30] sm:$0xff]  ;;  %v684_v54 = vld [vmem:[#allocation2 + $0x21] sm:$0xff]  ;;  %956 = vmatpush.bf16.msra.mxu0 %v1187_v52 }
  0x1d   : > { %256 = vperm.xlu0 %1220, %v238_v17   ;;  %261 = vperm.xlu1 %1221, %v239_v18   ;;  %v617_v38 = vld [vmem:[#allocation2 + $0x38] sm:$0xff]  ;;  %v1348_v41 = vpack.c.bf16 %v616_v37, %v615_v35  ;;  %v1387_v58 = vld [vmem:[#allocation2 + $0x29] sm:$0xff] }
  0x1e   : > { %v622_v40 = vpack.c.bf16 %v617_v38, %v616_v37  ;;  %v305_v47 = vld [vmem:[#allocation2 + $0x40] sm:$0xff]  ;;  %1086 = vmatmul.msk.bf16.vlgmr.msra.gmra.mxu1 %vm215_vm0, %v1354_v44  ;;  %v1397_v63 = vld [vmem:[#allocation2 + $0x31] sm:$0xff] }
  0x1f   : > { %446 = vperm.xlu2 %1222, %v1101_v20   ;;  %1087 = vmatmul.msk.bf16.vlgmr.msra.gmra.mxu2 %vm215_vm0, %v1348_v41  ;;  %v1363_v48 = vpack.c.bf16 %v305_v47, %v617_v38  ;;  %v1369_v49 = vld [vmem:[#allocation2 + $0x48] sm:$0xff]  ;;  %v760_v10 = vld [vmem:[#allocation2 + $0x17] sm:$0xff]  ;;  %v761_v11 = vld [vmem:[#allocation2 + $0x1f] sm:$0xff] }
  0x20   : > { %v623_v50 = vpack.c.bf16 %v1369_v49, %v305_v47  ;;  %808 = vmatpush.bf16.msra.mxu2 %v1185_v56  ;;  %730 = vmatpush.bf16.msra.mxu1 %v1184_v60  ;;  %v534_v9 = vld [vmem:[#allocation2 + $0xf] sm:$0xff]  ;;  %v912_v47 = vld [vmem:[#allocation2 + $0x39] sm:$0xff] }
  0x21   : > { %1088 = vmatmul.msk.bf16.vlgmr.msra.gmra.mxu3 %vm215_vm0, %v1363_v48  ;;  %v539_v60 = vld [vmem:[#allocation2 + $0x37] sm:$0xff] }
  0x22   : > { %878 = vmatpush.bf16.msra.mxu3 %v1186_v57 }
  0x25   : > { %451 = vperm.xlu0 %1220, %v1102_v25   ;;  %266 = vperm.xlu1 %1221, %v240_v26  }
  0x27   : > { %271 = vperm.xlu2 %1222, %v241_v27  }
  0x2b   : > { %1131 = vmatmul.msk.bf16.vlgmr.msrb.gmra.mxu0 %vm215_vm0, %v620_v31  ;;  %v762_v31 = vld [vmem:[#allocation2 + $0x27] sm:$0xff] }
  0x2d   : > { %456 = vperm.xlu0 %1220, %v1103_v29   ;;  %461 = vperm.xlu1 %1221, %v1104_v30  }
  0x2f   : > { %276 = vperm.xlu2 %1222, %v242_v32   ;;  %v233_v32 = vld [vmem:[#allocation2 + $0x2f] sm:$0xff] }
  0x35   : > { %281 = vperm.xlu0 %1220, %v243_v33  }
  0x3b   : > { %1132 = vmatmul.msk.bf16.gmra.mxu0 %vm215_vm0, %v621_v36 }
  0x4b   : > { %1133 = vmatmul.msk.bf16.gmra.mxu0 %vm215_vm0, %v622_v40  ;;  %v1427_v40 = vld [vmem:[#allocation2 + $0x3f] sm:$0xff] }
  0x5b   : > { %1134 = vmatmul.msk.bf16.gmra.mxu0 %vm215_vm0, %v623_v50 }
  0x69   : > { %v437_v53 = vpop.permute.xlu2 %436 }
  0x6a   : > { %v1379_v55 = vmul.f32 %v684_v54, %v437_v53  ;;  %v466_v38 = vmul.f32 %v437_v53, %v409_v6  ;;  %v918_v45 = vmul.f32 %v1387_v58, %v437_v53 }
  0x71   : > { %v442_v59 = vpop.permute.xlu2 %441 }
  0x72   : > { %v1393_v61 = vmul.f32 %v1387_v58, %v442_v59  ;;  %v467_v39 = vmul.f32 %v684_v54, %v442_v59  ;;  %v919_v46 = vmul.f32 %v1397_v63, %v442_v59 }
  0x74   : > { %v699_v62 = vpack.c.bf16 %v1393_v61, %v1379_v55  ;;  %v845_v55 = vld [vmem:[#allocation2 + $0x50] sm:$0xff] }
  0x79   : > { %v1399_v0 = vpop.permute.xlu2 %446 }
  0x7a   : > { %v1403_v1 = vmul.f32 %v1397_v63, %v1399_v0 }
  0x7f   : > { %v427_v3 = vpop.permute.xlu0 %426  ;;  %v247_v4 = vpop.permute.xlu1 %246 }
  0x80   : > { %v1405_v5 = vmul.f32 %v682_v2, %v427_v3  ;;  %v464_v12 = vmul.f32 %v427_v3, %v407_v7  ;;  %v916_v13 = vmul.f32 %v427_v3, %v409_v6  ;;  %v284_v14 = vmul.f32 %v247_v4, %v228_v8 }
  0x81   : > { %v542_v21 = vmul.f32 %v534_v9, %v247_v4  ;;  %v1409_v22 = vmul.f32 %v760_v10, %v247_v4  ;;  %v272_v57 = vpop.permute.xlu2 %271  ;;  %v925_v7 = vpack.c.bf16 %v919_v46, %v918_v45 }
  0x82   : > { %v1434_v3 = vmul.f32 %v1427_v40, %v272_v57 }
  0x87   : > { %v432_v15 = vpop.permute.xlu0 %431  ;;  %v252_v16 = vpop.permute.xlu1 %251 }
  0x88   : > { %v465_v17 = vmul.f32 %v682_v2, %v432_v15  ;;  %v1407_v18 = vmul.f32 %v432_v15, %v409_v6  ;;  %v917_v19 = vmul.f32 %v684_v54, %v432_v15  ;;  %v285_v20 = vmul.f32 %v534_v9, %v252_v16  ;;  %v914_v9 = vld [vmem:[#allocation2 + $0x49] sm:$0xff] }
  0x89   : > { %v543_v23 = vmul.f32 %v760_v10, %v252_v16  ;;  %v1411_v24 = vmul.f32 %v761_v11, %v252_v16  ;;  %v473_v6 = vpack.c.bf16 %v467_v39, %v466_v38  ;;  %v277_v16 = vpop.permute.xlu2 %276  ;;  %v920_v38 = vmul.f32 %v912_v47, %v1399_v0 }
  0x8a   : > { %v472_v25 = vpack.c.bf16 %v465_v17, %v464_v12  ;;  %v698_v26 = vpack.c.bf16 %v1407_v18, %v1405_v5  ;;  %v924_v27 = vpack.c.bf16 %v917_v19, %v916_v13  ;;  %v292_v28 = vpack.c.bf16 %v285_v20, %v284_v14  ;;  %v766_v17 = vld [vmem:[#allocation2 + $0x47] sm:$0xff]  ;;  %v767_v19 = vld [vmem:[#allocation2 + $0x4f] sm:$0xff] }
  0x8b   : > { %v550_v29 = vpack.c.bf16 %v543_v23, %v542_v21  ;;  %v776_v30 = vpack.c.bf16 %v1411_v24, %v1409_v22  ;;  %v547_v39 = vmul.f32 %v539_v60, %v272_v57 }
  0x8c   : > { %1093 = vmatmul.msk.bf16.vlgmr.msrb.gmra.mxu1 %vm215_vm0, %v292_v28  ;;  %1111 = vmatmul.msk.bf16.vlgmr.msrb.gmra.mxu2 %vm215_vm0, %v472_v25  ;;  %v468_v28 = vmul.f32 %v1387_v58, %v1399_v0  ;;  %v915_v58 = vld [vmem:[#allocation2 + $0x51] sm:$0xff] }
  0x8d   : > { %1121 = vmatmul.msk.bf16.vlgmr.msrb.gmra.mxu3 %vm215_vm0, %v550_v29  ;;  %1171 = vmatmul.msk.bf16.vlgmr.msra.gmra.mxu0 %vm215_vm0, %v924_v27  ;;  %v289_v29 = vmul.f32 %v272_v57, %v233_v32  ;;  %v548_v57 = vmul.f32 %v1427_v40, %v277_v16 }
  0x8f   : > { %v257_v33 = vpop.permute.xlu0 %256  ;;  %v262_v34 = vpop.permute.xlu1 %261 }
  0x90   : > { %v1421_v35 = vmul.f32 %v762_v31, %v257_v33  ;;  %v1423_v36 = vmul.f32 %v262_v34, %v233_v32  ;;  %v286_v42 = vmul.f32 %v760_v10, %v257_v33  ;;  %v287_v43 = vmul.f32 %v761_v11, %v262_v34  ;;  %v913_v10 = vld [vmem:[#allocation2 + $0x41] sm:$0xff] }
  0x91   : > { %v544_v50 = vmul.f32 %v761_v11, %v257_v33  ;;  %v545_v51 = vmul.f32 %v762_v31, %v262_v34  ;;  %v774_v33 = vmul.f32 %v766_v17, %v277_v16 }
  0x92   : > { %v777_v37 = vpack.c.bf16 %v1423_v36, %v1421_v35  ;;  %v293_v4 = vpack.c.bf16 %v287_v43, %v286_v42 }
  0x93   : > { %v551_v59 = vpack.c.bf16 %v545_v51, %v544_v50 }
  0x97   : > { %v452_v52 = vpop.permute.xlu0 %451  ;;  %v267_v56 = vpop.permute.xlu1 %266 }
  0x98   : > { %v1431_v2 = vmul.f32 %v912_v47, %v452_v52  ;;  %v1436_v54 = vmul.f32 %v539_v60, %v267_v56  ;;  %v469_v20 = vmul.f32 %v1397_v63, %v452_v52  ;;  %v288_v21 = vmul.f32 %v762_v31, %v267_v56  ;;  %v340_v5 = vpop.f32.mrf.mxu0 }
  0x99   : > { %v921_v23 = vmul.f32 %v913_v10, %v452_v52  ;;  %v546_v25 = vmul.f32 %v267_v56, %v233_v32  ;;  %v290_v56 = vmul.f32 %v539_v60, %v277_v16 }
  0x9a   : > { %v700_v53 = vpack.c.bf16 %v1431_v2, %v1403_v1  ;;  %v778_v8 = vpack.c.bf16 %v1434_v3, %v1436_v54  ;;  %v294_v43 = vpack.c.bf16 %v289_v29, %v288_v21  ;;  %v474_v45 = vpack.c.bf16 %v469_v20, %v468_v28 }
  0x9b   : > { %v552_v46 = vpack.c.bf16 %v547_v39, %v546_v25  ;;  %v926_v50 = vpack.c.bf16 %v921_v23, %v920_v38  ;;  %v345_v61 = vpop.f32.mrf.mxu1 }
  0x9c   : > { %1094 = vmatmul.msk.bf16.gmra.mxu1 %vm215_vm0, %v293_v4  ;;  %1112 = vmatmul.msk.bf16.gmra.mxu2 %vm215_vm0, %v473_v6 }
  0x9d   : > { %1122 = vmatmul.msk.bf16.gmra.mxu3 %vm215_vm0, %v551_v59  ;;  %1172 = vmatmul.msk.bf16.gmra.mxu0 %vm215_vm0, %v925_v7 }
  0x9f   : > { %v457_v11 = vpop.permute.xlu0 %456  ;;  %v462_v12 = vpop.permute.xlu1 %461 }
  0xa0   : > { %v696_v13 = vmul.f32 %v913_v10, %v457_v11  ;;  %v697_v14 = vmul.f32 %v914_v9, %v462_v12  ;;  %v470_v63 = vmul.f32 %v912_v47, %v457_v11  ;;  %v471_v31 = vmul.f32 %v913_v10, %v462_v12  ;;  %v342_v18 = vpop.f32.mrf.mxu0 }
  0xa1   : > { %v922_v0 = vmul.f32 %v914_v9, %v457_v11  ;;  %v923_v51 = vmul.f32 %v915_v58, %v462_v12 }
  0xa2   : > { %v701_v15 = vpack.c.bf16 %v697_v14, %v696_v13  ;;  %v475_v3 = vpack.c.bf16 %v471_v31, %v470_v63 }
  0xa3   : > { %v927_v4 = vpack.c.bf16 %v923_v51, %v922_v0  ;;  %v1495_v24 = vpop.f32.mrf.mxu1 }
  0xa4   : > { %v1493_v1 = vpop.f32.mrf.mxu3 }
  0xa7   : > { %v282_v27 = vpop.permute.xlu0 %281 }
  0xa8   : > { %v775_v34 = vmul.f32 %v767_v19, %v282_v27  ;;  %v291_v32 = vmul.f32 %v1427_v40, %v282_v27  ;;  %v549_v52 = vmul.f32 %v766_v17, %v282_v27 }
  0xaa   : > { %v779_v42 = vpack.c.bf16 %v775_v34, %v774_v33  ;;  %v295_v54 = vpack.c.bf16 %v291_v32, %v290_v56  ;;  %v553_v6 = vpack.c.bf16 %v549_v52, %v548_v57  ;;  %v1538_v57 = vld [vmem:[%s1599_s3] ss:$0 sm:$0xff] }
  0xac   : > { %1095 = vmatmul.msk.bf16.gmra.mxu1 %vm215_vm0, %v294_v43  ;;  %1113 = vmatmul.msk.bf16.gmra.mxu2 %vm215_vm0, %v474_v45 }
  0xad   : > { %1123 = vmatmul.msk.bf16.gmra.mxu3 %vm215_vm0, %v552_v46  ;;  %1173 = vmatmul.msk.bf16.gmra.mxu0 %vm215_vm0, %v926_v50 }
  0xbc   : > { %1096 = vmatmul.msk.bf16.gmra.mxu1 %vm215_vm0, %v295_v54  ;;  %1114 = vmatmul.msk.bf16.gmra.mxu2 %vm215_vm0, %v475_v3 }
  0xbd   : > { %1124 = vmatmul.msk.bf16.gmra.mxu3 %vm215_vm0, %v553_v6  ;;  %1174 = vmatmul.msk.bf16.gmra.mxu0 %vm215_vm0, %v927_v4 }
  0xcc   : > { %1141 = vmatmul.msk.bf16.vlgmr.msra.gmra.mxu1 %vm215_vm0, %v698_v26  ;;  %1151 = vmatmul.msk.bf16.vlgmr.msra.gmra.mxu2 %vm215_vm0, %v776_v30 }
  0xcd   : > { %1161 = vmatmul.msk.bf16.vlgmr.msra.gmra.mxu3 %vm215_vm0, %v1354_v44  ;;  %v654_v44 = vpop.f32.mrf.mxu0 }
  0xd5   : > { %v656_v22 = vpop.f32.mrf.mxu0 }
  0xdc   : > { %1142 = vmatmul.msk.bf16.gmra.mxu1 %vm215_vm0, %v699_v62  ;;  %1152 = vmatmul.msk.bf16.gmra.mxu2 %vm215_vm0, %v777_v37  ;;  %v849_v62 = vpack.c.bf16 %v845_v55, %v1369_v49 }
  0xdd   : > { %1162 = vmatmul.msk.bf16.gmra.mxu3 %vm215_vm0, %v1348_v41  ;;  %v1490_v41 = vpop.f32.mrf.mxu2  ;;  %v1501_v30 = vpop.f32.mrf.mxu0 }
  0xe5   : > { %v1497_v26 = vpop.f32.mrf.mxu2  ;;  %v1503_v40 = vpop.f32.mrf.mxu0 }
  0xec   : > { %1143 = vmatmul.msk.bf16.gmra.mxu1 %vm215_vm0, %v700_v53  ;;  %1153 = vmatmul.msk.bf16.gmra.mxu2 %vm215_vm0, %v778_v8 }
  0xed   : > { %1163 = vmatmul.msk.bf16.gmra.mxu3 %vm215_vm0, %v1363_v48  ;;  %v1499_v48 = vpop.f32.mrf.mxu3  ;;  %v1505_v53 = vpop.f32.mrf.mxu0 }
  0xf5   : > { %v1507_v9 = vpop.f32.mrf.mxu0 }
  0xfc   : > { %1144 = vmatmul.msk.bf16.gmra.mxu1 %vm215_vm0, %v701_v15  ;;  %1154 = vmatmul.msk.bf16.gmra.mxu2 %vm215_vm0, %v779_v42 }
  0xfd   : > { %1164 = vmatmul.msk.bf16.gmra.mxu3 %vm215_vm0, %v849_v62  ;;  %v1513_v15 = vpop.f32.mrf.mxu0 }
 0x105   : > { %v1523_v21 = vpop.f32.mrf.mxu0 }
 0x109   : > { %v387_v49 = vpop.f32.mrf.mxu1 }
 0x10a   : > { %v388_v28 = vadd.f32 %v387_v49, %v340_v5 }
 0x10d   : > { %v958_v33 = vpop.f32.mrf.mxu0 }
 0x10f   : > { %v506_v35 = vpop.f32.mrf.mxu2 }
 0x110   : > { %v584_v36 = vpop.f32.mrf.mxu3  ;;  %v526_v29 = vadd.f32 %v506_v35, %v388_v28 }
 0x111   : > { %v389_v37 = vpop.f32.mrf.mxu1 }
 0x112   : > { %v604_v38 = vadd.f32 %v584_v36, %v526_v29  ;;  %v390_v43 = vadd.f32 %v389_v37, %v342_v18 }
 0x114   : > { %v674_v46 = vadd.f32 %v654_v44, %v604_v38 }
 0x115   : > { %v960_v58 = vpop.f32.mrf.mxu0 }
 0x117   : > { %v508_v47 = vpop.f32.mrf.mxu2 }
 0x118   : > { %v586_v60 = vpop.f32.mrf.mxu3  ;;  %v527_v45 = vadd.f32 %v508_v47, %v390_v43 }
 0x119   : > { %v392_v2 = vpop.f32.mrf.mxu1 }
 0x11a   : > { %v605_v31 = vadd.f32 %v586_v60, %v527_v45  ;;  %v393_v52 = vadd.f32 %v392_v2, %v345_v61 }
 0x11c   : > { %v675_v4 = vadd.f32 %v656_v22, %v605_v31 }
 0x11d   : > { %v963_v49 = vpop.f32.mrf.mxu0 }
 0x11f   : > { %v511_v59 = vpop.f32.mrf.mxu2 }
 0x120   : > { %v589_v7 = vpop.f32.mrf.mxu3  ;;  %v528_v3 = vadd.f32 %v511_v59, %v393_v52 }
 0x121   : > { %v394_v8 = vpop.f32.mrf.mxu1 }
 0x122   : > { %v606_v44 = vadd.f32 %v589_v7, %v528_v3  ;;  %v395_v22 = vadd.f32 %v394_v8, %v1495_v24 }
 0x124   : > { %v676_v60 = vadd.f32 %v1501_v30, %v606_v44 }
 0x125   : > { %v965_v8 = vpop.f32.mrf.mxu0 }
 0x127   : > { %v513_v10 = vpop.f32.mrf.mxu2 }
 0x128   : > { %v591_v11 = vpop.f32.mrf.mxu3  ;;  %v529_v37 = vadd.f32 %v513_v10, %v395_v22 }
 0x129   : > { %v397_v12 = vpop.f32.mrf.mxu1 }
 0x12a   : > { %v607_v7 = vadd.f32 %v591_v11, %v529_v37  ;;  %v398_v43 = vadd.f32 %v397_v12, %v1490_v41 }
 0x12c   : > { %v677_v30 = vadd.f32 %v1503_v40, %v607_v7 }
 0x12d   : > { %v968_v52 = vpop.f32.mrf.mxu0 }
 0x12f   : > { %v1509_v13 = vpop.f32.mrf.mxu2 }
 0x130   : > { %v1511_v14 = vpop.f32.mrf.mxu3  ;;  %v530_v10 = vadd.f32 %v1509_v13, %v398_v43 }
 0x131   : > { %v1515_v16 = vpop.f32.mrf.mxu1 }
 0x132   : > { %v400_v12 = vadd.f32 %v1515_v16, %v1497_v26 }
 0x137   : > { %v1517_v17 = vpop.f32.mrf.mxu2 }
 0x138   : > { %v1519_v19 = vpop.f32.mrf.mxu3 }
 0x139   : > { %v1521_v20 = vpop.f32.mrf.mxu1 }
 0x13a   : > { %v403_v16 = vadd.f32 %v1521_v20, %v1493_v1 }
 0x13f   : > { %v1525_v23 = vpop.f32.mrf.mxu2 }
 0x140   : > { %v1527_v25 = vpop.f32.mrf.mxu3 }
 0x141   : > { %v1529_v27 = vpop.f32.mrf.mxu1 }
 0x142   : > { %v405_v20 = vadd.f32 %v1529_v27, %v1499_v48 }
 0x147   : > { %v1531_v34 = vpop.f32.mrf.mxu2 }
 0x148   : > { %v1533_v39 = vpop.f32.mrf.mxu3 }
 0x149   : > { %v732_v42 = vpop.f32.mrf.mxu1 }
 0x14a   : > { %v752_v50 = vadd.f32 %v732_v42, %v674_v46 }
 0x14f   : > { %v810_v63 = vpop.f32.mrf.mxu2 }
 0x150   : > { %v830_v32 = vadd.f32 %v810_v63, %v752_v50  ;;  %v880_v0 = vpop.f32.mrf.mxu3 }
 0x151   : > { %v734_v51 = vpop.f32.mrf.mxu1 }
 0x152   : > { %v900_v56 = vadd.f32 %v880_v0, %v830_v32  ;;  %v753_v5 = vadd.f32 %v734_v51, %v675_v4  ;;  %v531_v0 = vadd.f32 %v1517_v17, %v400_v12 }
 0x154   : > { %v978_v54 = vadd.f32 %v958_v33, %v900_v56 }
 0x156   : > { %v990_v6 = vadd.f32 %v1538_v57, %v978_v54  ;;  %v609_v54 = vadd.f32 %v1519_v19, %v531_v0  ;;  %v970_v19 = vpop.f32.mrf.mxu0 }
 0x157   : > { %v812_v18 = vpop.f32.mrf.mxu2 }
 0x158   : > { %v998_v55 = vpack.c.bf16 %v990_v6, %v990_v6  ;;  %v831_v61 = vadd.f32 %v812_v18, %v753_v5  ;;  %v882_v62 = vpop.f32.mrf.mxu3  ;;  %v679_v44 = vadd.f32 %v1507_v9, %v609_v54  ;;  %v533_v9 = vadd.f32 %v1531_v34, %v405_v20 }
 0x159   : > { %v737_v35 = vpop.f32.mrf.mxu1 }
 0x15a   : > { %1007 = vst.msk [vmem:[%s1546_s30] sm:$0xf] %vm1006_vm1, %v998_v55  ;;  %v901_v36 = vadd.f32 %v882_v62, %v831_v61  ;;  %v754_v59 = vadd.f32 %v737_v35, %v676_v60 }
 0x15c   : > { %v979_v47 = vadd.f32 %v960_v58, %v901_v36  ;;  %v608_v58 = vadd.f32 %v1511_v14, %v530_v10 }
 0x15e   : > { %v991_v2 = vadd.f32 %v1538_v57, %v979_v47  ;;  %v678_v51 = vadd.f32 %v1505_v53, %v608_v58  ;;  %v532_v53 = vadd.f32 %v1525_v23, %v403_v16 }
 0x15f   : > { %v815_v28 = vpop.f32.mrf.mxu2 }
 0x160   : > { %v999_v29 = vpack.c.bf16 %v991_v2, %v991_v2  ;;  %v832_v33 = vadd.f32 %v815_v28, %v754_v59  ;;  %v885_v38 = vpop.f32.mrf.mxu3  ;;  %v611_v59 = vadd.f32 %v1533_v39, %v533_v9 }
 0x161   : > { %v739_v42 = vpop.f32.mrf.mxu1 }
 0x162   : > { %1008 = vst.msk [vmem:[%s1546_s30 + $0x4] sm:$0xf] %vm1006_vm1, %v999_v29  ;;  %v902_v24 = vadd.f32 %v885_v38, %v832_v33  ;;  %v755_v50 = vadd.f32 %v739_v42, %v677_v30  ;;  %v973_v33 = vpop.f32.mrf.mxu0  ;;  %v681_v38 = vadd.f32 %v1523_v21, %v611_v59 }
 0x164   : > { %v980_v45 = vadd.f32 %v963_v49, %v902_v24  ;;  %v610_v49 = vadd.f32 %v1527_v25, %v532_v53 }
 0x166   : > { %v992_v46 = vadd.f32 %v1538_v57, %v980_v45  ;;  %v680_v47 = vadd.f32 %v1513_v15, %v610_v49 }
 0x167   : > { %v817_v11 = vpop.f32.mrf.mxu2 }
 0x168   : > { %v1000_v63 = vpack.c.bf16 %v992_v46, %v992_v46  ;;  %v833_v31 = vadd.f32 %v817_v11, %v755_v50  ;;  %v887_v32 = vpop.f32.mrf.mxu3 }
 0x169   : > { %v742_v41 = vpop.f32.mrf.mxu1 }
 0x16a   : > { %1009 = vst.msk [vmem:[%s1546_s30 + $0x8] sm:$0xf] %vm1006_vm1, %v1000_v63  ;;  %v903_v13 = vadd.f32 %v887_v32, %v833_v31  ;;  %v756_v14 = vadd.f32 %v742_v41, %v678_v51  ;;  %v975_v45 = vpop.f32.mrf.mxu0 }
 0x16c   : > { %v981_v40 = vadd.f32 %v965_v8, %v903_v13 }
 0x16e   : > { %v993_v56 = vadd.f32 %v1538_v57, %v981_v40 }
 0x16f   : > { %v820_v3 = vpop.f32.mrf.mxu2 }
 0x170   : > { %v1001_v4 = vpack.c.bf16 %v993_v56, %v993_v56  ;;  %v834_v6 = vadd.f32 %v820_v3, %v756_v14  ;;  %v890_v5 = vpop.f32.mrf.mxu3 }
 0x171   : > { %v744_v26 = vpop.f32.mrf.mxu1 }
 0x172   : > { %1010 = vst.msk [vmem:[%s1546_s30 + $0xc] sm:$0xf] %vm1006_vm1, %v1001_v4  ;;  %v904_v17 = vadd.f32 %v890_v5, %v834_v6  ;;  %v757_v61 = vadd.f32 %v744_v26, %v679_v44 }
 0x174   : > { %v982_v18 = vadd.f32 %v968_v52, %v904_v17 }
 0x176   : > { %v994_v55 = vadd.f32 %v1538_v57, %v982_v18 }
 0x177   : > { %v822_v62 = vpop.f32.mrf.mxu2 }
 0x178   : > { %v1002_v35 = vpack.c.bf16 %v994_v55, %v994_v55  ;;  %v835_v22 = vadd.f32 %v822_v62, %v757_v61  ;;  %v892_v36 = vpop.f32.mrf.mxu3 }
 0x179   : > { %v747_v1 = vpop.f32.mrf.mxu1 }
 0x17a   : > { %1011 = vst.msk [vmem:[%s1546_s30 + $0x10] sm:$0xf] %vm1006_vm1, %v1002_v35  ;;  %v905_v23 = vadd.f32 %v892_v36, %v835_v22  ;;  %v758_v2 = vadd.f32 %v747_v1, %v680_v47 }
 0x17c   : > { %v983_v37 = vadd.f32 %v970_v19, %v905_v23 }
 0x17e   : > { %v995_v60 = vadd.f32 %v1538_v57, %v983_v37 }
 0x17f   : > { %v825_v25 = vpop.f32.mrf.mxu2 }
 0x180   : > { %v1003_v28 = vpack.c.bf16 %v995_v60, %v995_v60  ;;  %v836_v7 = vadd.f32 %v825_v25, %v758_v2  ;;  %v895_v29 = vpop.f32.mrf.mxu3 }
 0x181   : > { %v749_v27 = vpop.f32.mrf.mxu1 }
 0x182   : > { %1012 = vst.msk [vmem:[%s1546_s30 + $0x14] sm:$0xf] %vm1006_vm1, %v1003_v28  ;;  %v906_v48 = vadd.f32 %v895_v29, %v836_v7  ;;  %v759_v42 = vadd.f32 %v749_v27, %v681_v38 }
 0x184   : > { %v984_v34 = vadd.f32 %v973_v33, %v906_v48 }
 0x186   : > { %v996_v15 = vadd.f32 %v1538_v57, %v984_v34 }
 0x187   : > { %v827_v43 = vpop.f32.mrf.mxu2 }
 0x188   : > { %v1004_v24 = vpack.c.bf16 %v996_v15, %v996_v15  ;;  %v837_v8 = vadd.f32 %v827_v43, %v759_v42  ;;  %v897_v39 = vpop.f32.mrf.mxu3 }
 0x18a   : > { %1013 = vst.msk [vmem:[%s1546_s30 + $0x18] sm:$0xf] %vm1006_vm1, %v1004_v24  ;;  %v907_v10 = vadd.f32 %v897_v39, %v837_v8 }
 0x18c   : > { %v985_v30 = vadd.f32 %v975_v45, %v907_v10 }
 0x18e   : > { %v997_v46 = vadd.f32 %v1538_v57, %v985_v30 }
 0x190   : > { %v1005_v50 = vpack.c.bf16 %v997_v46, %v997_v46 }
 0x192   : > { %1014 = vst.msk [vmem:[%s1546_s30 + $0x1c] sm:$0xf] %vm1006_vm1, %v1005_v50 }
 0x193 PF: > { %s14_s15 = sadd.s32 1, %s1230_s15  }
 0x194   : > { %p11_p4 = scmp.ge.s32.totalorder %s14_s15, 4  }
 0x196   :  { %13 = sbr.rel (!%p11_p4) target bundleno = 1 (0x1), region = 75 }

// kernel: fuse_block_forward.9
= control target key start
LH: loop header
LB: loop body
LE: loop exit
PB: predicated region body
PF: predicated region fallthrough
CT: control target
= control target key end

     0   :  { %12 = vsyncpa [#allocation5], 0  ;;  %s3901_s0 = inlined_call_operand.vmem [shape: bf16[2,64,16], index: 0, kind: input, shape index: {}]   ;;  %s3902_s1 = inlined_call_operand.vmem [shape: bf16[2,64,16], index: 1, kind: input, shape index: {}]   ;;  %s3903_s2 = inlined_call_operand.vmem [shape: f32[2,64,1], index: 2, kind: input, shape index: {}]   ;;  %s3904_s3 = inlined_call_operand.vmem [shape: bf16[9,32,16], index: 3, kind: input, shape index: {}]   ;;  %s3905_s4 = inlined_call_operand.vmem [shape: f32[1,16], index: 4, kind: input, shape index: {}]   ;;  %s3906_s5 = inlined_call_operand.vmem [shape: bf16[9,16,32], index: 5, kind: input, shape index: {}]   ;;  %s3907_s6 = inlined_call_operand.vmem [shape: f32[1,32], index: 6, kind: input, shape index: {}]   ;;  %s3908_s7 = inlined_call_operand.hbm [shape: f32[2,64,16], index: 7, kind: output, shape index: {}]  }
   0x1   :  { %14 = vsyncpa [#allocation5 + $0x1], 0  ;;  %s2879_s24 = smov 0   ;;  %s2881_s25 = smov 0  }
   0x2   :  { %s2883_s26 = smov 0   ;;  %s2885_s27 = smov 0  }
   0x3 LB: > { %s2900_s28 = sadd.s32 4294967295, %s2830_s27   ;;  %s2337_s29 = sadd.s32 4294967294, %s2830_s27   ;;  %s2830_s27 = sphi %s2885_s27, %s3956_s27   ;;  %s2826_s26 = sphi %s2883_s26, %s3955_s26   ;;  %s2822_s25 = sphi %s2881_s25, %s3954_s25   ;;  %s2818_s24 = sphi %s2879_s24, %s3953_s24  }
   0x4   : > { %s2904_s30 = sadd.s32 1, %s2830_s27   ;;  %s184_s8 = sadd.s32 1, %s2826_s26 }
   0x5   : > { %s181_s9 = ssub.s32 %s2830_s27, %s2904_s30  ;;  %p194_p0 = scmp.ne.s32.totalorder %s2826_s26, %s2822_s25 }
   0x6   : > { %p182_p1 = scmp.eq.s32.totalorder %s181_s9, 0  ;;  %p195_p2 = scmp.eq.s32.totalorder %s2900_s28, 1 }
   0x7   : > { %p200_p3 = scmp.ne.s32.totalorder %s2822_s25, %s2818_s24  ;;  %p201_p4 = scmp.eq.s32.totalorder %s2337_s29, 1 }
   0x8   : > { %s2915_s10 = scalar_select %p182_p1, %s2826_s26, %s184_s8  }
   0x9   : > { %p2917_p5 = por %p195_p2, %p194_p0  ;;  %p2921_p6 = por %p201_p4, %p200_p3 }
   0xa   : > { %p2340_p7 = scmp.ge.s32.totalorder %s2830_s27, 1  ;;  %p250_p8 = scmp.lt.s32.totalorder %s2830_s27, 3 }
   0xc   : > { %p251_p9 = pnand %p2340_p7, %p250_p8 }
   0xe   : > { %254 = sbr.rel (%p251_p9) target bundleno = 879 (0x36f), region = 48 }
  0x13   : > { %v2930_v0 = vld [vmem:[%s3903_s2 + $0x20] sm:$0xff]  ;;  %p287_p10 = scmp.lt.s32.totalorder %s2900_s28, 1  ;;  %v2832_v1 = vmov 0   ;;  %v2946_v6 = vld [vmem:[%s3903_s2 + $0x28] sm:$0xff]  ;;  %s2833_s22 = smov 16   ;;  %v2954_v14 = vld [vmem:[%s3903_s2 + $0x38] sm:$0xff] }
  0x14   : > { %2726 = vset.pattern.permute.xlu1 %v2832_v1  ;;  %2732 = vset.pattern.permute.xlu0 %v2832_v1  ;;  %v2374_v17 = vld [vmem:[%s3903_s2 + $0x40] sm:$0xff]  ;;  %v398_v18 = vld [vmem:[%s3903_s2 + $0x30] sm:$0xff]  ;;  %v2375_v19 = vld [vmem:[%s3903_s2 + $0x48] sm:$0xff]  ;;  %vm371_vm0 = vcmask 261120   ;;  %v2834_v31 = vmov 0.0   ;;  %vm362_vm1 = vcmask 130048  }
  0x15   : > { %422 = vperm.xlu1 %2726, %v2930_v0   ;;  %s2935_s15 = scalar_select %p287_p10, %s2900_s28, 1  ;;  %2733 = vset.pattern.permute.xlu2 %v2832_v1  ;;  %v393_v20 = vld [vmem:[%s3903_s2 + $0x8] sm:$0xff]  ;;  %v392_v21 = vld [vmem:[%s3903_s2] sm:$0xff]  ;;  %v2376_v22 = vld [vmem:[%s3903_s2 + $0x50] sm:$0xff]  ;;  %373 = vst.msk [vmem:[#allocation2 + $0x8] sm:$0xff] %vm371_vm0, %v2834_v31 }
  0x16   : > { %v394_v23 = vld [vmem:[%s3903_s2 + $0x10] sm:$0xff]  ;;  %v2377_v24 = vld [vmem:[%s3903_s2 + $0x58] sm:$0xff]  ;;  %v2379_v26 = vld [vmem:[%s3903_s2 + $0x68] sm:$0xff]  ;;  %372 = vst.msk [vmem:[#allocation2] sm:$0xff] %vm371_vm0, %v2834_v31  ;;  %s2835_s21 = smov 112   ;;  %s2632_s29 = sshll.u32 %s2900_s28, 6 }
  0x17   : > { %s2603_s16 = sshll.u32 %s2935_s15, 5  ;;  %v395_v25 = vld [vmem:[%s3903_s2 + $0x18] sm:$0xff]  ;;  %v2378_v27 = vld [vmem:[%s3903_s2 + $0x60] sm:$0xff]  ;;  %v2380_v30 = vld [vmem:[%s3903_s2 + $0x70] sm:$0xff]  ;;  %374 = vst.msk [vmem:[#allocation2 + $0x50] sm:$0xff] %vm371_vm0, %v2834_v31  ;;  %s2259_s13 = scalar_lea.hbm %s3908_s7, %s2632_s29 }
  0x18   : > { %s296_s19 = scalar_lea.vmem %s3902_s1, %s2603_s16  ;;  %v2381_v29 = vld [vmem:[%s3903_s2 + $0x78] sm:$0xff]  ;;  %375 = vst.msk [vmem:[#allocation2 + $0x58] sm:$0xff] %vm371_vm0, %v2834_v31  ;;  %v2607_v33 = vld [vmem:[%s3904_s3 + $0x10] sm:$0xff]  ;;  %s3021_s23 = scalar_lea.vmem %s3901_s0, %s2603_s16  ;;  %v2606_v44 = vld [vmem:[%s3904_s3 + $0x8] sm:$0xff] }
  0x19   : > { %v2650_v2 = vld [vmem:[%s296_s19] sm:$0xff]   ;;  %v2668_v3 = vld [vmem:[%s296_s19 + $0x8] sm:$0xff]   ;;  %v2669_v4 = vld [vmem:[%s296_s19 + $0x10] sm:$0xff]   ;;  %1226 = vst.msk [vmem:[#allocation3] sm:$0xff] %vm362_vm1, %v2834_v31  ;;  %2673 = vmatpush.bf16.msra.mxu3 %v2606_v44  ;;  %556 = vmatpush.bf16.msra.mxu1 %v2606_v44  ;;  %s2262_s17 = sshll.u32 %s2259_s13, 4  ;;  %s2263_s17 = int_to_ptr.hbm [resolvable:$true] %s2262_s17 }
  0x1a   : > { %v2651_v5 = vunpack.c.l.bf16 %v2650_v2  ;;  %v2655_v7 = vunpack.c.l.bf16 %v2668_v3  ;;  %v2656_v8 = vunpack.c.h.bf16 %v2668_v3  ;;  %v2670_v9 = vld [vmem:[%s296_s19 + $0x18] sm:$0xff]   ;;  %v2660_v11 = vunpack.c.h.bf16 %v2669_v4  ;;  %1227 = vst.msk [vmem:[#allocation3 + $0x8] sm:$0xff] %vm362_vm1, %v2834_v31  ;;  %v3024_v34 = vld [vmem:[%s3021_s23] sm:$0xff]   ;;  %v3036_v38 = vld [vmem:[%s3021_s23 + $0x10] sm:$0xff]   ;;  %s2782_s18 = sshra.s32 %s2263_s17, 4  ;;  %s2783_s18 = int_to_ptr.hbm [resolvable:$true] %s2782_s18 }
  0x1b   : > { %v2663_v12 = vunpack.c.l.bf16 %v2670_v9  ;;  %v2659_v15 = vunpack.c.l.bf16 %v2669_v4  ;;  %v2652_v16 = vunpack.c.h.bf16 %v2650_v2  ;;  %v2664_v28 = vunpack.c.h.bf16 %v2670_v9  ;;  %v2608_v32 = vld [vmem:[%s3904_s3 + $0x18] sm:$0xff]  ;;  %1228 = vst.msk [vmem:[#allocation3 + $0x50] sm:$0xff] %vm362_vm1, %v2834_v31  ;;  %v2605_v51 = vld [vmem:[%s3904_s3] sm:$0xff]  ;;  %v2610_v53 = vld [vmem:[%s3904_s3 + $0x28] sm:$0xff]  ;;  %p2789_p0 = scmp.lt.s32.totalorder %s2783_s18, %s3908_s7 }
  0x1c   : > { %338 = vrot.lane.b32.xlu2 %v2651_v5, %s2833_s22  ;;  %v2721_v10 = vpack.i.bf16 %v2656_v8, %v2655_v7  ;;  %503 = vmatpush.bf16.msra.mxu0 %v2608_v32  ;;  %1229 = vst.msk [vmem:[#allocation3 + $0x58] sm:$0xff] %vm362_vm1, %v2834_v31  ;;  %v3915_v35 = vunpack.c.l.bf16 %v3024_v34  ;;  %v3039_v39 = vld [vmem:[%s3021_s23 + $0x18] sm:$0xff]   ;;  %v3913_v40 = vunpack.c.h.bf16 %v3036_v38  ;;  %v456_v42 = vld [vmem:[#allocation2 + $0x8] sm:$0xff]  ;;  %v3914_v52 = vunpack.c.h.bf16 %v3024_v34  ;;  %v2613_v59 = vld [vmem:[%s3904_s3 + $0x40] sm:$0xff] }
  0x1d   : > { %427 = vperm.xlu1 %2726, %v2946_v6   ;;  %v2727_v13 = vpack.i.bf16 %v2663_v12, %v2660_v11  ;;  %2671 = vmatpush.bf16.msra.mxu2 %v2608_v32  ;;  %3931 = vst [vmem:[#allocation7_spill] sm:$0xff] %v3024_v34  ;;  %v3910_v41 = vunpack.c.l.bf16 %v3039_v39  ;;  %v2612_v54 = vld [vmem:[%s3904_s3 + $0x38] sm:$0xff]  ;;  %v2614_v56 = vld [vmem:[%s3904_s3 + $0x48] sm:$0xff]  ;;  %v3911_v8 = vunpack.c.l.bf16 %v3036_v38  ;;  %v2609_v9 = vld [vmem:[%s3904_s3 + $0x20] sm:$0xff] }
  0x1e   : > { %2722 = vrot.lane.b32.xlu0 %v2721_v10, %s2833_s22  ;;  %3932 = vst [vmem:[#allocation8_spill] sm:$0xff] %v3036_v38  ;;  %2674 = vmatpush.bf16.msra.mxu3 %v2605_v51  ;;  %v3090_v60 = vld [vmem:[%s3021_s23 + $0x8] sm:$0xff]   ;;  %v2611_v10 = vld [vmem:[%s3904_s3 + $0x30] sm:$0xff]  ;;  %s284_s23 = sand.u32 1, %s2822_s25  }
  0x1f   : > { %3933 = vst [vmem:[#allocation9_spill] sm:$0xff] %v3039_v39  ;;  %557 = vmatpush.bf16.msra.mxu1 %v2605_v51  ;;  %v3912_v1 = vunpack.c.h.bf16 %v3090_v60  ;;  %s2341_s15 = sshll.u32 %s284_s23, 6  ;;  %s2248_s28 = scalar_lea.sflag [#allocation5], %s284_s23 }
  0x20   : > { %504 = vmatpush.bf16.msra.mxu0 %v2607_v33  ;;  %3934 = vst [vmem:[#allocation10_spill] sm:$0xff] %v3090_v60  ;;  %s3823_s16 = scalar_lea.vmem [#allocation4], %s2341_s15 }
  0x21   : > { %2672 = vmatpush.bf16.msra.mxu2 %v2607_v33  ;;  %s2260_s14 = sshll.u32 %s3823_s16, 4  ;;  %s2261_s14 = int_to_ptr.vmem [resolvable:$true] %s2260_s14 }
  0x22   : > { %769 = vmatpush.bf16.msrb.mxu3 %v2612_v54  ;;  %v2618_v54 = vld [vmem:[%s3904_s3 + $0x68] sm:$0xff] }
  0x24   : > { %2728 = vrot.lane.b32.xlu2 %v2727_v13, %s2833_s22  ;;  %847 = vmatpush.bf16.msrb.mxu0 %v2614_v56  ;;  %v2616_v56 = vld [vmem:[%s3904_s3 + $0x58] sm:$0xff] }
  0x25   : > { %437 = vperm.xlu1 %2726, %v2954_v14   ;;  %683 = vmatpush.bf16.msrb.mxu2 %v2610_v53 }
  0x26   : > { %346 = vrot.lane.b32.xlu0 %v2659_v15, %s2833_s22  ;;  %770 = vmatpush.bf16.msrb.mxu3 %v2611_v10 }
  0x27   : > { %933 = vmatpush.bf16.msrb.mxu1 %v2616_v56 }
  0x28   : > { %848 = vmatpush.bf16.msrb.mxu0 %v2613_v59 }
  0x29   : > { %684 = vmatpush.bf16.msrb.mxu2 %v2609_v9 }
  0x2c   : > { %340 = vrot.lane.b32.xlu2 %v2652_v16, %s2833_s22 }
  0x2d   : > { %598 = vperm.xlu1 %2726, %v2374_v17  }
  0x2e   : > { %432 = vperm.xlu0 %2732, %v398_v18  }
  0x34   : > { %603 = vperm.xlu2 %2733, %v2375_v19  }
  0x35   : > { %407 = vperm.xlu1 %2726, %v393_v20  }
  0x36   : > { %402 = vperm.xlu0 %2732, %v392_v21  }
  0x3c   : > { %608 = vperm.xlu2 %2733, %v2376_v22  }
  0x3d   : > { %412 = vperm.xlu1 %2726, %v394_v23  }
  0x3e   : > { %613 = vperm.xlu0 %2732, %v2377_v24  }
  0x44   : > { %417 = vperm.xlu2 %2733, %v395_v25  }
  0x45   : > { %623 = vperm.xlu1 %2726, %v2379_v26  }
  0x46   : > { %618 = vperm.xlu0 %2732, %v2378_v27  }
  0x4c   : > { %352 = vrot.lane.b32.xlu2 %v2664_v28, %s2833_s22  ;;  %s2784_s22 = scalar_lea.hbm %s2783_s18, 64 }
  0x4d   : > { %633 = vperm.xlu1 %2726, %v2381_v29   ;;  %p2785_p11 = scmp.ne.s32.totalorder %s2783_s18, %s2784_s22 }
  0x4e   : > { %628 = vperm.xlu0 %2732, %v2380_v30  }
  0x4f   : > { %p2786_p12 = pnand %p2785_p11, %p2917_p5 }
  0x51   : > { %p2787_p13 = pneg %p2786_p12 }
  0x54   : > { %1256 = vperm.xlu2 %2733, %v392_v21  }
  0x55   : > { %1435 = vperm.xlu1 %2726, %v2374_v17  }
  0x56   : > { %1261 = vperm.xlu0 %2732, %v393_v20  }
  0x5c   : > { %1440 = vperm.xlu2 %2733, %v2375_v19  }
  0x5d   : > { %1271 = vperm.xlu1 %2726, %v395_v25  }
  0x5e   : > { %1266 = vperm.xlu0 %2732, %v394_v23  }
  0x64   : > { %1445 = vperm.xlu2 %2733, %v2376_v22  }
  0x65   : > { %1276 = vperm.xlu1 %2726, %v2930_v0   ;;  %v3916_v0 = vunpack.c.l.bf16 %v3090_v60 }
  0x66   : > { %1450 = vperm.xlu0 %2732, %v2377_v24  }
  0x6c   : > { %1281 = vperm.xlu2 %2733, %v2946_v6  }
  0x6d   : > { %1460 = vperm.xlu1 %2726, %v2379_v26  }
  0x6e   : > { %1455 = vperm.xlu0 %2732, %v2378_v27  }
  0x74   : > { %1286 = vperm.xlu2 %2733, %v398_v18  }
  0x75   : > { %1465 = vperm.xlu1 %2726, %v2380_v30  }
  0x76   : > { %1291 = vperm.xlu0 %2732, %v2954_v14   ;;  %v3028_v36 = vpop.permute.xlu2 %338 }
  0x77   : > { %v363_v37 = vsel %vm362_vm1, %v3915_v35, %v3028_v36 }
  0x78   : > { %376 = vst.msk [vmem:[#allocation2 + $0x10] sm:$0xff] %vm371_vm0, %v363_v37  ;;  %v3909_v37 = vunpack.c.h.bf16 %v3039_v39 }
  0x7c   : > { %1470 = vperm.xlu2 %2733, %v2381_v29  }
  0x7e   : > { %v3043_v43 = vpop.permute.xlu2 %2728 }
  0x7f   : > { %v3917_v45 = vunpack.i.h.bf16 %v3043_v43  ;;  %v3918_v46 = vunpack.i.l.bf16 %v3043_v43  ;;  %v3050_v47 = vld [vmem:[#allocation2 + $0x10] sm:$0xff] }
  0x80   : > { %v464_v48 = vpack.c.bf16 %v3050_v47, %v456_v42  ;;  %v385_v53 = vld [vmem:[#allocation2 + $0xf] sm:$0xff] }
  0x81   : > { %v368_v49 = vsel %vm362_vm1, %v3913_v40, %v3918_v46  ;;  %v369_v50 = vsel %vm362_vm1, %v3910_v41, %v3917_v45  ;;  %v579_v46 = vld [vmem:[#allocation2 + $0x9] sm:$0xff] }
  0x82   : > { %381 = vst.msk [vmem:[#allocation2 + $0x38] sm:$0xff] %vm371_vm0, %v368_v49  ;;  %2358 = vmatmul.msk.bf16.vlgmr.msra.gmra.mxu0 %vm371_vm0, %v464_v48 }
  0x83   : > { %382 = vst.msk [vmem:[#allocation2 + $0x40] sm:$0xff] %vm371_vm0, %v369_v50 }
  0x86   : > { %v3076_v55 = vpop.permute.xlu2 %340 }
  0x87   : > { %v364_v57 = vsel %vm362_vm1, %v3914_v52, %v3076_v55  ;;  %v423_v58 = vpop.permute.xlu1 %422 }
  0x88   : > { %377 = vst.msk [vmem:[#allocation2 + $0x18] sm:$0xff] %vm371_vm0, %v364_v57 }
  0x89   : > { %v462_v40 = vld [vmem:[#allocation2 + $0x38] sm:$0xff] }
  0x8a   : > { %v3092_v61 = vld [vmem:[#allocation2 + $0x3f] sm:$0xff] }
  0x8b   : > { %v3222_v56 = vld [vmem:[#allocation2 + $0x40] sm:$0xff] }
  0x8e   : > { %v3094_v62 = vpop.permute.xlu2 %603 }
  0x8f   : > { %v428_v63 = vpop.permute.xlu1 %427  ;;  %v458_v15 = vld [vmem:[#allocation2 + $0x18] sm:$0xff] }
  0x90   : > { %v3099_v2 = vmul.f32 %v3092_v61, %v428_v63  ;;  %v3101_v3 = vpop.permute.xlu0 %2722  ;;  %v715_v59 = vld [vmem:[#allocation2 + $0x17] sm:$0xff] }
  0x91   : > { %v3919_v4 = vunpack.i.h.bf16 %v3101_v3  ;;  %v3920_v5 = vunpack.i.l.bf16 %v3101_v3 }
  0x93   : > { %v365_v6 = vsel %vm362_vm1, %v3916_v0, %v3920_v5  ;;  %v366_v7 = vsel %vm362_vm1, %v3912_v1, %v3919_v4 }
  0x94   : > { %378 = vst.msk [vmem:[#allocation2 + $0x20] sm:$0xff] %vm371_vm0, %v365_v6 }
  0x95   : > { %379 = vst.msk [vmem:[#allocation2 + $0x28] sm:$0xff] %vm371_vm0, %v366_v7 }
  0x96   : > { %v3124_v11 = vpop.permute.xlu2 %608 }
  0x97   : > { %v3126_v12 = vpop.permute.xlu1 %437 }
  0x98   : > { %v3128_v13 = vpop.permute.xlu0 %346  ;;  %v447_v52 = vmul.f32 %v3092_v61, %v3126_v12 }
  0x99   : > { %v367_v14 = vsel %vm362_vm1, %v3911_v8, %v3128_v13 }
  0x9a   : > { %380 = vst.msk [vmem:[#allocation2 + $0x30] sm:$0xff] %vm371_vm0, %v367_v14  ;;  %v2620_v14 = vld [vmem:[%s3904_s3 + $0x78] sm:$0xff] }
  0x9b   : > { %v3135_v16 = vld [vmem:[#allocation2 + $0x20] sm:$0xff] }
  0x9c   : > { %v3138_v17 = vpack.c.bf16 %v3135_v16, %v458_v15  ;;  %v3140_v18 = vld [vmem:[#allocation2 + $0x21] sm:$0xff]  ;;  %v3146_v20 = vld [vmem:[#allocation2 + $0x19] sm:$0xff] }
  0x9d   : > { %v3150_v22 = vld [vmem:[#allocation2 + $0x27] sm:$0xff]  ;;  %v3158_v24 = vmul.f32 %v3140_v18, %v3094_v62  ;;  %v3198_v7 = vld [vmem:[#allocation2 + $0x1f] sm:$0xff] }
  0x9e   : > { %v3142_v19 = vpop.permute.xlu2 %417  ;;  %2359 = vmatmul.msk.bf16.gmra.mxu0 %vm371_vm0, %v3138_v17  ;;  %v3170_v32 = vld [vmem:[#allocation2 + $0x28] sm:$0xff]  ;;  %v444_v42 = vmul.f32 %v3150_v22, %v423_v58 }
  0x9f   : > { %v3148_v21 = vpop.permute.xlu1 %598 }
  0xa0   : > { %v3154_v23 = vmul.f32 %v3148_v21, %v3146_v20  ;;  %v433_v25 = vpop.permute.xlu0 %432 }
  0xa1   : > { %v967_v26 = vld [vmem:[#allocation2 + $0x2f] sm:$0xff]  ;;  %v390_v27 = vld [vmem:[#allocation2 + $0x37] sm:$0xff]  ;;  %v3161_v28 = vmul.f32 %v3092_v61, %v433_v25 }
  0xa2   : > { %v3163_v29 = vld [vmem:[#allocation2 + $0x30] sm:$0xff]  ;;  %v3166_v30 = vmul.f32 %v967_v26, %v3142_v19  ;;  %v1144_v31 = vpack.c.bf16 %v3158_v24, %v3154_v23  ;;  %v445_v44 = vmul.f32 %v967_v26, %v428_v63  ;;  %v3178_v48 = vmul.f32 %v967_v26, %v423_v58 }
  0xa3   : > { %v3174_v33 = vpack.c.bf16 %v3163_v29, %v3170_v32  ;;  %v3180_v49 = vmul.f32 %v428_v63, %v390_v27  ;;  %v3182_v50 = vmul.f32 %v423_v58, %v390_v27  ;;  %v384_v63 = vld [vmem:[#allocation2 + $0x7] sm:$0xff] }
  0xa4   : > { %v450_v51 = vpack.c.bf16 %v445_v44, %v444_v42 }
  0xa5   : > { %2360 = vmatmul.msk.bf16.vlgmr.msra.gmra.mxu2 %vm371_vm0, %v3174_v33  ;;  %v732_v58 = vpack.c.bf16 %v3180_v49, %v3178_v48  ;;  %v982_v6 = vpack.c.bf16 %v3099_v2, %v3182_v50 }
  0xa6   : > { %v3192_v57 = vpop.permute.xlu2 %352  ;;  %2372 = vmatmul.msk.bf16.vlgmr.msra.gmra.mxu3 %vm371_vm0, %v450_v51  ;;  %1019 = vmatpush.bf16.msra.mxu2 %v2618_v54 }
  0xa7   : > { %v370_v9 = vsel %vm362_vm1, %v3909_v37, %v3192_v57  ;;  %v408_v10 = vpop.permute.xlu1 %407  ;;  %v2615_v37 = vld [vmem:[%s3904_s3 + $0x50] sm:$0xff]  ;;  %1097 = vmatpush.bf16.msra.mxu3 %v2620_v14 }
  0xa8   : > { %383 = vst.msk [vmem:[#allocation2 + $0x48] sm:$0xff] %vm371_vm0, %v370_v9  ;;  %v441_v26 = vmul.f32 %v408_v10, %v385_v53  ;;  %v3210_v42 = vmul.f32 %v408_v10, %v3198_v7  ;;  %v403_v44 = vpop.permute.xlu0 %402  ;;  %v808_v9 = vpack.c.bf16 %v458_v15, %v3050_v47  ;;  %934 = vmatpush.bf16.msrb.mxu1 %v2615_v37 }
  0xa9   : > { %v440_v41 = vmul.f32 %v403_v44, %v384_v63  ;;  %v3215_v51 = vmul.f32 %v715_v59, %v403_v44  ;;  %v2622_v63 = vld [vmem:[%s3904_s3 + $0x88] sm:$0xff]  ;;  %v3231_v47 = vpack.c.bf16 %v3222_v56, %v462_v40  ;;  %v722_v4 = vmul.f32 %v403_v44, %v385_v53 }
  0xaa   : > { %1183 = vmatpush.bf16.msra.mxu0 %v2622_v63 }
  0xab   : > { %v980_v54 = vpack.c.bf16 %v3210_v42, %v3215_v51  ;;  %v448_v8 = vpack.c.bf16 %v441_v26, %v440_v41  ;;  %v446_v26 = vmul.f32 %v433_v25, %v390_v27 }
  0xad   : > { %2370 = vmatmul.msk.bf16.vlgmr.msra.gmra.mxu1 %vm371_vm0, %v448_v8  ;;  %v451_v35 = vpack.c.bf16 %v447_v52, %v446_v26  ;;  %v636_v26 = vmul.f32 %v3148_v21, %v579_v46  ;;  %v2621_v46 = vld [vmem:[%s3904_s3 + $0x80] sm:$0xff] }
  0xae   : > { %2426 = vmatmul.msk.bf16.vlgmr.msrb.gmra.mxu0 %vm371_vm0, %v808_v9 }
  0xaf   : > { %v413_v1 = vpop.permute.xlu1 %412  ;;  %v721_v41 = vld [vmem:[#allocation2 + $0x47] sm:$0xff]  ;;  %v971_v15 = vld [vmem:[#allocation2 + $0x4f] sm:$0xff]  ;;  %1184 = vmatpush.bf16.msra.mxu0 %v2621_v46 }
  0xb0   : > { %v3228_v14 = vmul.f32 %v3150_v22, %v413_v1  ;;  %v3234_v8 = vmul.f32 %v721_v41, %v3126_v12  ;;  %v3238_v9 = vmul.f32 %v721_v41, %v433_v25  ;;  %v3245_v27 = vmul.f32 %v971_v15, %v3126_v12  ;;  %v580_v41 = vld [vmem:[#allocation2 + $0x11] sm:$0xff]  ;;  %v1133_v46 = vld [vmem:[#allocation2 + $0x41] sm:$0xff] }
  0xb1   : > { %v442_v45 = vmul.f32 %v715_v59, %v413_v1  ;;  %v443_v25 = vmul.f32 %v3142_v19, %v3198_v7  ;;  %v809_v12 = vpack.c.bf16 %v3170_v32, %v3135_v16  ;;  %v637_v52 = vmul.f32 %v3094_v62, %v580_v41  ;;  %v2619_v32 = vld [vmem:[%s3904_s3 + $0x70] sm:$0xff] }
  0xb2   : > { %v981_v37 = vpack.c.bf16 %v3166_v30, %v3228_v14  ;;  %v733_v63 = vpack.c.bf16 %v3234_v8, %v3161_v28  ;;  %v983_v0 = vpack.c.bf16 %v3245_v27, %v3238_v9  ;;  %v723_v15 = vmul.f32 %v715_v59, %v408_v10  ;;  %1098 = vmatpush.bf16.msra.mxu3 %v2619_v32  ;;  %v614_v59 = vpop.permute.xlu0 %613 }
  0xb3   : > { %v449_v61 = vpack.c.bf16 %v443_v25, %v442_v45  ;;  %v2617_v45 = vld [vmem:[%s3904_s3 + $0x60] sm:$0xff]  ;;  %v886_v16 = vmul.f32 %v3148_v21, %v580_v41  ;;  %v810_v21 = vpack.c.bf16 %v462_v40, %v3163_v29  ;;  %v638_v10 = vmul.f32 %v3124_v11, %v3146_v20  ;;  %v881_v41 = vld [vmem:[#allocation2 + $0x29] sm:$0xff] }
  0xb4   : > { %v730_v5 = vpack.c.bf16 %v723_v15, %v722_v4  ;;  %1020 = vmatpush.bf16.msra.mxu2 %v2617_v45  ;;  %v887_v4 = vmul.f32 %v3094_v62, %v3146_v20  ;;  %v724_v44 = vmul.f32 %v413_v1, %v3198_v7  ;;  %v725_v62 = vmul.f32 %v3150_v22, %v3142_v19  ;;  %v1131_v19 = vld [vmem:[#allocation2 + $0x31] sm:$0xff] }
  0xb5   : > { %2361 = vmatmul.msk.bf16.gmra.mxu2 %vm371_vm0, %v3231_v47  ;;  %v889_v40 = vmul.f32 %v881_v41, %v614_v59  ;;  %v888_v29 = vmul.f32 %v3140_v18, %v3124_v11 }
  0xb6   : > { %2373 = vmatmul.msk.bf16.gmra.mxu3 %vm371_vm0, %v451_v35  ;;  %v644_v35 = vpack.c.bf16 %v637_v52, %v636_v26  ;;  %v894_v53 = vpack.c.bf16 %v887_v4, %v886_v16 }
  0xb7   : > { %v895_v52 = vpack.c.bf16 %v889_v40, %v888_v29  ;;  %v624_v20 = vpop.permute.xlu1 %623  ;;  %v2624_v40 = vld [vmem:[%s3906_s5 + $0x8] sm:$0xff] }
  0xb8   : > { %v641_v22 = vmul.f32 %v1131_v19, %v624_v20  ;;  %v1141_v28 = vmul.f32 %v1133_v46, %v624_v20  ;;  %1348 = vmatpush.bf16.msra.mxu1 %v2624_v40 }
  0xba   : > { %v619_v26 = vpop.permute.xlu0 %618 }
  0xbb   : > { %v640_v7 = vmul.f32 %v881_v41, %v619_v26  ;;  %v890_v45 = vmul.f32 %v1131_v19, %v619_v26 }
  0xbd   : > { %2371 = vmatmul.msk.bf16.gmra.mxu1 %vm371_vm0, %v449_v61  ;;  %v731_v61 = vpack.c.bf16 %v725_v62, %v724_v44  ;;  %v646_v15 = vpack.c.bf16 %v641_v22, %v640_v7 }
  0xbe   : > { %2427 = vmatmul.msk.bf16.gmra.mxu0 %vm371_vm0, %v809_v12  ;;  %v3287_v12 = vld [vmem:[#allocation2 + $0x48] sm:$0xff] }
  0xbf   : > { %v811_v1 = vpack.c.bf16 %v3287_v12, %v3222_v56  ;;  %v634_v56 = vpop.permute.xlu1 %633 }
  0xc0   : > { %v643_v4 = vmul.f32 %v1133_v46, %v634_v56 }
  0xc2   : > { %v629_v32 = vpop.permute.xlu0 %628 }
  0xc3   : > { %v892_v49 = vmul.f32 %v1133_v46, %v629_v32 }
  0xc5   : > { %2394 = vmatmul.msk.bf16.vlgmr.msrb.gmra.mxu2 %vm371_vm0, %v644_v35  ;;  %v883_v35 = vld [vmem:[#allocation2 + $0x39] sm:$0xff] }
  0xc6   : > { %2410 = vmatmul.msk.bf16.vlgmr.msrb.gmra.mxu3 %vm371_vm0, %v730_v5  ;;  %v639_v5 = vmul.f32 %v3140_v18, %v614_v59  ;;  %v891_v18 = vmul.f32 %v883_v35, %v624_v20 }
  0xc8   : > { %v645_v25 = vpack.c.bf16 %v639_v5, %v638_v10  ;;  %v896_v16 = vpack.c.bf16 %v891_v18, %v890_v45  ;;  %v885_v5 = vld [vmem:[#allocation2 + $0x49] sm:$0xff]  ;;  %v1138_v10 = vmul.f32 %v881_v41, %v3124_v11 }
  0xc9   : > { %v893_v48 = vmul.f32 %v885_v5, %v634_v56 }
  0xcb   : > { %v897_v44 = vpack.c.bf16 %v893_v48, %v892_v49 }
  0xcd   : > { %2442 = vmatmul.msk.bf16.vlgmr.msrb.gmra.mxu1 %vm371_vm0, %v894_v53  ;;  %v642_v53 = vmul.f32 %v883_v35, %v629_v32 }
  0xce   : > { %2428 = vmatmul.msk.bf16.gmra.mxu0 %vm371_vm0, %v810_v21 }
  0xcf   : > { %v647_v21 = vpack.c.bf16 %v643_v4, %v642_v53 }
  0xd5   : > { %2395 = vmatmul.msk.bf16.gmra.mxu2 %vm371_vm0, %v645_v25 }
  0xd6   : > { %2411 = vmatmul.msk.bf16.gmra.mxu3 %vm371_vm0, %v731_v61  ;;  %v1057_v61 = vld [vmem:[#allocation2 + $0x50] sm:$0xff] }
  0xd7   : > { %v1061_v2 = vpack.c.bf16 %v1057_v61, %v3287_v12 }
  0xdd   : > { %2443 = vmatmul.msk.bf16.gmra.mxu1 %vm371_vm0, %v895_v52 }
  0xde   : > { %2429 = vmatmul.msk.bf16.gmra.mxu0 %vm371_vm0, %v811_v1 }
  0xe5   : > { %2396 = vmatmul.msk.bf16.gmra.mxu2 %vm371_vm0, %v646_v15 }
  0xe6   : > { %2412 = vmatmul.msk.bf16.gmra.mxu3 %vm371_vm0, %v732_v58  ;;  %v1139_v58 = vmul.f32 %v1131_v19, %v614_v59 }
  0xe8   : > { %v1145_v23 = vpack.c.bf16 %v1139_v58, %v1138_v10 }
  0xed   : > { %2444 = vmatmul.msk.bf16.gmra.mxu1 %vm371_vm0, %v896_v16 }
  0xee   : > { %2490 = vmatmul.msk.bf16.vlgmr.msra.gmra.mxu0 %vm371_vm0, %v1144_v31  ;;  %v1140_v31 = vmul.f32 %v883_v35, %v619_v26 }
  0xf0   : > { %v1146_v8 = vpack.c.bf16 %v1141_v28, %v1140_v31 }
  0xf5   : > { %2397 = vmatmul.msk.bf16.gmra.mxu2 %vm371_vm0, %v647_v21  ;;  %v2623_v21 = vld [vmem:[%s3906_s5] sm:$0xff] }
  0xf6   : > { %2413 = vmatmul.msk.bf16.gmra.mxu3 %vm371_vm0, %v733_v63  ;;  %v1135_v63 = vld [vmem:[#allocation2 + $0x51] sm:$0xff]  ;;  %1395 = vmatpush.bf16.msrb.mxu2 %v2623_v21 }
  0xf7   : > { %v1143_v42 = vmul.f32 %v1135_v63, %v634_v56 }
  0xfd   : > { %2445 = vmatmul.msk.bf16.gmra.mxu1 %vm371_vm0, %v897_v44 }
  0xfe   : > { %2491 = vmatmul.msk.bf16.gmra.mxu0 %vm371_vm0, %v1145_v23  ;;  %v2626_v23 = vld [vmem:[%s3906_s5 + $0x18] sm:$0xff] }
  0xff   : > { %v3317_v24 = vpop.f32.mrf.mxu0  ;;  %1591 = vmatpush.bf16.msrb.mxu0 %v2626_v23 }
 0x105   : > { %2458 = vmatmul.msk.bf16.vlgmr.msra.gmra.mxu2 %vm371_vm0, %v980_v54 }
 0x106   : > { %2474 = vmatmul.msk.bf16.vlgmr.msra.gmra.mxu3 %vm371_vm0, %v3138_v17  ;;  %v1142_v17 = vmul.f32 %v885_v5, %v629_v32  ;;  %v2625_v5 = vld [vmem:[%s3906_s5 + $0x10] sm:$0xff] }
 0x107   : > { %v3320_v11 = vpop.f32.mrf.mxu0  ;;  %1513 = vmatpush.bf16.msrb.mxu3 %v2625_v5  ;;  %v3406_v5 = vld [vmem:[%s3905_s4] ss:$0 sm:$0xff] }
 0x108   : > { %v1147_v54 = vpack.c.bf16 %v1143_v42, %v1142_v17 }
 0x10e   : > { %2492 = vmatmul.msk.bf16.gmra.mxu0 %vm371_vm0, %v1146_v8 }
 0x115   : > { %2459 = vmatmul.msk.bf16.gmra.mxu2 %vm371_vm0, %v981_v37 }
 0x116   : > { %2475 = vmatmul.msk.bf16.gmra.mxu3 %vm371_vm0, %v3174_v33 }
 0x11b   : > { %v3328_v51 = vpop.f32.mrf.mxu0 }
 0x11e   : > { %2493 = vmatmul.msk.bf16.gmra.mxu0 %vm371_vm0, %v1147_v54  ;;  %v2627_v54 = vld [vmem:[%s3906_s5 + $0x20] sm:$0xff] }
 0x11f   : > { %1661 = vmatpush.bf16.msrb.mxu1 %v2627_v54  ;;  %v3412_v54 = vpop.permute.xlu2 %1256 }
 0x123   : > { %v3331_v59 = vpop.f32.mrf.mxu0 }
 0x125   : > { %2460 = vmatmul.msk.bf16.gmra.mxu2 %vm371_vm0, %v982_v6 }
 0x126   : > { %2476 = vmatmul.msk.bf16.gmra.mxu3 %vm371_vm0, %v3231_v47 }
 0x128   : > { %v516_v30 = vpop.f32.mrf.mxu2 }
 0x129   : > { %v569_v14 = vpop.f32.mrf.mxu3 }
 0x12a   : > { %v3339_v33 = vadd.f32 %v569_v14, %v516_v30  ;;  %v559_v20 = vpop.f32.mrf.mxu1 }
 0x12b   : > { %v850_v37 = vpop.f32.mrf.mxu0  ;;  %v560_v44 = vadd.f32 %v559_v20, %v3317_v24 }
 0x130   : > { %v3341_v62 = vpop.f32.mrf.mxu2 }
 0x131   : > { %v3343_v25 = vpop.f32.mrf.mxu3 }
 0x132   : > { %v561_v7 = vpop.f32.mrf.mxu1 }
 0x133   : > { %v852_v50 = vpop.f32.mrf.mxu0  ;;  %v562_v17 = vadd.f32 %v561_v7, %v3320_v11 }
 0x135   : > { %2461 = vmatmul.msk.bf16.gmra.mxu2 %vm371_vm0, %v983_v0 }
 0x136   : > { %2477 = vmatmul.msk.bf16.gmra.mxu3 %vm371_vm0, %v1061_v2 }
 0x138   : > { %v521_v6 = vpop.f32.mrf.mxu2 }
 0x139   : > { %v574_v47 = vpop.f32.mrf.mxu3 }
 0x13a   : > { %v3351_v41 = vadd.f32 %v574_v47, %v521_v6  ;;  %v564_v16 = vpop.f32.mrf.mxu1 }
 0x13b   : > { %v3358_v52 = vpop.f32.mrf.mxu0 }
 0x140   : > { %v3356_v29 = vpop.f32.mrf.mxu2 }
 0x141   : > { %v3360_v9 = vpop.f32.mrf.mxu3 }
 0x142   : > { %v566_v4 = vpop.f32.mrf.mxu1 }
 0x143   : > { %v3362_v12 = vpop.f32.mrf.mxu0 }
 0x148   : > { %v686_v0 = vpop.f32.mrf.mxu2 }
 0x149   : > { %v772_v27 = vpop.f32.mrf.mxu3  ;;  %v706_v31 = vadd.f32 %v686_v0, %v560_v44  ;;  %v565_v0 = vadd.f32 %v564_v16, %v3328_v51 }
 0x14a   : > { %v936_v58 = vpop.f32.mrf.mxu1 }
 0x14b   : > { %v3364_v19 = vpop.f32.mrf.mxu0  ;;  %v792_v63 = vadd.f32 %v772_v27, %v706_v31  ;;  %v567_v31 = vadd.f32 %v566_v4, %v3331_v59  ;;  %v3415_v59 = vpop.permute.xlu0 %1261 }
 0x14d   : > { %v870_v14 = vadd.f32 %v850_v37, %v792_v63 }
 0x14f   : > { %v956_v2 = vadd.f32 %v936_v58, %v870_v14 }
 0x150   : > { %v688_v26 = vpop.f32.mrf.mxu2 }
 0x151   : > { %v774_v1 = vpop.f32.mrf.mxu3  ;;  %v707_v61 = vadd.f32 %v688_v26, %v562_v17 }
 0x152   : > { %v938_v30 = vpop.f32.mrf.mxu1 }
 0x153   : > { %v3366_v35 = vpop.f32.mrf.mxu0  ;;  %v793_v6 = vadd.f32 %v774_v1, %v707_v61 }
 0x155   : > { %v871_v21 = vadd.f32 %v852_v50, %v793_v6 }
 0x157   : > { %v957_v26 = vadd.f32 %v938_v30, %v871_v21 }
 0x158   : > { %v691_v22 = vpop.f32.mrf.mxu2 }
 0x159   : > { %v777_v15 = vpop.f32.mrf.mxu3  ;;  %v708_v11 = vadd.f32 %v691_v22, %v565_v0 }
 0x15a   : > { %v941_v44 = vpop.f32.mrf.mxu1 }
 0x15b   : > { %v3370_v32 = vpop.f32.mrf.mxu0  ;;  %v794_v23 = vadd.f32 %v777_v15, %v708_v11  ;;  %v1308_v15 = vld [vmem:[#allocation3 + $0x8] sm:$0xff] }
 0x15d   : > { %v872_v16 = vadd.f32 %v3358_v52, %v794_v23  ;;  %v3428_v23 = vpop.permute.xlu1 %1435 }
 0x15f   : > { %v958_v61 = vadd.f32 %v941_v44, %v872_v16 }
 0x160   : > { %v693_v18 = vpop.f32.mrf.mxu2 }
 0x161   : > { %v779_v45 = vpop.f32.mrf.mxu3  ;;  %v709_v63 = vadd.f32 %v693_v18, %v567_v31 }
 0x162   : > { %v943_v30 = vpop.f32.mrf.mxu1 }
 0x163   : > { %v3384_v49 = vpop.f32.mrf.mxu0 }
 0x168   : > { %v3368_v56 = vpop.f32.mrf.mxu2 }
 0x169   : > { %v3372_v46 = vpop.f32.mrf.mxu3 }
 0x16b   : > { %v1186_v8 = vpop.f32.mrf.mxu0 }
 0x170   : > { %v3374_v53 = vpop.f32.mrf.mxu2 }
 0x171   : > { %v3382_v48 = vpop.f32.mrf.mxu3 }
 0x173   : > { %v1188_v47 = vpop.f32.mrf.mxu0 }
 0x178   : > { %v3386_v10 = vpop.f32.mrf.mxu2 }
 0x179   : > { %v3392_v28 = vpop.f32.mrf.mxu3 }
 0x17b   : > { %v1191_v50 = vpop.f32.mrf.mxu0 }
 0x180   : > { %v3394_v42 = vpop.f32.mrf.mxu2 }
 0x181   : > { %v3400_v24 = vpop.f32.mrf.mxu3 }
 0x183   : > { %v1193_v44 = vpop.f32.mrf.mxu0 }
 0x188   : > { %v1022_v40 = vpop.f32.mrf.mxu2 }
 0x189   : > { %v1042_v27 = vadd.f32 %v1022_v40, %v956_v2  ;;  %v1100_v20 = vpop.f32.mrf.mxu3  ;;  %v795_v2 = vadd.f32 %v779_v45, %v709_v63  ;;  %v710_v45 = vadd.f32 %v3368_v56, %v3339_v33  ;;  %v946_v56 = vpop.f32.mrf.mxu1 }
 0x18b   : > { %v1120_v7 = vadd.f32 %v1100_v20, %v1042_v27  ;;  %v873_v21 = vadd.f32 %v3362_v12, %v795_v2  ;;  %v572_v12 = vadd.f32 %v3343_v25, %v3341_v62  ;;  %v3449_v2 = vpop.permute.xlu0 %1266 }
 0x18d   : > { %v1206_v37 = vadd.f32 %v1186_v8, %v1120_v7  ;;  %v1238_v8 = vld [vmem:[#allocation3 + $0x7] sm:$0xff]  ;;  %v959_v31 = vadd.f32 %v943_v30, %v873_v21 }
 0x18e   : > { %v1294_v52 = vmul.f32 %v3412_v54, %v1238_v8  ;;  %v711_v8 = vadd.f32 %v3374_v53, %v572_v12 }
 0x18f   : > { %v1218_v1 = vadd.f32 %v3406_v5, %v1206_v37 }
 0x190   : > { %v1024_v58 = vpop.f32.mrf.mxu2 }
 0x191   : > { %1230 = vst.msk [vmem:[#allocation3 + $0x10] sm:$0xff] %vm362_vm1, %v1218_v1  ;;  %v1043_v51 = vadd.f32 %v1024_v58, %v957_v26  ;;  %v1102_v22 = vpop.f32.mrf.mxu3  ;;  %v796_v1 = vadd.f32 %v3372_v46, %v710_v45  ;;  %v3431_v58 = vpop.permute.xlu2 %1440 }
 0x193   : > { %v1121_v17 = vadd.f32 %v1102_v22, %v1043_v51  ;;  %v874_v62 = vadd.f32 %v3364_v19, %v796_v1  ;;  %v3455_v19 = vpop.permute.xlu1 %1271 }
 0x195   : > { %v1207_v14 = vadd.f32 %v1188_v47, %v1121_v17 }
 0x197   : > { %v1219_v6 = vadd.f32 %v3406_v5, %v1207_v14 }
 0x198   : > { %v1027_v4 = vpop.f32.mrf.mxu2  ;;  %v3417_v40 = vld [vmem:[#allocation3 + $0x10] sm:$0xff] }
 0x199   : > { %v1239_v0 = vld [vmem:[#allocation3 + $0xf] sm:$0xff]  ;;  %1231 = vst.msk [vmem:[#allocation3 + $0x18] sm:$0xff] %vm362_vm1, %v1219_v6  ;;  %v1044_v18 = vadd.f32 %v1027_v4, %v958_v61  ;;  %v1316_v47 = vpack.c.bf16 %v3417_v40, %v1308_v15  ;;  %v1105_v20 = vpop.f32.mrf.mxu3  ;;  %v1196_v4 = vpop.f32.mrf.mxu0 }
 0x19a   : > { %v1295_v27 = vmul.f32 %v3415_v59, %v1239_v0  ;;  %v1417_v26 = vld [vmem:[#allocation3 + $0x9] sm:$0xff]  ;;  %v1551_v17 = vmul.f32 %v3412_v54, %v1239_v0  ;;  %v960_v0 = vadd.f32 %v946_v56, %v874_v62 }
 0x19b   : > { %v1122_v11 = vadd.f32 %v1105_v20, %v1044_v18  ;;  %2500 = vmatmul.msk.bf16.vlgmr.msra.gmra.mxu1 %vm362_vm1, %v1316_v47  ;;  %v2628_v56 = vld [vmem:[%s3906_s5 + $0x28] sm:$0xff] }
 0x19c   : > { %v1302_v7 = vpack.c.bf16 %v1295_v27, %v1294_v52  ;;  %v797_v52 = vadd.f32 %v3382_v48, %v711_v8  ;;  %1739 = vmatpush.bf16.msra.mxu2 %v2628_v56 }
 0x19d   : > { %v1208_v37 = vadd.f32 %v1191_v50, %v1122_v11  ;;  %v1473_v50 = vmul.f32 %v3428_v23, %v1417_v26 }
 0x19e   : > { %2508 = vmatmul.msk.bf16.vlgmr.msrb.gmra.mxu2 %vm362_vm1, %v1302_v7  ;;  %v948_v7 = vpop.f32.mrf.mxu1  ;;  %v875_v26 = vadd.f32 %v3366_v35, %v797_v52 }
 0x19f   : > { %v1220_v33 = vadd.f32 %v3406_v5, %v1208_v37 }
 0x1a0   : > { %v1029_v51 = vpop.f32.mrf.mxu2  ;;  %v3436_v22 = vld [vmem:[#allocation3 + $0x11] sm:$0xff] }
 0x1a1   : > { %v3439_v16 = vld [vmem:[#allocation3 + $0x17] sm:$0xff]  ;;  %1232 = vst.msk [vmem:[#allocation3 + $0x20] sm:$0xff] %vm362_vm1, %v1220_v33  ;;  %v1045_v63 = vadd.f32 %v1029_v51, %v959_v31  ;;  %v1474_v46 = vmul.f32 %v3431_v58, %v3436_v22  ;;  %v1107_v25 = vpop.f32.mrf.mxu3  ;;  %v3489_v51 = vpop.permute.xlu0 %1450 }
 0x1a2   : > { %v1552_v14 = vmul.f32 %v3439_v16, %v3415_v59  ;;  %v3457_v53 = vld [vmem:[#allocation3 + $0x18] sm:$0xff]  ;;  %v1296_v48 = vmul.f32 %v3439_v16, %v3449_v2 }
 0x1a3   : > { %v1123_v30 = vadd.f32 %v1107_v25, %v1045_v63  ;;  %v1481_v15 = vpack.c.bf16 %v1474_v46, %v1473_v50  ;;  %v961_v50 = vadd.f32 %v948_v7, %v875_v26  ;;  %v577_v46 = vadd.f32 %v3360_v9, %v3356_v29  ;;  %v3524_v7 = vpop.permute.xlu1 %1276 }
 0x1a4   : > { %v1559_v61 = vpack.c.bf16 %v1552_v14, %v1551_v17  ;;  %v1198_v17 = vpop.f32.mrf.mxu0 }
 0x1a5   : > { %v1209_v6 = vadd.f32 %v1193_v44, %v1123_v30  ;;  %2526 = vmatmul.msk.bf16.vlgmr.msrb.gmra.mxu3 %vm362_vm1, %v1481_v15  ;;  %v712_v44 = vadd.f32 %v3386_v10, %v3351_v41  ;;  %v2629_v41 = vld [vmem:[%s3906_s5 + $0x30] sm:$0xff]  ;;  %v3486_v10 = vpop.permute.xlu2 %1445 }
 0x1a6   : > { %2536 = vmatmul.msk.bf16.vlgmr.msrb.gmra.mxu0 %vm362_vm1, %v1559_v61  ;;  %1817 = vmatpush.bf16.msra.mxu3 %v2629_v41 }
 0x1a7   : > { %v1221_v18 = vadd.f32 %v3406_v5, %v1209_v6  ;;  %v798_v35 = vadd.f32 %v3392_v28, %v712_v44 }
 0x1a8   : > { %v1032_v47 = vpop.f32.mrf.mxu2  ;;  %v3459_v27 = vld [vmem:[#allocation3 + $0x20] sm:$0xff] }
 0x1a9   : > { %v3461_v45 = vld [vmem:[#allocation3 + $0x1f] sm:$0xff]  ;;  %1233 = vst.msk [vmem:[#allocation3 + $0x28] sm:$0xff] %vm362_vm1, %v1221_v18  ;;  %v1046_v20 = vadd.f32 %v1032_v47, %v960_v0  ;;  %v3466_v21 = vpack.c.bf16 %v3459_v27, %v3457_v53  ;;  %v1110_v37 = vpop.f32.mrf.mxu3  ;;  %v876_v9 = vadd.f32 %v3370_v32, %v798_v35  ;;  %v713_v0 = vadd.f32 %v3394_v42, %v577_v46 }
 0x1aa   : > { %v1297_v11 = vmul.f32 %v3455_v19, %v3461_v45  ;;  %v3478_v12 = vld [vmem:[#allocation3 + $0x19] sm:$0xff]  ;;  %v1553_v15 = vmul.f32 %v3449_v2, %v3461_v45 }
 0x1ab   : > { %v1124_v1 = vadd.f32 %v1110_v37, %v1046_v20  ;;  %2501 = vmatmul.msk.bf16.gmra.mxu1 %vm362_vm1, %v3466_v21  ;;  %v1475_v25 = vmul.f32 %v3486_v10, %v3478_v12  ;;  %v3510_v6 = vmul.f32 %v3428_v23, %v3478_v12  ;;  %v951_v20 = vpop.f32.mrf.mxu1  ;;  %v2630_v32 = vld [vmem:[%s3906_s5 + $0x38] sm:$0xff]  ;;  %v799_v42 = vadd.f32 %v3400_v24, %v713_v0  ;;  %v3557_v0 = vpop.permute.xlu1 %1460 }
 0x1ac   : > { %v1303_v31 = vpack.c.bf16 %v1297_v11, %v1296_v48  ;;  %v962_v44 = vadd.f32 %v951_v20, %v876_v9  ;;  %1887 = vmatpush.bf16.msra.mxu0 %v2630_v32  ;;  %v1700_v48 = vmul.f32 %v3431_v58, %v3478_v12 }
 0x1ad   : > { %v1210_v33 = vadd.f32 %v1196_v4, %v1124_v1  ;;  %v3528_v26 = vpop.permute.xlu2 %1281 }
 0x1ae   : > { %2509 = vmatmul.msk.bf16.gmra.mxu2 %vm362_vm1, %v1303_v31 }
 0x1af   : > { %v1222_v63 = vadd.f32 %v3406_v5, %v1210_v33 }
 0x1b0   : > { %v1034_v14 = vpop.f32.mrf.mxu2  ;;  %v3494_v62 = vld [vmem:[#allocation3 + $0x21] sm:$0xff] }
 0x1b1   : > { %v3498_v8 = vld [vmem:[#allocation3 + $0x27] sm:$0xff]  ;;  %1234 = vst.msk [vmem:[#allocation3 + $0x30] sm:$0xff] %vm362_vm1, %v1222_v63  ;;  %v1047_v28 = vadd.f32 %v1034_v14, %v961_v50  ;;  %v1476_v30 = vmul.f32 %v3489_v51, %v3494_v62  ;;  %v1112_v61 = vpop.f32.mrf.mxu3  ;;  %v3514_v4 = vmul.f32 %v3431_v58, %v3494_v62  ;;  %v1201_v63 = vpop.f32.mrf.mxu0  ;;  %v1701_v58 = vmul.f32 %v3486_v10, %v3494_v62 }
 0x1b2   : > { %v1554_v29 = vmul.f32 %v3498_v8, %v3455_v19  ;;  %v3530_v31 = vld [vmem:[#allocation3 + $0x28] sm:$0xff]  ;;  %v1298_v24 = vmul.f32 %v3498_v8, %v3524_v7 }
 0x1b3   : > { %v1125_v52 = vadd.f32 %v1112_v61, %v1047_v28  ;;  %v1482_v18 = vpack.c.bf16 %v1476_v30, %v1475_v25  ;;  %v2631_v28 = vld [vmem:[%s3906_s5 + $0x40] sm:$0xff]  ;;  %v953_v9 = vpop.f32.mrf.mxu1 }
 0x1b4   : > { %v1560_v47 = vpack.c.bf16 %v1554_v29, %v1553_v15  ;;  %1965 = vmatpush.bf16.msra.mxu1 %v2631_v28  ;;  %v3554_v29 = vpop.permute.xlu0 %1455 }
 0x1b5   : > { %v1211_v11 = vadd.f32 %v1198_v17, %v1125_v52  ;;  %2527 = vmatmul.msk.bf16.gmra.mxu3 %vm362_vm1, %v1482_v18  ;;  %v877_v17 = vadd.f32 %v3384_v49, %v799_v42 }
 0x1b6   : > { %2537 = vmatmul.msk.bf16.gmra.mxu0 %vm362_vm1, %v1560_v47 }
 0x1b7   : > { %v1223_v37 = vadd.f32 %v3406_v5, %v1211_v11  ;;  %v963_v61 = vadd.f32 %v953_v9, %v877_v17 }
 0x1b8   : > { %v1037_v1 = vpop.f32.mrf.mxu2  ;;  %v3532_v33 = vld [vmem:[#allocation3 + $0x30] sm:$0xff] }
 0x1b9   : > { %v3534_v56 = vld [vmem:[#allocation3 + $0x2f] sm:$0xff]  ;;  %1235 = vst.msk [vmem:[#allocation3 + $0x38] sm:$0xff] %vm362_vm1, %v1223_v37  ;;  %v1048_v41 = vadd.f32 %v1037_v1, %v962_v44  ;;  %v3539_v35 = vpack.c.bf16 %v3532_v33, %v3530_v31  ;;  %v1115_v46 = vpop.f32.mrf.mxu3 }
 0x1ba   : > { %v1299_v50 = vmul.f32 %v3528_v26, %v3534_v56  ;;  %v3552_v15 = vld [vmem:[#allocation3 + $0x29] sm:$0xff]  ;;  %v1555_v44 = vmul.f32 %v3524_v7, %v3534_v56 }
 0x1bb   : > { %v1126_v14 = vadd.f32 %v1115_v46, %v1048_v41  ;;  %2502 = vmatmul.msk.bf16.gmra.mxu1 %vm362_vm1, %v3539_v35  ;;  %v1477_v47 = vmul.f32 %v3554_v29, %v3552_v15  ;;  %v3574_v1 = vmul.f32 %v3486_v10, %v3552_v15  ;;  %v1203_v46 = vpop.f32.mrf.mxu0 }
 0x1bc   : > { %v1304_v25 = vpack.c.bf16 %v1299_v50, %v1298_v24 }
 0x1bd   : > { %v1212_v30 = vadd.f32 %v1201_v63, %v1126_v14 }
 0x1be   : > { %2510 = vmatmul.msk.bf16.gmra.mxu2 %vm362_vm1, %v1304_v25  ;;  %v3584_v25 = vpop.permute.xlu2 %1286 }
 0x1bf   : > { %v1224_v49 = vadd.f32 %v3406_v5, %v1212_v30  ;;  %v3587_v30 = vpop.permute.xlu0 %1291 }
 0x1c0   : > { %v1039_v52 = vpop.f32.mrf.mxu2  ;;  %v3559_v18 = vld [vmem:[#allocation3 + $0x31] sm:$0xff] }
 0x1c1   : > { %v3563_v20 = vld [vmem:[#allocation3 + $0x37] sm:$0xff]  ;;  %1236 = vst.msk [vmem:[#allocation3 + $0x40] sm:$0xff] %vm362_vm1, %v1224_v49  ;;  %v1049_v11 = vadd.f32 %v1039_v52, %v963_v61  ;;  %v1478_v32 = vmul.f32 %v3557_v0, %v3559_v18  ;;  %v1117_v37 = vpop.f32.mrf.mxu3  ;;  %v3578_v41 = vmul.f32 %v3489_v51, %v3559_v18 }
 0x1c2   : > { %v1556_v42 = vmul.f32 %v3563_v20, %v3528_v26  ;;  %v1314_v9 = vld [vmem:[#allocation3 + $0x38] sm:$0xff] }
 0x1c3   : > { %v1127_v24 = vadd.f32 %v1117_v37, %v1049_v11  ;;  %v1483_v50 = vpack.c.bf16 %v1478_v32, %v1477_v47  ;;  %v1300_v47 = vmul.f32 %v3563_v20, %v3584_v25 }
 0x1c4   : > { %v1561_v63 = vpack.c.bf16 %v1556_v42, %v1555_v44  ;;  %v3600_v42 = vpop.permute.xlu1 %1465 }
 0x1c5   : > { %v1213_v14 = vadd.f32 %v1203_v46, %v1127_v24  ;;  %2528 = vmatmul.msk.bf16.gmra.mxu3 %vm362_vm1, %v1483_v50 }
 0x1c6   : > { %2538 = vmatmul.msk.bf16.gmra.mxu0 %vm362_vm1, %v1561_v63  ;;  %v3598_v44 = vpop.permute.xlu2 %1470 }
 0x1c7   : > { %v1225_v28 = vadd.f32 %v3406_v5, %v1213_v14 }
 0x1c8   : > { %v3589_v61 = vld [vmem:[#allocation3 + $0x40] sm:$0xff] }
 0x1c9   : > { %v1245_v49 = vld [vmem:[#allocation3 + $0x3f] sm:$0xff]  ;;  %1237 = vst.msk [vmem:[#allocation3 + $0x48] sm:$0xff] %vm362_vm1, %v1225_v28  ;;  %v1319_v52 = vpack.c.bf16 %v3589_v61, %v1314_v9 }
 0x1ca   : > { %v1301_v11 = vmul.f32 %v3587_v30, %v1245_v49  ;;  %v1423_v5 = vld [vmem:[#allocation3 + $0x39] sm:$0xff]  ;;  %v1557_v46 = vmul.f32 %v3584_v25, %v1245_v49 }
 0x1cb   : > { %2503 = vmatmul.msk.bf16.gmra.mxu1 %vm362_vm1, %v1319_v52  ;;  %v1479_v50 = vmul.f32 %v3600_v42, %v1423_v5 }
 0x1cc   : > { %v1305_v32 = vpack.c.bf16 %v1301_v11, %v1300_v47  ;;  %v3607_v47 = vmul.f32 %v3554_v29, %v1423_v5 }
 0x1ce   : > { %2511 = vmatmul.msk.bf16.gmra.mxu2 %vm362_vm1, %v1305_v32 }
 0x1d0   : > { %v1424_v37 = vld [vmem:[#allocation3 + $0x41] sm:$0xff]  ;;  %v1698_v10 = vld [vmem:[#allocation3 + $0x49] sm:$0xff] }
 0x1d1   : > { %v1550_v24 = vld [vmem:[#allocation3 + $0x47] sm:$0xff]  ;;  %v1480_v63 = vmul.f32 %v3598_v44, %v1424_v37  ;;  %v3610_v11 = vmul.f32 %v3557_v0, %v1424_v37  ;;  %v1705_v62 = vmul.f32 %v3600_v42, %v1424_v37 }
 0x1d2   : > { %v1558_v14 = vmul.f32 %v1550_v24, %v3587_v30 }
 0x1d3   : > { %v1484_v28 = vpack.c.bf16 %v1480_v63, %v1479_v50  ;;  %v1935_v32 = vpack.c.bf16 %v3610_v11, %v3607_v47  ;;  %v1629_v50 = vpack.c.bf16 %v3457_v53, %v3417_v40  ;;  %v1699_v63 = vmul.f32 %v3428_v23, %v3436_v22  ;;  %v1924_v47 = vld [vmem:[#allocation3 + $0x51] sm:$0xff] }
 0x1d4   : > { %v1562_v17 = vpack.c.bf16 %v1558_v14, %v1557_v46  ;;  %v1777_v14 = vmul.f32 %v3439_v16, %v3412_v54  ;;  %v1702_v40 = vmul.f32 %v3489_v51, %v3552_v15  ;;  %v1630_v23 = vpack.c.bf16 %v3530_v31, %v3459_v27  ;;  %v1628_v51 = vld [vmem:[#allocation3 + $0x48] sm:$0xff] }
 0x1d5   : > { %2529 = vmatmul.msk.bf16.gmra.mxu3 %vm362_vm1, %v1484_v28  ;;  %v1707_v46 = vpack.c.bf16 %v1700_v48, %v1699_v63  ;;  %v1780_v54 = vmul.f32 %v3455_v19, %v3534_v56  ;;  %v1779_v22 = vmul.f32 %v3498_v8, %v3449_v2  ;;  %v1704_v53 = vmul.f32 %v3557_v0, %v1423_v5  ;;  %v1854_v56 = vld [vmem:[#allocation3 + $0x50] sm:$0xff] }
 0x1d6   : > { %2539 = vmatmul.msk.bf16.gmra.mxu0 %vm362_vm1, %v1562_v17  ;;  %v1778_v17 = vmul.f32 %v3415_v59, %v3461_v45  ;;  %v1708_v59 = vpack.c.bf16 %v1702_v40, %v1701_v58  ;;  %v1631_v27 = vpack.c.bf16 %v1314_v9, %v3532_v33  ;;  %v1703_v45 = vmul.f32 %v3554_v29, %v3559_v18 }
 0x1d7   : > { %v1786_v16 = vpack.c.bf16 %v1780_v54, %v1779_v22  ;;  %v1782_v2 = vmul.f32 %v3528_v26, %v1245_v49  ;;  %v1781_v19 = vmul.f32 %v3563_v20, %v3524_v7  ;;  %v1706_v8 = vmul.f32 %v1698_v10, %v3598_v44  ;;  %v1776_v26 = vld [vmem:[#allocation3 + $0x4f] sm:$0xff] }
 0x1d8   : > { %v1785_v28 = vpack.c.bf16 %v1778_v17, %v1777_v14  ;;  %v1632_v48 = vpack.c.bf16 %v1628_v51, %v3589_v61  ;;  %v1783_v7 = vmul.f32 %v1550_v24, %v3584_v25  ;;  %v1784_v33 = vmul.f32 %v1776_v26, %v3587_v30 }
 0x1d9   : > { %v1787_v12 = vpack.c.bf16 %v1782_v2, %v1781_v19  ;;  %v1710_v31 = vpack.c.bf16 %v1706_v8, %v1705_v62  ;;  %v1858_v15 = vpack.c.bf16 %v1854_v56, %v1628_v51  ;;  %v3935_v0 = vpack.c.bf16 %v3514_v4, %v3510_v6 }
 0x1da   : > { %v3936_v25 = vpack.c.bf16 %v3578_v41, %v3574_v1  ;;  %v1931_v1 = vmul.f32 %v1698_v10, %v3600_v42  ;;  %v1932_v41 = vmul.f32 %v1924_v47, %v3598_v44 }
 0x1db   : > { %2546 = vmatmul.msk.bf16.vlgmr.msrb.gmra.mxu1 %vm362_vm1, %v1629_v50 }
 0x1dc   : > { %v1936_v63 = vpack.c.bf16 %v1932_v41, %v1931_v1 }
 0x1de   : > { %2556 = vmatmul.msk.bf16.vlgmr.msra.gmra.mxu2 %vm362_vm1, %v1707_v46 }
 0x1e5   : > { %2566 = vmatmul.msk.bf16.vlgmr.msra.gmra.mxu3 %vm362_vm1, %v1785_v28 }
 0x1e6   : > { %2576 = vmatmul.msk.bf16.vlgmr.msra.gmra.mxu0 %vm362_vm1, %v3466_v21  ;;  %v1709_v21 = vpack.c.bf16 %v1704_v53, %v1703_v45 }
 0x1eb   : > { %2547 = vmatmul.msk.bf16.gmra.mxu1 %vm362_vm1, %v1630_v23 }
 0x1ee   : > { %2557 = vmatmul.msk.bf16.gmra.mxu2 %vm362_vm1, %v1708_v59 }
 0x1f5   : > { %2567 = vmatmul.msk.bf16.gmra.mxu3 %vm362_vm1, %v1786_v16 }
 0x1f6   : > { %2577 = vmatmul.msk.bf16.gmra.mxu0 %vm362_vm1, %v3539_v35  ;;  %v1788_v35 = vpack.c.bf16 %v1784_v33, %v1783_v7 }
 0x1fb   : > { %2548 = vmatmul.msk.bf16.gmra.mxu1 %vm362_vm1, %v1631_v27 }
 0x1fe   : > { %2558 = vmatmul.msk.bf16.gmra.mxu2 %vm362_vm1, %v1709_v21 }
 0x205   : > { %2568 = vmatmul.msk.bf16.gmra.mxu3 %vm362_vm1, %v1787_v12 }
 0x206   : > { %2578 = vmatmul.msk.bf16.gmra.mxu0 %vm362_vm1, %v1319_v52 }
 0x20b   : > { %2549 = vmatmul.msk.bf16.gmra.mxu1 %vm362_vm1, %v1632_v48 }
 0x20e   : > { %2559 = vmatmul.msk.bf16.gmra.mxu2 %vm362_vm1, %v1710_v31 }
 0x215   : > { %2569 = vmatmul.msk.bf16.gmra.mxu3 %vm362_vm1, %v1788_v35 }
 0x216   : > { %2579 = vmatmul.msk.bf16.gmra.mxu0 %vm362_vm1, %v1858_v15 }
 0x218   : > { %v1350_v29 = vpop.f32.mrf.mxu1 }
 0x21b   : > { %2586 = vmatmul.msk.bf16.vlgmr.msra.gmra.mxu1 %vm362_vm1, %v3935_v0 }
 0x220   : > { %v1352_v18 = vpop.f32.mrf.mxu1 }
 0x221   : > { %v1397_v30 = vpop.f32.mrf.mxu2 }
 0x222   : > { %v1398_v48 = vadd.f32 %v1397_v30, %v1350_v29 }
 0x223   : > { %v1593_v49 = vpop.f32.mrf.mxu0 }
 0x228   : > { %v1355_v20 = vpop.f32.mrf.mxu1  ;;  %v1515_v61 = vpop.f32.mrf.mxu3 }
 0x229   : > { %v1399_v5 = vpop.f32.mrf.mxu2  ;;  %v1535_v7 = vadd.f32 %v1515_v61, %v1398_v48  ;;  %v3725_v61 = vld [vmem:[%s3907_s6] ss:$0 sm:$0xff] }
 0x22a   : > { %v1400_v15 = vadd.f32 %v1399_v5, %v1352_v18 }
 0x22b   : > { %2587 = vmatmul.msk.bf16.gmra.mxu1 %vm362_vm1, %v3936_v25  ;;  %v1595_v4 = vpop.f32.mrf.mxu0  ;;  %v1613_v35 = vadd.f32 %v1593_v49, %v1535_v7 }
 0x230   : > { %v3674_v9 = vpop.f32.mrf.mxu1  ;;  %v1517_v37 = vpop.f32.mrf.mxu3 }
 0x231   : > { %v1402_v24 = vpop.f32.mrf.mxu2  ;;  %v1536_v47 = vadd.f32 %v1517_v37, %v1400_v15 }
 0x232   : > { %v1403_v60 = vadd.f32 %v1402_v24, %v1355_v20 }
 0x233   : > { %v1598_v46 = vpop.f32.mrf.mxu0  ;;  %v1614_v38 = vadd.f32 %v1595_v4, %v1536_v47 }
 0x238   : > { %v3676_v52 = vpop.f32.mrf.mxu1  ;;  %v1520_v11 = vpop.f32.mrf.mxu3 }
 0x239   : > { %v1404_v17 = vpop.f32.mrf.mxu2  ;;  %v1537_v18 = vadd.f32 %v1520_v11, %v1403_v60 }
 0x23a   : > { %v1405_v20 = vadd.f32 %v1404_v17, %v3674_v9 }
 0x23b   : > { %2588 = vmatmul.msk.bf16.gmra.mxu1 %vm362_vm1, %v1935_v32  ;;  %v3688_v32 = vpop.f32.mrf.mxu0 }
 0x240   : > { %v3679_v6 = vpop.f32.mrf.mxu1  ;;  %v1522_v14 = vpop.f32.mrf.mxu3 }
 0x241   : > { %v3690_v40 = vpop.f32.mrf.mxu2 }
 0x243   : > { %v3694_v42 = vpop.f32.mrf.mxu0 }
 0x248   : > { %v3683_v50 = vpop.f32.mrf.mxu1  ;;  %v3692_v58 = vpop.f32.mrf.mxu3 }
 0x249   : > { %v3696_v59 = vpop.f32.mrf.mxu2 }
 0x24b   : > { %2589 = vmatmul.msk.bf16.gmra.mxu1 %vm362_vm1, %v1936_v63  ;;  %v3700_v16 = vpop.f32.mrf.mxu0 }
 0x250   : > { %v3686_v28 = vpop.f32.mrf.mxu1  ;;  %v3698_v54 = vpop.f32.mrf.mxu3 }
 0x251   : > { %v3702_v53 = vpop.f32.mrf.mxu2 }
 0x253   : > { %v3706_v21 = vpop.f32.mrf.mxu0 }
 0x258   : > { %v1663_v23 = vpop.f32.mrf.mxu1  ;;  %v3704_v27 = vpop.f32.mrf.mxu3 }
 0x259   : > { %v3708_v2 = vpop.f32.mrf.mxu2  ;;  %v1683_v0 = vadd.f32 %v1663_v23, %v1613_v35  ;;  %v1538_v35 = vadd.f32 %v1522_v14, %v1405_v20 }
 0x25b   : > { %v3714_v10 = vpop.f32.mrf.mxu0 }
 0x260   : > { %v1665_v44 = vpop.f32.mrf.mxu1  ;;  %v3710_v19 = vpop.f32.mrf.mxu3 }
 0x261   : > { %v1741_v51 = vpop.f32.mrf.mxu2  ;;  %v1684_v29 = vadd.f32 %v1665_v44, %v1614_v38 }
 0x262   : > { %v1761_v1 = vadd.f32 %v1741_v51, %v1683_v0 }
 0x263   : > { %v1889_v31 = vpop.f32.mrf.mxu0 }
 0x268   : > { %v1668_v22 = vpop.f32.mrf.mxu1  ;;  %v1819_v8 = vpop.f32.mrf.mxu3 }
 0x269   : > { %v1743_v33 = vpop.f32.mrf.mxu2  ;;  %v1839_v63 = vadd.f32 %v1819_v8, %v1761_v1  ;;  %v1615_v8 = vadd.f32 %v1598_v46, %v1537_v18  ;;  %v1408_v1 = vadd.f32 %v3690_v40, %v3676_v52  ;;  %v1410_v40 = vadd.f32 %v3696_v59, %v3679_v6 }
 0x26a   : > { %v1762_v5 = vadd.f32 %v1743_v33, %v1684_v29 }
 0x26b   : > { %v1891_v41 = vpop.f32.mrf.mxu0  ;;  %v1909_v30 = vadd.f32 %v1889_v31, %v1839_v63  ;;  %v1685_v38 = vadd.f32 %v1668_v22, %v1615_v8  ;;  %v1539_v14 = vadd.f32 %v3692_v58, %v1408_v1 }
 0x270   : > { %v1670_v45 = vpop.f32.mrf.mxu1  ;;  %v1821_v56 = vpop.f32.mrf.mxu3 }
 0x271   : > { %v1746_v39 = vpop.f32.mrf.mxu2  ;;  %v1840_v48 = vadd.f32 %v1821_v56, %v1762_v5  ;;  %v1616_v56 = vadd.f32 %v3688_v32, %v1538_v35 }
 0x272   : > { %v1763_v15 = vadd.f32 %v1746_v39, %v1685_v38 }
 0x273   : > { %v1894_v37 = vpop.f32.mrf.mxu0  ;;  %v1910_v44 = vadd.f32 %v1891_v41, %v1840_v48  ;;  %v1686_v17 = vadd.f32 %v1670_v45, %v1616_v56 }
 0x278   : > { %v3712_v12 = vpop.f32.mrf.mxu1  ;;  %v1824_v34 = vpop.f32.mrf.mxu3 }
 0x279   : > { %v1748_v7 = vpop.f32.mrf.mxu2  ;;  %v1841_v60 = vadd.f32 %v1824_v34, %v1763_v15 }
 0x27a   : > { %v1764_v34 = vadd.f32 %v1748_v7, %v1686_v17 }
 0x27b   : > { %v1896_v47 = vpop.f32.mrf.mxu0  ;;  %v1911_v41 = vadd.f32 %v1894_v37, %v1841_v60 }
 0x280   : > { %v3716_v62 = vpop.f32.mrf.mxu1  ;;  %v1826_v24 = vpop.f32.mrf.mxu3 }
 0x281   : > { %v1751_v22 = vpop.f32.mrf.mxu2 }
 0x283   : > { %v1899_v58 = vpop.f32.mrf.mxu0 }
 0x288   : > { %v3718_v26 = vpop.f32.mrf.mxu1  ;;  %v1829_v63 = vpop.f32.mrf.mxu3 }
 0x289   : > { %v1753_v7 = vpop.f32.mrf.mxu2 }
 0x290   : > { %v3720_v25 = vpop.f32.mrf.mxu1  ;;  %v1831_v6 = vpop.f32.mrf.mxu3 }
 0x298   : > { %v1967_v49 = vpop.f32.mrf.mxu1 }
 0x299   : > { %v1987_v23 = vadd.f32 %v1967_v49, %v1909_v30  ;;  %v1842_v30 = vadd.f32 %v1826_v24, %v1764_v34  ;;  %v1617_v49 = vadd.f32 %v3694_v42, %v1539_v14  ;;  %v1756_v34 = vpop.f32.mrf.mxu2 }
 0x29b   : > { %v1999_v51 = vadd.f32 %v3725_v61, %v1987_v23  ;;  %v1687_v45 = vadd.f32 %v3712_v12, %v1617_v49  ;;  %v1912_v48 = vadd.f32 %v1896_v47, %v1842_v30  ;;  %v1834_v49 = vpop.f32.mrf.mxu3 }
 0x29d   : > { %v2590_v4 = vmul.f32 -1.442695, %v1999_v51  ;;  %v1540_v51 = vadd.f32 %v3698_v54, %v1410_v40  ;;  %v1765_v8 = vadd.f32 %v1751_v22, %v1687_v45  ;;  %v1413_v54 = vadd.f32 %v3702_v53, %v3683_v50 }
 0x29f   : > { %2736 = vpow2.f32 %v2590_v4  ;;  %v1843_v38 = vadd.f32 %v1829_v63, %v1765_v8  ;;  %v1541_v1 = vadd.f32 %v3704_v27, %v1413_v54 }
 0x2a0   : > { %v1969_v31 = vpop.f32.mrf.mxu1 }
 0x2a1   : > { %v1988_v0 = vadd.f32 %v1969_v31, %v1910_v44  ;;  %v1618_v31 = vadd.f32 %v3700_v16, %v1540_v51  ;;  %v1913_v56 = vadd.f32 %v1899_v58, %v1843_v38  ;;  %v1619_v30 = vadd.f32 %v3706_v21, %v1541_v1 }
 0x2a3   : > { %v2000_v11 = vadd.f32 %v3725_v61, %v1988_v0  ;;  %v1689_v40 = vadd.f32 %v3718_v26, %v1619_v30 }
 0x2a5   : > { %v2737_v33 = vpop.eup %2736  ;;  %v2591_v46 = vmul.f32 -1.442695, %v2000_v11  ;;  %v1688_v11 = vadd.f32 %v3716_v62, %v1618_v31 }
 0x2a6   : > { %v2031_v9 = vadd.f32 1.0, %v2737_v33 }
 0x2a7   : > { %2738 = vpow2.f32 %v2591_v46  ;;  %v1766_v17 = vadd.f32 %v1753_v7, %v1688_v11 }
 0x2a8   : > { %2740 = vrcp.f32 %v2031_v9  ;;  %v1972_v39 = vpop.f32.mrf.mxu1  ;;  %v2050_v24 = vand.u32 2147483648, %v2031_v9  ;;  %v2048_v44 = vand.u32 2147483647, %v2031_v9  ;;  %vm2044_vm3 = vweird.f32 %v2031_v9 }
 0x2a9   : > { %v1989_v29 = vadd.f32 %v1972_v39, %v1911_v41  ;;  %v1844_v14 = vadd.f32 %v1831_v6, %v1766_v17 }
 0x2aa   : > { %v2051_v47 = vor.u32 1.1754944e-38, %v2050_v24  ;;  %vm2049_vm5 = vcmp.eq.f32.partialorder %v2048_v44, 8.507059e+37 }
 0x2ab   : > { %v2001_v32 = vadd.f32 %v3725_v61, %v1989_v29 }
 0x2ad   : > { %v2739_v18 = vpop.eup %2738  ;;  %v2592_v5 = vmul.f32 -1.442695, %v2001_v32 }
 0x2ae   : > { %v2741_v52 = vpop.eup %2740  ;;  %v3739_v23 = vadd.f32 1.0, %v2739_v18 }
 0x2af   : > { %2742 = vpow2.f32 %v2592_v5  ;;  %v2040_v37 = vmul.f32 %v2741_v52, %v2031_v9  ;;  %vm2045_vm2 = vweird.f32 %v2741_v52  ;;  %v1901_v9 = vpop.f32.mrf.mxu0 }
 0x2b0   : > { %2744 = vrcp.f32 %v3739_v23  ;;  %v1974_v42 = vpop.f32.mrf.mxu1  ;;  %vm2046_vm4 = vmor %vm2044_vm3, %vm2045_vm2  ;;  %v2065_v39 = vand.u32 2147483648, %v3739_v23  ;;  %v2063_v29 = vand.u32 2147483647, %v3739_v23  ;;  %vm2059_vm7 = vweird.f32 %v3739_v23 }
 0x2b1   : > { %v1990_v4 = vadd.f32 %v1974_v42, %v1912_v48  ;;  %v2041_v20 = vsub.f32 1.0, %v2040_v37  ;;  %v1914_v58 = vadd.f32 %v1901_v9, %v1844_v14 }
 0x2b2   : > { %v2066_v48 = vor.u32 1.1754944e-38, %v2065_v39  ;;  %vm2064_vm9 = vcmp.eq.f32.partialorder %v2063_v29, 8.507059e+37 }
 0x2b3   : > { %v2002_v59 = vadd.f32 %v3725_v61, %v1990_v4  ;;  %v2042_v12 = vmul.f32 %v2741_v52, %v2041_v20 }
 0x2b5   : > { %v2743_v35 = vpop.eup %2742  ;;  %v2593_v15 = vmul.f32 -1.442695, %v2002_v59  ;;  %v2043_v0 = vadd.f32 %v2741_v52, %v2042_v12  ;;  %v1758_v12 = vpop.f32.mrf.mxu2 }
 0x2b6   : > { %v2745_v60 = vpop.eup %2744  ;;  %v3748_v33 = vadd.f32 1.0, %v2743_v35 }
 0x2b7   : > { %2746 = vpow2.f32 %v2593_v15  ;;  %v2047_v46 = vsel %vm2046_vm4, %v2741_v52, %v2043_v0  ;;  %v2055_v16 = vmul.f32 %v2745_v60, %v3739_v23  ;;  %vm2060_vm6 = vweird.f32 %v2745_v60  ;;  %v1904_v20 = vpop.f32.mrf.mxu0 }
 0x2b8   : > { %2748 = vrcp.f32 %v3748_v33  ;;  %v1977_v50 = vpop.f32.mrf.mxu1  ;;  %v3753_v53 = vsel %vm2049_vm5, %v2051_v47, %v2047_v46  ;;  %vm2061_vm8 = vmor %vm2059_vm7, %vm2060_vm6  ;;  %v2080_v4 = vand.u32 2147483648, %v3748_v33  ;;  %v2078_v24 = vand.u32 2147483647, %v3748_v33 }
 0x2b9   : > { %v1991_v62 = vadd.f32 %v1977_v50, %v1913_v56  ;;  %v2167_v22 = vmul.f32 %v3753_v53, %v3028_v36  ;;  %v2056_v41 = vsub.f32 1.0, %v2055_v16  ;;  %v1415_v36 = vadd.f32 %v3708_v2, %v3686_v28 }
 0x2ba   : > { %v1767_v2 = vadd.f32 %v1756_v34, %v1689_v40  ;;  %vm2074_vm11 = vweird.f32 %v3748_v33  ;;  %v2081_v0 = vor.u32 1.1754944e-38, %v2080_v4  ;;  %vm2079_vm13 = vcmp.eq.f32.partialorder %v2078_v24, 8.507059e+37 }
 0x2bb   : > { %v2003_v63 = vadd.f32 %v3725_v61, %v1991_v62  ;;  %2183 = vrot.lane.b32.xlu0 %v2167_v22, %s2835_s21  ;;  %v2057_v27 = vmul.f32 %v2745_v60, %v2056_v41  ;;  %v1542_v28 = vadd.f32 %v3710_v19, %v1415_v36 }
 0x2bc   : > { %v1845_v7 = vadd.f32 %v1834_v49, %v1767_v2 }
 0x2bd   : > { %v2747_v32 = vpop.eup %2746  ;;  %v2594_v18 = vmul.f32 -1.442695, %v2003_v63  ;;  %v2058_v5 = vadd.f32 %v2745_v60, %v2057_v27  ;;  %v1620_v6 = vadd.f32 %v3714_v10, %v1542_v28 }
 0x2be   : > { %v2749_v52 = vpop.eup %2748  ;;  %v3766_v45 = vadd.f32 1.0, %v2747_v32  ;;  %v1915_v15 = vadd.f32 %v1904_v20, %v1845_v7 }
 0x2bf   : > { %2750 = vpow2.f32 %v2594_v18  ;;  %v2062_v37 = vsel %vm2061_vm8, %v2745_v60, %v2058_v5  ;;  %v2070_v21 = vmul.f32 %v2749_v52, %v3748_v33  ;;  %vm2075_vm10 = vweird.f32 %v2749_v52  ;;  %v1836_v60 = vpop.f32.mrf.mxu3  ;;  %v1906_v14 = vpop.f32.mrf.mxu0 }
 0x2c0   : > { %2752 = vrcp.f32 %v3766_v45  ;;  %v1979_v51 = vpop.f32.mrf.mxu1  ;;  %v3771_v23 = vsel %vm2064_vm9, %v2066_v48, %v2062_v37  ;;  %v1690_v35 = vadd.f32 %v3720_v25, %v1620_v6  ;;  %vm2076_vm12 = vmor %vm2074_vm11, %vm2075_vm10  ;;  %v3937_v33 = vunpack.i.l.bf16 %v3101_v3 }
 0x2c1   : > { %v1992_v8 = vadd.f32 %v1979_v51, %v1914_v58  ;;  %v2168_v26 = vmul.f32 %v3771_v23, %v3076_v55  ;;  %v2071_v42 = vsub.f32 1.0, %v2070_v21  ;;  %v2095_v50 = vand.u32 2147483648, %v3766_v45 }
 0x2c2   : > { %v1768_v10 = vadd.f32 %v1758_v12, %v1690_v35  ;;  %v2093_v22 = vand.u32 2147483647, %v3766_v45  ;;  %vm2089_vm15 = vweird.f32 %v3766_v45 }
 0x2c3   : > { %v2004_v38 = vadd.f32 %v3725_v61, %v1992_v8  ;;  %2185 = vrot.lane.b32.xlu1 %v2168_v26, %s2835_s21  ;;  %v2072_v19 = vmul.f32 %v2749_v52, %v2071_v42  ;;  %v2096_v30 = vor.u32 1.1754944e-38, %v2095_v50 }
 0x2c4   : > { %v1846_v17 = vadd.f32 %v1836_v60, %v1768_v10  ;;  %vm2094_vm2 = vcmp.eq.f32.partialorder %v2093_v22, 8.507059e+37 }
 0x2c5   : > { %v2751_v59 = vpop.eup %2750  ;;  %v2595_v44 = vmul.f32 -1.442695, %v2004_v38  ;;  %v2073_v31 = vadd.f32 %v2749_v52, %v2072_v19 }
 0x2c6   : > { %v2753_v55 = vpop.eup %2752  ;;  %v2035_v54 = vadd.f32 1.0, %v2751_v59  ;;  %v1916_v29 = vadd.f32 %v1906_v14, %v1846_v17  ;;  %v3940_v17 = vunpack.i.h.bf16 %v3043_v43 }
 0x2c7   : > { %2754 = vpow2.f32 %v2595_v44  ;;  %v2077_v11 = vsel %vm2076_vm12, %v2749_v52, %v2073_v31  ;;  %v2085_v56 = vmul.f32 %v2753_v55, %v3766_v45  ;;  %vm2090_vm14 = vweird.f32 %v2753_v55 }
 0x2c8   : > { %2756 = vrcp.f32 %v2035_v54  ;;  %v1982_v47 = vpop.f32.mrf.mxu1  ;;  %v3783_v46 = vsel %vm2079_vm13, %v2081_v0, %v2077_v11  ;;  %vm2091_vm0 = vmor %vm2089_vm15, %vm2090_vm14  ;;  %v3938_v52 = vunpack.i.h.bf16 %v3101_v3  ;;  %v2110_v45 = vand.u32 2147483648, %v2035_v54 }
 0x2c9   : > { %v1993_v16 = vadd.f32 %v1982_v47, %v1915_v15  ;;  %v2169_v25 = vmul.f32 %v3937_v33, %v3783_v46  ;;  %v2086_v1 = vsub.f32 1.0, %v2085_v56  ;;  %v2108_v21 = vand.u32 2147483647, %v2035_v54 }
 0x2ca   : > { %vm2104_vm4 = vweird.f32 %v2035_v54  ;;  %v2111_v42 = vor.u32 1.1754944e-38, %v2110_v45 }
 0x2cb   : > { %v2005_v9 = vadd.f32 %v3725_v61, %v1993_v16  ;;  %2187 = vrot.lane.b32.xlu2 %v2169_v25, %s2835_s21  ;;  %v2087_v62 = vmul.f32 %v2753_v55, %v2086_v1  ;;  %vm2109_vm6 = vcmp.eq.f32.partialorder %v2108_v21, 8.507059e+37 }
 0x2cd   : > { %v2755_v41 = vpop.eup %2754  ;;  %v2596_v39 = vmul.f32 -1.442695, %v2005_v9  ;;  %v2088_v34 = vadd.f32 %v2753_v55, %v2087_v62 }
 0x2ce   : > { %v2757_v63 = vpop.eup %2756  ;;  %v2036_v27 = vadd.f32 1.0, %v2755_v41 }
 0x2cf   : > { %2758 = vpow2.f32 %v2596_v39  ;;  %v2092_v32 = vsel %vm2091_vm0, %v2753_v55, %v2088_v34  ;;  %v2100_v36 = vmul.f32 %v2757_v63, %v2035_v54  ;;  %vm2105_vm3 = vweird.f32 %v2757_v63 }
 0x2d0   : > { %2760 = vrcp.f32 %v2036_v27  ;;  %v1984_v49 = vpop.f32.mrf.mxu1  ;;  %v3793_v18 = vsel %vm2094_vm2, %v2096_v30, %v2092_v32  ;;  %vm2106_vm5 = vmor %vm2104_vm4, %vm2105_vm3  ;;  %v2125_v38 = vand.u32 2147483648, %v2036_v27  ;;  %v2123_v24 = vand.u32 2147483647, %v2036_v27 }
 0x2d1   : > { %v1994_v5 = vadd.f32 %v1984_v49, %v1916_v29  ;;  %v2170_v40 = vmul.f32 %v3938_v52, %v3793_v18  ;;  %v2101_v58 = vsub.f32 1.0, %v2100_v36  ;;  %vm2119_vm8 = vweird.f32 %v2036_v27 }
 0x2d2   : > { %v2126_v31 = vor.u32 1.1754944e-38, %v2125_v38  ;;  %vm2124_vm10 = vcmp.eq.f32.partialorder %v2123_v24, 8.507059e+37 }
 0x2d3   : > { %v2006_v48 = vadd.f32 %v3725_v61, %v1994_v5  ;;  %2189 = vrot.lane.b32.xlu0 %v2170_v40, %s2835_s21  ;;  %v2102_v37 = vmul.f32 %v2757_v63, %v2101_v58 }
 0x2d5   : > { %v2759_v28 = vpop.eup %2758  ;;  %v2597_v2 = vmul.f32 -1.442695, %v2006_v48  ;;  %v2103_v51 = vadd.f32 %v2757_v63, %v2102_v37 }
 0x2d6   : > { %v2761_v8 = vpop.eup %2760  ;;  %v2037_v26 = vadd.f32 1.0, %v2759_v28  ;;  %v3946_v28 = vld [vmem:[#allocation8_spill] sm:$0xff] }
 0x2d7   : > { %2762 = vpow2.f32 %v2597_v2  ;;  %v2107_v3 = vsel %vm2106_vm5, %v2757_v63, %v2103_v51  ;;  %v2115_v7 = vmul.f32 %v2761_v8, %v2036_v27  ;;  %vm2120_vm7 = vweird.f32 %v2761_v8 }
 0x2d8   : > { %2764 = vrcp.f32 %v2037_v26  ;;  %v3800_v4 = vsel %vm2109_vm6, %v2111_v42, %v2107_v3  ;;  %vm2121_vm9 = vmor %vm2119_vm8, %vm2120_vm7  ;;  %v2140_v60 = vand.u32 2147483648, %v2037_v26  ;;  %v2138_v56 = vand.u32 2147483647, %v2037_v26 }
 0x2d9   : > { %v2171_v61 = vmul.f32 %v3800_v4, %v3128_v13  ;;  %v2116_v20 = vsub.f32 1.0, %v2115_v7  ;;  %v3939_v13 = vunpack.i.l.bf16 %v3043_v43  ;;  %vm2134_vm12 = vweird.f32 %v2037_v26  ;;  %v3941_v43 = vld [vmem:[#allocation10_spill] sm:$0xff] }
 0x2da   : > { %v2141_v16 = vor.u32 1.1754944e-38, %v2140_v60  ;;  %vm2139_vm14 = vcmp.eq.f32.partialorder %v2138_v56, 8.507059e+37  ;;  %v3942_v29 = vunpack.c.l.bf16 %v3941_v43  ;;  %vm2836_vm5 = vmmov 1  }
 0x2db   : > { %2191 = vrot.lane.b32.xlu1 %v2171_v61, %s2835_s21  ;;  %v2117_v19 = vmul.f32 %v2761_v8, %v2116_v20  ;;  %v3947_v2 = vunpack.c.h.bf16 %v3946_v28  ;;  %v3949_v38 = vunpack.c.l.bf16 %v3946_v28 }
 0x2dc   : > { %v2161_v30 = vmul.f32 %v3942_v29, %v3783_v46 }
 0x2dd   : > { %v2763_v6 = vpop.eup %2762  ;;  %v2118_v59 = vadd.f32 %v2761_v8, %v2117_v19  ;;  %v2163_v19 = vmul.f32 %v3949_v38, %v3800_v4 }
 0x2de   : > { %v2765_v12 = vpop.eup %2764  ;;  %v2038_v44 = vadd.f32 1.0, %v2763_v6 }
 0x2df   : > { %v2122_v55 = vsel %vm2121_vm9, %v2761_v8, %v2118_v59  ;;  %v2130_v35 = vmul.f32 %v2765_v12, %v2037_v26  ;;  %vm2135_vm11 = vweird.f32 %v2765_v12  ;;  %v3950_v59 = vld [vmem:[#allocation9_spill] sm:$0xff] }
 0x2e0   : > { %2766 = vrcp.f32 %v2038_v44  ;;  %v2127_v54 = vsel %vm2124_vm10, %v2126_v31, %v2122_v55  ;;  %vm2136_vm13 = vmor %vm2134_vm12, %vm2135_vm11  ;;  %v2155_v62 = vand.u32 2147483648, %v2038_v44  ;;  %v2153_v41 = vand.u32 2147483647, %v2038_v44 }
 0x2e1   : > { %v2172_v15 = vmul.f32 %v3939_v13, %v2127_v54  ;;  %v2131_v0 = vsub.f32 1.0, %v2130_v35  ;;  %vm2149_vm0 = vweird.f32 %v2038_v44  ;;  %v2164_v51 = vmul.f32 %v3947_v2, %v2127_v54 }
 0x2e2   : > { %v2156_v39 = vor.u32 1.1754944e-38, %v2155_v62  ;;  %vm2154_vm3 = vcmp.eq.f32.partialorder %v2153_v41, 8.507059e+37  ;;  %v3952_v35 = vunpack.c.h.bf16 %v3950_v59 }
 0x2e3   : > { %2193 = vrot.lane.b32.xlu2 %v2172_v15, %s2835_s21  ;;  %v2132_v11 = vmul.f32 %v2765_v12, %v2131_v0 }
 0x2e5   : > { %v2133_v10 = vadd.f32 %v2765_v12, %v2132_v11 }
 0x2e6   : > { %v2767_v47 = vpop.eup %2766 }
 0x2e7   : > { %v2137_v33 = vsel %vm2136_vm13, %v2765_v12, %v2133_v10  ;;  %v2145_v25 = vmul.f32 %v2767_v47, %v2038_v44  ;;  %vm2150_vm15 = vweird.f32 %v2767_v47  ;;  %v3951_v12 = vunpack.c.l.bf16 %v3950_v59 }
 0x2e8   : > { %v3808_v1 = vsel %vm2139_vm14, %v2141_v16, %v2137_v33  ;;  %vm2151_vm2 = vmor %vm2149_vm0, %vm2150_vm15 }
 0x2e9   : > { %v2173_v50 = vmul.f32 %v3940_v17, %v3808_v1  ;;  %v2146_v9 = vsub.f32 1.0, %v2145_v25  ;;  %v2165_v44 = vmul.f32 %v3951_v12, %v3808_v1 }
 0x2eb   : > { %2195 = vrot.lane.b32.xlu0 %v2173_v50, %s2835_s21  ;;  %v2147_v22 = vmul.f32 %v2767_v47, %v2146_v9 }
 0x2ed   : > { %v2148_v14 = vadd.f32 %v2767_v47, %v2147_v22 }
 0x2ef   : > { %v2152_v34 = vsel %vm2151_vm2, %v2767_v47, %v2148_v14 }
 0x2f0   : > { %v2157_v63 = vsel %vm2154_vm3, %v2156_v39, %v2152_v34 }
 0x2f1   : > { %v2174_v27 = vmul.f32 %v2157_v63, %v3192_v57  ;;  %v3943_v57 = vld [vmem:[#allocation7_spill] sm:$0xff]  ;;  %v2166_v54 = vmul.f32 %v3952_v35, %v2157_v63 }
 0x2f2   : > { %v3944_v5 = vunpack.c.l.bf16 %v3943_v57  ;;  %v3945_v45 = vunpack.c.h.bf16 %v3943_v57 }
 0x2f3   : > { %2197 = vrot.lane.b32.xlu1 %v2174_v27, %s2835_s21  ;;  %s2788_s21 = scalar_lea.hbm %s3908_s7, 128 }
 0x2f4   : > { %v2159_v46 = vmul.f32 %v3944_v5, %v3753_v53  ;;  %v2160_v48 = vmul.f32 %v3945_v45, %v3771_v23  ;;  %v3948_v23 = vunpack.c.h.bf16 %v3941_v43  ;;  %p2790_p1 = scmp.lt.s32.totalorder %s2788_s21, %s2784_s22 }
 0x2f6   : > { %v2162_v3 = vmul.f32 %v3948_v23, %v3793_v18  ;;  %p2791_p2 = por %p2790_p1, %p2789_p0 }
 0x2f8   : > { %p2792_p3 = pnand %p2791_p2, %p2787_p13 }
 0x325   : > { %v2188_v32 = vpop.permute.xlu2 %2187 }
 0x326   : > { %v2209_v36 = vadd.f32 %v2188_v32, %v2161_v30 }
 0x328   : > { %vm2217_vm4 = vweird.f32 %v2209_v36 }
 0x329   : > { %vm2225_vm6 = vmxor %vm2217_vm4, %vm2836_vm5 }
 0x32a   : > { %v2233_v49 = vsel %vm2225_vm6, %v2209_v36, 1e-05 }
 0x32b   : > { %2241 = vst.msk [vmem:[%s3823_s16 + $0x10] sm:$0xff] %vm362_vm1, %v2233_v49 }
 0x32d   : > { %v2184_v52 = vpop.permute.xlu0 %2183 }
 0x32e   : > { %v2207_v40 = vadd.f32 %v2184_v52, %v2159_v46 }
 0x330   : > { %vm2215_vm7 = vweird.f32 %v2207_v40 }
 0x331   : > { %vm2223_vm8 = vmxor %vm2215_vm7, %vm2836_vm5 }
 0x332   : > { %v2231_v58 = vsel %vm2223_vm8, %v2207_v40, 1e-05 }
 0x333   : > { %2239 = vst.msk [vmem:[%s3823_s16] sm:$0xff] %vm362_vm1, %v2231_v58 }
 0x335   : > { %v2186_v37 = vpop.permute.xlu1 %2185 }
 0x336   : > { %v2208_v21 = vadd.f32 %v2186_v37, %v2160_v48 }
 0x338   : > { %vm2216_vm9 = vweird.f32 %v2208_v21 }
 0x339   : > { %vm2224_vm10 = vmxor %vm2216_vm9, %vm2836_vm5 }
 0x33a   : > { %v2232_v53 = vsel %vm2224_vm10, %v2208_v21, 1e-05 }
 0x33b   : > { %2240 = vst.msk [vmem:[%s3823_s16 + $0x8] sm:$0xff] %vm362_vm1, %v2232_v53 }
 0x33d   : > { %v2194_v8 = vpop.permute.xlu2 %2193 }
 0x33e   : > { %v2212_v26 = vadd.f32 %v2194_v8, %v2164_v51 }
 0x340   : > { %vm2220_vm11 = vweird.f32 %v2212_v26 }
 0x341   : > { %vm2228_vm12 = vmxor %vm2220_vm11, %vm2836_vm5 }
 0x342   : > { %v2236_v42 = vsel %vm2228_vm12, %v2212_v26, 1e-05 }
 0x343   : > { %2244 = vst.msk [vmem:[%s3823_s16 + $0x28] sm:$0xff] %vm362_vm1, %v2236_v42 }
 0x345   : > { %v2190_v7 = vpop.permute.xlu0 %2189 }
 0x346   : > { %v2210_v61 = vadd.f32 %v2190_v7, %v2162_v3 }
 0x348   : > { %vm2218_vm13 = vweird.f32 %v2210_v61 }
 0x349   : > { %vm2226_vm14 = vmxor %vm2218_vm13, %vm2836_vm5 }
 0x34a   : > { %v2234_v20 = vsel %vm2226_vm14, %v2210_v61, 1e-05 }
 0x34b   : > { %2242 = vst.msk [vmem:[%s3823_s16 + $0x18] sm:$0xff] %vm362_vm1, %v2234_v20 }
 0x34d   : > { %v2192_v24 = vpop.permute.xlu1 %2191 }
 0x34e   : > { %v2211_v6 = vadd.f32 %v2192_v24, %v2163_v19 }
 0x350   : > { %vm2219_vm15 = vweird.f32 %v2211_v6 }
 0x351   : > { %vm2227_vm0 = vmxor %vm2219_vm15, %vm2836_vm5 }
 0x352   : > { %v2235_v18 = vsel %vm2227_vm0, %v2211_v6, 1e-05 }
 0x353   : > { %2243 = vst.msk [vmem:[%s3823_s16 + $0x20] sm:$0xff] %vm362_vm1, %v2235_v18 }
 0x35d   : > { %v2196_v31 = vpop.permute.xlu0 %2195 }
 0x35e   : > { %v2213_v55 = vadd.f32 %v2196_v31, %v2165_v44 }
 0x360   : > { %vm2221_vm2 = vweird.f32 %v2213_v55 }
 0x361   : > { %vm2229_vm3 = vmxor %vm2221_vm2, %vm2836_vm5 }
 0x362   : > { %v2237_v4 = vsel %vm2229_vm3, %v2213_v55, 1e-05 }
 0x363   : > { %2245 = vst.msk [vmem:[%s3823_s16 + $0x30] sm:$0xff] %vm362_vm1, %v2237_v4 }
 0x365   : > { %v2198_v13 = vpop.permute.xlu1 %2197 }
 0x366   : > { %v2214_v15 = vadd.f32 %v2198_v13, %v2166_v54 }
 0x368   : > { %vm2222_vm4 = vweird.f32 %v2214_v15 }
 0x369   : > { %vm2230_vm6 = vmxor %vm2222_vm4, %vm2836_vm5 }
 0x36a   : > { %v2238_v0 = vsel %vm2230_vm6, %v2214_v15, 1e-05 }
 0x36b   : > { %2246 = vst.msk [vmem:[%s3823_s16 + $0x38] sm:$0xff] %vm362_vm1, %v2238_v0 }
 0x36c   : > { %2795 = shalt.err (!%p2792_p3)
}
 0x36d   : > { %s2837_s23 = smov 128   ;;  %s2838_s16 = smov 8  }
 0x36e   : > { %2675 = dma.vmem_to_hbm [thread:$0]  (%p2917_p5), %s2261_s14, 1024, %s2263_s17, %s2248_s28, %s2837_s23, %s2837_s23, %s2838_s16  }
 0x36f PF: > { %p2681_p4 = scmp.ge.s32.totalorder %s2830_s27, 2  ;;  %s2277_s8 = sand.u32 1, %s2818_s24  }
 0x370   : > { %s2278_s9 = scalar_lea.sflag [#allocation5], %s2277_s8 }
 0x371   : > { %p2678_p7 = pnand %p2681_p4, %p2921_p6 }
 0x373   : > { %p2679_p8 = pneg %p2678_p7 }
 0x375   : > { %2813 = dma.done.wait (%p2679_p8), %s2278_s9, 1024  }
 0x376   : > { %2815 = vsyncadd (%p2679_p8), %s2278_s9, 4294966272  ;;  %p17_p9 = scmp.ge.s32.totalorder %s2904_s30, 4   ;;  %s3953_s24 = smov %s2822_s25 }
 0x377   : > { %s3954_s25 = smov %s2826_s26  ;;  %s3955_s26 = smov %s2915_s10 }
 0x378   : > { %s3956_s27 = smov %s2904_s30  ;;  %19 = sbr.rel (!%p17_p9) target bundleno = 3 (0x3), region = 103 }
 0x37d   :  { %2284 = vsyncpa [#allocation5], 1 }
 0x37e   :  { %2286 = vsyncpa [#allocation5 + $0x1], 1 }

// kernel: fuse_block_forward.7
= control target key start
LH: loop header
LB: loop body
LE: loop exit
PB: predicated region body
PF: predicated region fallthrough
CT: control target
= control target key end

     0   :  { %s2593_s27 = smov 0   ;;  %s3680_s0 = inlined_call_operand.vmem [shape: bf16[2,64,16], index: 0, kind: input, shape index: {}]   ;;  %s3681_s1 = inlined_call_operand.vmem [shape: bf16[2,64,16], index: 1, kind: input, shape index: {}]   ;;  %s3682_s2 = inlined_call_operand.vmem [shape: f32[2,64,1], index: 2, kind: input, shape index: {}]   ;;  %s3683_s3 = inlined_call_operand.vmem [shape: bf16[9,16,16], index: 3, kind: input, shape index: {}]   ;;  %s3684_s4 = inlined_call_operand.vmem [shape: bf16[9,16,32], index: 4, kind: input, shape index: {}]   ;;  %s3685_s5 = inlined_call_operand.vmem [shape: bf16[16,16], index: 5, kind: input, shape index: {}]   ;;  %s3686_s6 = inlined_call_operand.vmem [shape: f32[1,16], index: 6, kind: input, shape index: {}]   ;;  %s3687_s7 = inlined_call_operand.vmem [shape: f32[16,16], index: 7, kind: input, shape index: {}]   ;;  %s3688_s8 = inlined_call_operand.vmem [shape: bf16[2,64,16], index: 8, kind: output, shape index: {}]  }
   0x1 LB: > { %s2221_s28 = sadd.s32 4294967295, %s2543_s27   ;;  %p2225_p0 = scmp.ge.s32.totalorder %s2543_s27, 1  ;;  %s2543_s27 = sphi %s2593_s27, %s18_s27  }
   0x2   : > { %p272_p1 = scmp.lt.s32.totalorder %s2543_s27, 3 }
   0x4   : > { %p273_p2 = pnand %p2225_p0, %p272_p1 }
   0x6   : > { %276 = sbr.rel (%p273_p2) target bundleno = 1493 (0x5d5), region = 52 }
   0xb   : > { %v396_v0 = vld [vmem:[%s3682_s2 + $0x20] sm:$0xff]  ;;  %v394_v1 = vld [vmem:[%s3682_s2 + $0x10] sm:$0xff]  ;;  %p311_p3 = scmp.lt.s32.totalorder %s2221_s28, 1  ;;  %v2545_v3 = vmov 0   ;;  %v397_v4 = vld [vmem:[%s3682_s2 + $0x28] sm:$0xff]  ;;  %vm343_vm0 = vcmask 130048  }
   0xc   : > { %v392_v2 = vld [vmem:[%s3682_s2] sm:$0xff]  ;;  %2523 = vset.pattern.permute.xlu2 %v2545_v3  ;;  %2522 = vset.pattern.permute.xlu1 %v2545_v3  ;;  %v395_v5 = vld [vmem:[%s3682_s2 + $0x18] sm:$0xff]  ;;  %v393_v6 = vld [vmem:[%s3682_s2 + $0x8] sm:$0xff]  ;;  %v2546_v11 = vmov 0.0   ;;  %vm1935_vm7 = vcmask 523264  }
   0xd   : > { %2521 = vset.pattern.permute.xlu0 %v2545_v3  ;;  %422 = vperm.xlu2 %2523, %v396_v0   ;;  %s3830_s28 = smov (!%p311_p3, %s2221_s28), 1  ;;  %v2436_v7 = vld [vmem:[%s3683_s3 + $0x8] sm:$0xff]  ;;  %345 = vst.msk [vmem:[#allocation2 + $0x8] sm:$0xff] %vm343_vm0, %v2546_v11  ;;  %v398_v13 = vld [vmem:[%s3682_s2 + $0x30] sm:$0xff]  ;;  %v2268_v15 = vld [vmem:[%s3682_s2 + $0x40] sm:$0xff] }
   0xe   : > { %412 = vperm.xlu1 %2522, %v394_v1   ;;  %402 = vperm.xlu0 %2521, %v392_v2   ;;  %s2610_s13 = sshll.u32 %s3830_s28, 5  ;;  %v2437_v8 = vld [vmem:[%s3684_s4 + $0x8] sm:$0xff]  ;;  %344 = vst.msk [vmem:[#allocation2] sm:$0xff] %vm343_vm0, %v2546_v11  ;;  %v2271_v26 = vld [vmem:[%s3682_s2 + $0x58] sm:$0xff]  ;;  %v2270_v27 = vld [vmem:[%s3682_s2 + $0x50] sm:$0xff] }
   0xf   : > { %s2625_s22 = scalar_lea.vmem %s3680_s0, %s2610_s13  ;;  %s2638_s30 = scalar_lea.vmem %s3681_s1, %s2610_s13  ;;  %528 = vmatpush.bf16.msra.mxu0 %v2436_v7  ;;  %625 = vmatpush.bf16.msra.mxu2 %v2437_v8  ;;  %346 = vst.msk [vmem:[#allocation2 + $0x50] sm:$0xff] %vm343_vm0, %v2546_v11  ;;  %v2269_v14 = vld [vmem:[%s3682_s2 + $0x48] sm:$0xff]  ;;  %v399_v28 = vld [vmem:[%s3682_s2 + $0x38] sm:$0xff]  ;;  %v2274_v32 = vld [vmem:[%s3682_s2 + $0x70] sm:$0xff] }
  0x10   : > { %v2454_v9 = vld [vmem:[%s2625_s22] sm:$0xff]   ;;  %347 = vst.msk [vmem:[#allocation2 + $0x58] sm:$0xff] %vm343_vm0, %v2546_v11  ;;  %v2501_v16 = vld [vmem:[%s2625_s22 + $0x8] sm:$0xff]   ;;  %v2275_v38 = vld [vmem:[%s3682_s2 + $0x78] sm:$0xff]  ;;  %s3656_s16 = scalar_lea.vmem %s3688_s8, %s2610_s13 }
  0x11   : > { %v2455_v10 = vunpack.c.l.bf16 %v2454_v9  ;;  %v2470_v12 = vld [vmem:[%s2638_s30] sm:$0xff]   ;;  %372 = vst.msk [vmem:[#allocation3] sm:$0xff] %vm343_vm0, %v2546_v11  ;;  %v2456_v18 = vunpack.c.h.bf16 %v2454_v9  ;;  %v2504_v19 = vld [vmem:[%s2638_s30 + $0x8] sm:$0xff]   ;;  %v2459_v21 = vunpack.c.l.bf16 %v2501_v16  ;;  %v2502_v42 = vld [vmem:[%s2625_s22 + $0x10] sm:$0xff]   ;;  %v2460_v44 = vunpack.c.h.bf16 %v2501_v16 }
  0x12   : > { %v2471_v17 = vunpack.c.l.bf16 %v2470_v12  ;;  %373 = vst.msk [vmem:[#allocation3 + $0x8] sm:$0xff] %vm343_vm0, %v2546_v11  ;;  %v2472_v22 = vunpack.c.h.bf16 %v2470_v12  ;;  %v2475_v24 = vunpack.c.l.bf16 %v2504_v19  ;;  %v2273_v33 = vld [vmem:[%s3682_s2 + $0x68] sm:$0xff]  ;;  %v2272_v34 = vld [vmem:[%s3682_s2 + $0x60] sm:$0xff]  ;;  %v2505_v43 = vld [vmem:[%s2638_s30 + $0x10] sm:$0xff]   ;;  %v2463_v45 = vunpack.c.l.bf16 %v2502_v42 }
  0x13   : > { %348 = vst.msk [vmem:[#allocation2 + $0x10] sm:$0xff] %vm343_vm0, %v2455_v10  ;;  %v2476_v46 = vunpack.c.h.bf16 %v2504_v19  ;;  %v2479_v47 = vunpack.c.l.bf16 %v2505_v43  ;;  %v2503_v54 = vld [vmem:[%s2625_s22 + $0x18] sm:$0xff]   ;;  %v2464_v56 = vunpack.c.h.bf16 %v2502_v42  ;;  %v2480_v58 = vunpack.c.h.bf16 %v2505_v43 }
  0x14   : > { %v476_v20 = vld [vmem:[#allocation2 + $0x8] sm:$0xff]  ;;  %374 = vst.msk [vmem:[#allocation3 + $0x50] sm:$0xff] %vm343_vm0, %v2546_v11  ;;  %v2506_v55 = vld [vmem:[%s2638_s30 + $0x18] sm:$0xff]   ;;  %v2467_v57 = vunpack.c.l.bf16 %v2503_v54  ;;  %v2468_v2 = vunpack.c.h.bf16 %v2503_v54  ;;  %s2547_s30 = smov 112  }
  0x15   : > { %427 = vperm.xlu2 %2523, %v397_v4   ;;  %375 = vst.msk [vmem:[#allocation3 + $0x58] sm:$0xff] %vm343_vm0, %v2546_v11  ;;  %v2483_v59 = vunpack.c.l.bf16 %v2506_v55  ;;  %v2484_v3 = vunpack.c.h.bf16 %v2506_v55  ;;  %v2440_v7 = vld [vmem:[%s3683_s3 + $0x18] sm:$0xff] }
  0x16   : > { %417 = vperm.xlu1 %2522, %v395_v5   ;;  %407 = vperm.xlu0 %2521, %v393_v6   ;;  %376 = vst.msk [vmem:[#allocation3 + $0x10] sm:$0xff] %vm343_vm0, %v2471_v17  ;;  %v2434_v5 = vld [vmem:[%s3683_s3] sm:$0xff] }
  0x17   : > { %349 = vst.msk [vmem:[#allocation2 + $0x18] sm:$0xff] %vm343_vm0, %v2456_v18  ;;  %v2435_v6 = vld [vmem:[%s3684_s4] sm:$0xff]  ;;  %575 = vmatpush.bf16.msra.mxu1 %v2434_v5  ;;  %967 = vmatpush.bf16.msrb.mxu2 %v2440_v7 }
  0x18   : > { %350 = vst.msk [vmem:[#allocation2 + $0x20] sm:$0xff] %vm343_vm0, %v2459_v21  ;;  %672 = vmatpush.bf16.msra.mxu3 %v2435_v6  ;;  %v384_v6 = vld [vmem:[#allocation2 + $0x7] sm:$0xff] }
  0x19   : > { %377 = vst.msk [vmem:[#allocation3 + $0x18] sm:$0xff] %vm343_vm0, %v2472_v22  ;;  %v488_v29 = vld [vmem:[#allocation3 + $0x8] sm:$0xff] }
  0x1a   : > { %v2661_v23 = vld [vmem:[#allocation2 + $0x10] sm:$0xff]  ;;  %378 = vst.msk [vmem:[#allocation3 + $0x20] sm:$0xff] %vm343_vm0, %v2475_v24  ;;  %v452_v7 = vld [vmem:[#allocation3 + $0x7] sm:$0xff] }
  0x1b   : > { %v484_v25 = vpack.c.bf16 %v2661_v23, %v476_v20  ;;  %351 = vst.msk [vmem:[#allocation2 + $0x28] sm:$0xff] %vm343_vm0, %v2460_v44 }
  0x1c   : > { %352 = vst.msk [vmem:[#allocation2 + $0x30] sm:$0xff] %vm343_vm0, %v2463_v45 }
  0x1d   : > { %432 = vperm.xlu2 %2523, %v398_v13   ;;  %2238 = vmatmul.msk.bf16.vlgmr.msra.gmra.mxu0 %vm343_vm0, %v484_v25  ;;  %v2679_v30 = vld [vmem:[#allocation3 + $0x10] sm:$0xff]  ;;  %379 = vst.msk [vmem:[#allocation3 + $0x28] sm:$0xff] %vm343_vm0, %v2476_v46 }
  0x1e   : > { %718 = vperm.xlu1 %2522, %v2269_v14   ;;  %713 = vperm.xlu0 %2521, %v2268_v15   ;;  %3729 = vst [vmem:[#allocation4_spill] sm:$0xff] %v2679_v30  ;;  %v496_v31 = vpack.c.bf16 %v2679_v30, %v488_v29  ;;  %v2692_v35 = vld [vmem:[#allocation2 + $0x18] sm:$0xff]  ;;  %v2438_v13 = vld [vmem:[%s3683_s3 + $0x10] sm:$0xff] }
  0x1f   : > { %v2694_v36 = vld [vmem:[#allocation2 + $0x20] sm:$0xff]  ;;  %380 = vst.msk [vmem:[#allocation3 + $0x30] sm:$0xff] %vm343_vm0, %v2479_v47  ;;  %811 = vmatpush.bf16.msrb.mxu0 %v2438_v13  ;;  %v453_v43 = vld [vmem:[#allocation3 + $0xf] sm:$0xff] }
  0x20   : > { %2256 = vmatmul.msk.bf16.vlgmr.msra.gmra.mxu2 %vm343_vm0, %v496_v31  ;;  %v2698_v37 = vpack.c.bf16 %v2694_v36, %v2692_v35  ;;  %v2705_v39 = vld [vmem:[#allocation3 + $0x18] sm:$0xff]  ;;  %353 = vst.msk [vmem:[#allocation2 + $0x38] sm:$0xff] %vm343_vm0, %v2464_v56  ;;  %v385_v13 = vld [vmem:[#allocation2 + $0xf] sm:$0xff] }
  0x21   : > { %3731 = vst [vmem:[#allocation6_spill] sm:$0xff] %v2705_v39  ;;  %v2707_v40 = vld [vmem:[#allocation3 + $0x20] sm:$0xff] }
  0x22   : > { %3730 = vst [vmem:[#allocation5_spill] sm:$0xff] %v2698_v37  ;;  %v2711_v41 = vpack.c.bf16 %v2707_v40, %v2705_v39  ;;  %v2721_v48 = vld [vmem:[#allocation2 + $0x28] sm:$0xff]  ;;  %v1352_v21 = vld [vmem:[#allocation2 + $0x1f] sm:$0xff] }
  0x23   : > { %3732 = vst [vmem:[#allocation7_spill] sm:$0xff] %v2707_v40  ;;  %v2723_v49 = vld [vmem:[#allocation2 + $0x30] sm:$0xff]  ;;  %v2851_v44 = vld [vmem:[#allocation2 + $0x27] sm:$0xff] }
  0x24   : > { %3733 = vst [vmem:[#allocation8_spill] sm:$0xff] %v2711_v41  ;;  %v2727_v50 = vpack.c.bf16 %v2723_v49, %v2721_v48  ;;  %v2729_v51 = vld [vmem:[#allocation3 + $0x28] sm:$0xff] }
  0x25   : > { %728 = vperm.xlu2 %2523, %v2271_v26   ;;  %3735 = vst [vmem:[#allocation10_spill] sm:$0xff] %v2729_v51  ;;  %v2853_v45 = vld [vmem:[#allocation3 + $0x27] sm:$0xff] }
  0x26   : > { %723 = vperm.xlu1 %2522, %v2270_v27   ;;  %437 = vperm.xlu0 %2521, %v399_v28   ;;  %3734 = vst [vmem:[#allocation9_spill] sm:$0xff] %v2727_v50  ;;  %v2731_v52 = vld [vmem:[#allocation3 + $0x30] sm:$0xff] }
  0x27   : > { %3736 = vst [vmem:[#allocation11_spill] sm:$0xff] %v2731_v52  ;;  %v2737_v53 = vpack.c.bf16 %v2731_v52, %v2729_v51  ;;  %v2747_v60 = vld [vmem:[#allocation2 + $0x38] sm:$0xff]  ;;  %v2780_v8 = vld [vmem:[#allocation3 + $0x2f] sm:$0xff] }
  0x28   : > { %354 = vst.msk [vmem:[#allocation2 + $0x40] sm:$0xff] %vm343_vm0, %v2467_v57  ;;  %v2782_v9 = vld [vmem:[#allocation2 + $0x37] sm:$0xff]  ;;  %v2975_v30 = vld [vmem:[#allocation3 + $0x29] sm:$0xff] }
  0x29   : > { %3737 = vst [vmem:[#allocation12_spill] sm:$0xff] %v2737_v53  ;;  %v2861_v54 = vld [vmem:[#allocation2 + $0x31] sm:$0xff] }
  0x2a   : > { %381 = vst.msk [vmem:[#allocation3 + $0x38] sm:$0xff] %vm343_vm0, %v2480_v58  ;;  %v2936_v52 = vld [vmem:[#allocation2 + $0x11] sm:$0xff] }
  0x2b   : > { %382 = vst.msk [vmem:[#allocation3 + $0x40] sm:$0xff] %vm343_vm0, %v2483_v59 }
  0x2c   : > { %355 = vst.msk [vmem:[#allocation2 + $0x48] sm:$0xff] %vm343_vm0, %v2468_v2 }
  0x2d   : > { %743 = vperm.xlu2 %2523, %v2274_v32   ;;  %2239 = vmatmul.msk.bf16.gmra.mxu0 %vm343_vm0, %v2698_v37  ;;  %383 = vst.msk [vmem:[#allocation3 + $0x48] sm:$0xff] %vm343_vm0, %v2484_v3  ;;  %v2843_v32 = vld [vmem:[#allocation2 + $0x17] sm:$0xff] }
  0x2e   : > { %738 = vperm.xlu1 %2522, %v2273_v33   ;;  %733 = vperm.xlu0 %2521, %v2272_v34   ;;  %v2845_v33 = vld [vmem:[#allocation3 + $0x17] sm:$0xff]  ;;  %v2847_v34 = vld [vmem:[#allocation3 + $0x1f] sm:$0xff] }
  0x2f   : > { %v2749_v61 = vld [vmem:[#allocation2 + $0x40] sm:$0xff] }
  0x30   : > { %2257 = vmatmul.msk.bf16.gmra.mxu2 %vm343_vm0, %v2711_v41  ;;  %3738 = vst [vmem:[#allocation13_spill] sm:$0xff] %v2749_v61  ;;  %v2753_v62 = vpack.c.bf16 %v2749_v61, %v2747_v60  ;;  %v2797_v14 = vld [vmem:[#allocation2 + $0x3f] sm:$0xff] }
  0x31   : > { %v2755_v63 = vld [vmem:[#allocation3 + $0x38] sm:$0xff] }
  0x32   : > { %3739 = vst [vmem:[#allocation14_spill] sm:$0xff] %v2753_v62  ;;  %v2757_v0 = vld [vmem:[#allocation3 + $0x40] sm:$0xff]  ;;  %v2784_v10 = vld [vmem:[#allocation3 + $0x37] sm:$0xff] }
  0x33   : > { %3740 = vst [vmem:[#allocation15_spill] sm:$0xff] %v2755_v63  ;;  %v2763_v1 = vpack.c.bf16 %v2757_v0, %v2755_v63  ;;  %v2799_v15 = vld [vmem:[#allocation3 + $0x3f] sm:$0xff]  ;;  %v2825_v25 = vld [vmem:[#allocation2 + $0x47] sm:$0xff]  ;;  %v2863_v55 = vld [vmem:[#allocation3 + $0x31] sm:$0xff] }
  0x34   : > { %3741 = vst [vmem:[#allocation16_spill] sm:$0xff] %v2757_v0  ;;  %v2827_v26 = vld [vmem:[#allocation3 + $0x47] sm:$0xff]  ;;  %v2913_v63 = vld [vmem:[#allocation3 + $0x19] sm:$0xff] }
  0x35   : > { %3742 = vst [vmem:[#allocation17_spill] sm:$0xff] %v2763_v1 }
  0x36   : > { %748 = vperm.xlu0 %2521, %v2275_v38  }
  0x3d   : > { %2240 = vmatmul.msk.bf16.gmra.mxu0 %vm343_vm0, %v2727_v50 }
  0x40   : > { %2258 = vmatmul.msk.bf16.gmra.mxu2 %vm343_vm0, %v2737_v53 }
  0x4d   : > { %2241 = vmatmul.msk.bf16.gmra.mxu0 %vm343_vm0, %v2753_v62  ;;  %v2895_v62 = vld [vmem:[#allocation2 + $0x2f] sm:$0xff] }
  0x50   : > { %2259 = vmatmul.msk.bf16.gmra.mxu2 %vm343_vm0, %v2763_v1 }
  0x67   : > { %v2769_v4 = vpop.permute.xlu2 %422 }
  0x68   : > { %v2788_v11 = vmul.f32 %v2780_v8, %v2769_v4  ;;  %v2792_v12 = vmul.f32 %v2782_v9, %v2769_v4  ;;  %v2803_v16 = vmul.f32 %v2784_v10, %v2769_v4 }
  0x6a   : > { %3743 = vst [vmem:[#allocation18_spill] sm:$0xff] %v2792_v12 }
  0x6b   : > { %3744 = vst [vmem:[#allocation19_spill] sm:$0xff] %v2803_v16 }
  0x6f   : > { %v2805_v17 = vpop.permute.xlu2 %427 }
  0x70   : > { %v2809_v18 = vmul.f32 %v2784_v10, %v2805_v17  ;;  %v2813_v19 = vmul.f32 %v2805_v17, %v2797_v14  ;;  %v2817_v20 = vmul.f32 %v2799_v15, %v2805_v17 }
  0x72   : > { %3745 = vst [vmem:[#allocation20_spill] sm:$0xff] %v2813_v19 }
  0x73   : > { %3746 = vst [vmem:[#allocation21_spill] sm:$0xff] %v2817_v20 }
  0x77   : > { %v2829_v27 = vpop.permute.xlu2 %432 }
  0x78   : > { %v2833_v28 = vmul.f32 %v2799_v15, %v2829_v27  ;;  %v2837_v29 = vmul.f32 %v2825_v25, %v2829_v27  ;;  %v2841_v31 = vmul.f32 %v2827_v26, %v2829_v27 }
  0x7a   : > { %3747 = vst [vmem:[#allocation22_spill] sm:$0xff] %v2837_v29  ;;  %v445_v29 = vmul.f32 %v2805_v17, %v2895_v62 }
  0x7b   : > { %3748 = vst [vmem:[#allocation23_spill] sm:$0xff] %v2841_v31 }
  0x7f   : > { %v2865_v56 = vpop.permute.xlu2 %728 }
  0x80   : > { %v2849_v38 = vpop.permute.xlu1 %412  ;;  %v403_v42 = vpop.permute.xlu0 %402  ;;  %v2883_v3 = vmul.f32 %v2865_v56, %v2861_v54  ;;  %v2887_v5 = vmul.f32 %v2863_v55, %v2865_v56 }
  0x81   : > { %v2856_v46 = vmul.f32 %v2843_v32, %v403_v42  ;;  %v2859_v47 = vmul.f32 %v2845_v33, %v403_v42  ;;  %v2867_v57 = vmul.f32 %v453_v43, %v403_v42  ;;  %v2871_v58 = vmul.f32 %v2847_v34, %v2849_v38 }
  0x82   : > { %v2875_v59 = vmul.f32 %v2851_v44, %v2849_v38  ;;  %v2879_v2 = vmul.f32 %v2853_v45, %v2849_v38  ;;  %3753 = vst [vmem:[#allocation28_spill] sm:$0xff] %v2883_v3  ;;  %v440_v1 = vmul.f32 %v403_v42, %v384_v6  ;;  %v460_v16 = vmul.f32 %v452_v7, %v403_v42 }
  0x83   : > { %3749 = vst [vmem:[#allocation24_spill] sm:$0xff] %v2856_v46  ;;  %v907_v12 = vmul.f32 %v403_v42, %v385_v13  ;;  %v442_v40 = vmul.f32 %v2843_v32, %v2849_v38  ;;  %v462_v46 = vmul.f32 %v2845_v33, %v2849_v38  ;;  %v911_v3 = vmul.f32 %v2769_v4, %v2895_v62 }
  0x84   : > { %3750 = vst [vmem:[#allocation25_spill] sm:$0xff] %v2859_v47  ;;  %v694_v47 = vld [vmem:[#allocation2 + $0x9] sm:$0xff] }
  0x85   : > { %3751 = vst [vmem:[#allocation26_spill] sm:$0xff] %v2875_v59 }
  0x86   : > { %3752 = vst [vmem:[#allocation27_spill] sm:$0xff] %v2879_v2 }
  0x87   : > { %3754 = vst [vmem:[#allocation29_spill] sm:$0xff] %v2887_v5 }
  0x88   : > { %v418_v24 = vpop.permute.xlu1 %417  ;;  %v408_v22 = vpop.permute.xlu0 %407 }
  0x89   : > { %v2889_v20 = vmul.f32 %v1352_v21, %v408_v22  ;;  %v2892_v53 = vmul.f32 %v2847_v34, %v408_v22  ;;  %v441_v41 = vmul.f32 %v408_v22, %v385_v13  ;;  %v461_v0 = vmul.f32 %v453_v43, %v408_v22 }
  0x8a   : > { %v908_v19 = vmul.f32 %v2843_v32, %v408_v22  ;;  %v2904_v43 = vmul.f32 %v2845_v33, %v408_v22  ;;  %v2907_v42 = vmul.f32 %v2853_v45, %v418_v24  ;;  %v2910_v13 = vmul.f32 %v418_v24, %v2895_v62  ;;  %v2999_v33 = vld [vmem:[#allocation2 + $0x29] sm:$0xff] }
  0x8b   : > { %3755 = vst [vmem:[#allocation30_spill] sm:$0xff] %v2889_v20  ;;  %v448_v6 = vpack.c.bf16 %v441_v41, %v440_v1  ;;  %v468_v7 = vpack.c.bf16 %v461_v0, %v460_v16  ;;  %v2916_v41 = vmul.f32 %v2780_v8, %v418_v24  ;;  %v2918_v0 = vld [vmem:[#allocation2 + $0x19] sm:$0xff]  ;;  %v2920_v1 = vld [vmem:[#allocation2 + $0x21] sm:$0xff]  ;;  %v443_v37 = vmul.f32 %v1352_v21, %v418_v24 }
  0x8c   : > { %3756 = vst [vmem:[#allocation31_spill] sm:$0xff] %v2892_v53  ;;  %v915_v50 = vpack.c.bf16 %v908_v19, %v907_v12  ;;  %v2922_v12 = vld [vmem:[#allocation3 + $0x11] sm:$0xff]  ;;  %v463_v39 = vmul.f32 %v2847_v34, %v418_v24  ;;  %v910_v51 = vmul.f32 %v2851_v44, %v418_v24 }
  0x8d   : > { %2246 = vmatmul.msk.bf16.vlgmr.msra.gmra.mxu1 %vm343_vm0, %v448_v6  ;;  %2264 = vmatmul.msk.bf16.vlgmr.msra.gmra.mxu3 %vm343_vm0, %v468_v7  ;;  %3757 = vst [vmem:[#allocation32_spill] sm:$0xff] %v2910_v13  ;;  %v2932_v6 = vld [vmem:[#allocation3 + $0x21] sm:$0xff]  ;;  %v1358_v24 = vld [vmem:[#allocation2 + $0x4f] sm:$0xff]  ;;  %v449_v32 = vpack.c.bf16 %v443_v37, %v442_v40 }
  0x8e   : > { %2302 = vmatmul.msk.bf16.vlgmr.msrb.gmra.mxu2 %vm343_vm0, %v915_v50  ;;  %3758 = vst [vmem:[#allocation33_spill] sm:$0xff] %v2916_v41 }
  0x90   : > { %v2930_v22 = vpop.permute.xlu1 %718  ;;  %v2934_v7 = vpop.permute.xlu0 %713 }
  0x91   : > { %v2942_v16 = vmul.f32 %v2913_v63, %v2930_v22  ;;  %v2946_v19 = vmul.f32 %v2920_v1, %v2930_v22  ;;  %v2950_v50 = vmul.f32 %v2932_v6, %v2930_v22  ;;  %v2954_v59 = vmul.f32 %v2922_v12, %v2934_v7 }
  0x92   : > { %v2958_v13 = vmul.f32 %v2918_v0, %v2934_v7  ;;  %v2962_v53 = vmul.f32 %v2913_v63, %v2934_v7  ;;  %v751_v2 = vmul.f32 %v2934_v7, %v694_v47  ;;  %v752_v41 = vmul.f32 %v2936_v52, %v2930_v22 }
  0x93   : > { %3759 = vst [vmem:[#allocation34_spill] sm:$0xff] %v2946_v19  ;;  %v444_v19 = vmul.f32 %v2851_v44, %v2769_v4  ;;  %v2444_v44 = vld [vmem:[%s3683_s3 + $0x28] sm:$0xff] }
  0x94   : > { %3760 = vst [vmem:[#allocation35_spill] sm:$0xff] %v2950_v50  ;;  %v759_v20 = vpack.c.bf16 %v752_v41, %v751_v2  ;;  %v909_v2 = vmul.f32 %v1352_v21, %v2849_v38  ;;  %v2997_v41 = vmul.f32 %v2975_v30, %v2865_v56  ;;  %v469_v50 = vpack.c.bf16 %v463_v39, %v462_v46  ;;  %v3048_v21 = vld [vmem:[#allocation3 + $0x41] sm:$0xff] }
  0x95   : > { %3761 = vst [vmem:[#allocation36_spill] sm:$0xff] %v2958_v13  ;;  %1263 = vmatpush.bf16.msra.mxu2 %v2444_v44 }
  0x96   : > { %3762 = vst [vmem:[#allocation37_spill] sm:$0xff] %v2962_v53  ;;  %2282 = vmatmul.msk.bf16.vlgmr.msrb.gmra.mxu0 %vm343_vm0, %v759_v20  ;;  %v1378_v53 = vld [vmem:[#allocation3 + $0x4f] sm:$0xff]  ;;  %v916_v13 = vpack.c.bf16 %v910_v51, %v909_v2  ;;  %v3046_v51 = vld [vmem:[#allocation3 + $0x39] sm:$0xff] }
  0x98   : > { %v2977_v47 = vpop.permute.xlu1 %723  ;;  %v2979_v61 = vpop.permute.xlu0 %437 }
  0x99   : > { %v2989_v20 = vmul.f32 %v2827_v26, %v2979_v61  ;;  %v2993_v34 = vmul.f32 %v2932_v6, %v2977_v47  ;;  %v3008_v38 = vmul.f32 %v1358_v24, %v2979_v61  ;;  %v3012_v37 = vmul.f32 %v2977_v47, %v2999_v33  ;;  %v3038_v26 = vld [vmem:[#allocation2 + $0x41] sm:$0xff] }
  0x9a   : > { %v3015_v39 = vmul.f32 %v1378_v53, %v2979_v61  ;;  %v3020_v40 = vmul.f32 %v2975_v30, %v2977_v47 }
  0x9b   : > { %3763 = vst [vmem:[#allocation38_spill] sm:$0xff] %v3008_v38  ;;  %v464_v38 = vmul.f32 %v2853_v45, %v2769_v4  ;;  %v912_v45 = vmul.f32 %v2782_v9, %v2805_v17 }
  0x9c   : > { %3764 = vst [vmem:[#allocation39_spill] sm:$0xff] %v3012_v37 }
  0x9d   : > { %2247 = vmatmul.msk.bf16.gmra.mxu1 %vm343_vm0, %v449_v32  ;;  %2265 = vmatmul.msk.bf16.gmra.mxu3 %vm343_vm0, %v469_v50  ;;  %3765 = vst [vmem:[#allocation40_spill] sm:$0xff] %v3015_v39  ;;  %v3036_v32 = vld [vmem:[#allocation2 + $0x39] sm:$0xff]  ;;  %v754_v50 = vmul.f32 %v2920_v1, %v2865_v56 }
  0x9e   : > { %2303 = vmatmul.msk.bf16.gmra.mxu2 %vm343_vm0, %v916_v13  ;;  %3766 = vst [vmem:[#allocation41_spill] sm:$0xff] %v3020_v40  ;;  %v753_v13 = vmul.f32 %v2918_v0, %v2977_v47 }
  0xa0   : > { %v3028_v2 = vpop.permute.xlu1 %738  ;;  %v3030_v24 = vpop.permute.xlu0 %733  ;;  %v760_v39 = vpack.c.bf16 %v754_v50, %v753_v13  ;;  %v465_v50 = vmul.f32 %v2780_v8, %v2805_v17  ;;  %v2439_v13 = vld [vmem:[%s3684_s4 + $0x10] sm:$0xff]  ;;  %v450_v8 = vpack.c.bf16 %v445_v29, %v444_v19  ;;  %v447_v29 = vmul.f32 %v2979_v61, %v2797_v14 }
  0xa1   : > { %v3042_v46 = vmul.f32 %v2863_v55, %v3030_v24  ;;  %v3052_v53 = vmul.f32 %v3030_v24, %v3036_v32  ;;  %v3056_v40 = vmul.f32 %v3028_v2, %v3038_v26  ;;  %v3060_v5 = vmul.f32 %v3046_v51, %v3030_v24  ;;  %869 = vmatpush.bf16.msrb.mxu1 %v2439_v13 }
  0xa2   : > { %v3064_v31 = vmul.f32 %v3048_v21, %v3028_v2  ;;  %v470_v37 = vpack.c.bf16 %v465_v50, %v464_v38  ;;  %v755_v62 = vmul.f32 %v3030_v24, %v2999_v33  ;;  %v756_v4 = vmul.f32 %v3028_v2, %v2861_v54 }
  0xa3   : > { %3767 = vst [vmem:[#allocation42_spill] sm:$0xff] %v3060_v5  ;;  %v917_v5 = vpack.c.bf16 %v912_v45, %v911_v3  ;;  %v467_v3 = vmul.f32 %v2799_v15, %v2979_v61  ;;  %v466_v19 = vmul.f32 %v2784_v10, %v2829_v27  ;;  %v913_v38 = vmul.f32 %v2829_v27, %v2797_v14  ;;  %v3124_v10 = vpop.f32.mrf.mxu2 }
  0xa4   : > { %3768 = vst [vmem:[#allocation43_spill] sm:$0xff] %v3064_v31  ;;  %v2442_v31 = vld [vmem:[%s3683_s3 + $0x20] sm:$0xff]  ;;  %v761_v17 = vpack.c.bf16 %v756_v4, %v755_v62  ;;  %v772_v45 = vmul.f32 %v2922_v12, %v2930_v22  ;;  %v1203_v62 = vmul.f32 %v2936_v52, %v2934_v7  ;;  %v773_v52 = vmul.f32 %v2913_v63, %v2977_v47 }
  0xa5   : > { %1107 = vmatpush.bf16.msra.mxu0 %v2442_v31  ;;  %v446_v31 = vmul.f32 %v2782_v9, %v2829_v27  ;;  %v471_v50 = vpack.c.bf16 %v467_v3, %v466_v19  ;;  %v3769_v3 = vpack.c.bf16 %v2904_v43, %v2867_v57  ;;  %v774_v57 = vmul.f32 %v2932_v6, %v2865_v56 }
  0xa6   : > { %2283 = vmatmul.msk.bf16.gmra.mxu0 %vm343_vm0, %v760_v39  ;;  %v2441_v39 = vld [vmem:[%s3684_s4 + $0x18] sm:$0xff] }
  0xa7   : > { %1025 = vmatpush.bf16.msrb.mxu3 %v2441_v39  ;;  %v3128_v39 = vpop.f32.mrf.mxu0 }
  0xa8   : > { %v3117_v15 = vpop.permute.xlu0 %748 }
  0xa9   : > { %v758_v9 = vmul.f32 %v3117_v15, %v3038_v26 }
  0xad   : > { %2248 = vmatmul.msk.bf16.gmra.mxu1 %vm343_vm0, %v450_v8  ;;  %2266 = vmatmul.msk.bf16.gmra.mxu3 %vm343_vm0, %v470_v37  ;;  %v451_v37 = vpack.c.bf16 %v447_v29, %v446_v31  ;;  %v1204_v8 = vmul.f32 %v2918_v0, %v2930_v22  ;;  %v1063_v0 = vpack.c.bf16 %v2692_v35, %v2661_v23 }
  0xae   : > { %2304 = vmatmul.msk.bf16.gmra.mxu2 %vm343_vm0, %v917_v5  ;;  %v914_v5 = vmul.f32 %v2825_v25, %v2979_v61  ;;  %v3120_v61 = vpop.permute.xlu2 %743  ;;  %v763_v25 = vld [vmem:[#allocation3 + $0x9] sm:$0xff]  ;;  %v780_v31 = vpack.c.bf16 %v774_v57, %v773_v52  ;;  %v3770_v35 = vpack.c.bf16 %v2907_v42, %v2871_v58  ;;  %v1207_v58 = vmul.f32 %v3030_v24, %v2861_v54 }
  0xaf   : > { %v757_v14 = vmul.f32 %v3120_v61, %v3036_v32  ;;  %v771_v44 = vmul.f32 %v763_v25, %v2934_v7  ;;  %v1211_v29 = vpack.c.bf16 %v1204_v8, %v1203_v62  ;;  %v3146_v12 = vpop.f32.mrf.mxu0  ;;  %v1205_v7 = vmul.f32 %v2920_v1, %v2977_v47  ;;  %v3773_v8 = vld [vmem:[#allocation13_spill] sm:$0xff] }
  0xb0   : > { %v918_v13 = vpack.c.bf16 %v914_v5, %v913_v38  ;;  %v1206_v5 = vmul.f32 %v2865_v56, %v2999_v33  ;;  %v1064_v1 = vpack.c.bf16 %v2721_v48, %v2694_v36  ;;  %v775_v56 = vmul.f32 %v2975_v30, %v3030_v24  ;;  %v2443_v36 = vld [vmem:[%s3684_s4 + $0x20] sm:$0xff]  ;;  %v2445_v30 = vld [vmem:[%s3684_s4 + $0x28] sm:$0xff]  ;;  %v2448_v24 = vld [vmem:[%s3683_s3 + $0x38] sm:$0xff] }
  0xb1   : > { %v762_v27 = vpack.c.bf16 %v758_v9, %v757_v14  ;;  %v779_v4 = vpack.c.bf16 %v772_v45, %v771_v44  ;;  %v776_v47 = vmul.f32 %v2863_v55, %v3028_v2  ;;  %v1208_v42 = vmul.f32 %v3028_v2, %v3036_v32  ;;  %v2446_v55 = vld [vmem:[%s3683_s3 + $0x30] sm:$0xff]  ;;  %1165 = vmatpush.bf16.msra.mxu1 %v2443_v36  ;;  %v3231_v44 = vld [vmem:[#allocation2 + $0x48] sm:$0xff] }
  0xb2   : > { %v1212_v23 = vpack.c.bf16 %v1206_v5, %v1205_v7  ;;  %v3771_v54 = vpack.c.bf16 %v2809_v18, %v2788_v11  ;;  %1321 = vmatpush.bf16.msra.mxu3 %v2445_v30  ;;  %1419 = vmatpush.bf16.msrb.mxu0 %v2446_v55  ;;  %v1065_v11 = vpack.c.bf16 %v2747_v60, %v2723_v49  ;;  %v3777_v52 = vld [vmem:[#allocation5_spill] sm:$0xff] }
  0xb3   : > { %v781_v19 = vpack.c.bf16 %v776_v47, %v775_v56  ;;  %v1213_v48 = vpack.c.bf16 %v1208_v42, %v1207_v58  ;;  %1559 = vmatpush.bf16.msrb.mxu2 %v2448_v24  ;;  %v778_v38 = vmul.f32 %v3048_v21, %v3117_v15  ;;  %v777_v9 = vmul.f32 %v3046_v51, %v3120_v61  ;;  %v3779_v56 = vld [vmem:[#allocation24_spill] sm:$0xff]  ;;  %v3781_v42 = vld [vmem:[#allocation7_spill] sm:$0xff]  ;;  %v3784_v24 = vld [vmem:[#allocation9_spill] sm:$0xff] }
  0xb4   : > { %v1209_v49 = vmul.f32 %v3120_v61, %v3038_v26  ;;  %v3772_v25 = vpack.c.bf16 %v2989_v20, %v2833_v28  ;;  %v1066_v26 = vpack.c.bf16 %v3231_v44, %v3773_v8  ;;  %v3783_v55 = vpack.c.bf16 %v2997_v41, %v2993_v34 }
  0xb5   : > { %v782_v60 = vpack.c.bf16 %v778_v38, %v777_v9  ;;  %v1228_v34 = vmul.f32 %v3046_v51, %v3028_v2  ;;  %v2449_v51 = vld [vmem:[%s3684_s4 + $0x38] sm:$0xff] }
  0xb6   : > { %2284 = vmatmul.msk.bf16.gmra.mxu0 %vm343_vm0, %v761_v17  ;;  %v3138_v17 = vpop.f32.mrf.mxu2 }
  0xb7   : > { %v3159_v43 = vpop.f32.mrf.mxu0 }
  0xbd   : > { %2249 = vmatmul.msk.bf16.gmra.mxu1 %vm343_vm0, %v451_v37  ;;  %2267 = vmatmul.msk.bf16.gmra.mxu3 %vm343_vm0, %v471_v50  ;;  %v3213_v37 = vld [vmem:[#allocation2 + $0x49] sm:$0xff] }
  0xbe   : > { %2305 = vmatmul.msk.bf16.gmra.mxu2 %vm343_vm0, %v918_v13  ;;  %v3150_v22 = vpop.f32.mrf.mxu2  ;;  %v1210_v13 = vmul.f32 %v3213_v37, %v3117_v15 }
  0xbf   : > { %v3173_v6 = vpop.f32.mrf.mxu0 }
  0xc0   : > { %v1214_v14 = vpack.c.bf16 %v1210_v13, %v1209_v49 }
  0xc6   : > { %2285 = vmatmul.msk.bf16.gmra.mxu0 %vm343_vm0, %v762_v27  ;;  %v3169_v63 = vpop.f32.mrf.mxu2 }
  0xc7   : > { %v3203_v32 = vpop.f32.mrf.mxu0 }
  0xcd   : > { %2292 = vmatmul.msk.bf16.vlgmr.msrb.gmra.mxu1 %vm343_vm0, %v779_v4  ;;  %2312 = vmatmul.msk.bf16.vlgmr.msrb.gmra.mxu3 %vm343_vm0, %v3769_v3  ;;  %v3774_v4 = vld [vmem:[#allocation4_spill] sm:$0xff] }
  0xce   : > { %2342 = vmatmul.msk.bf16.vlgmr.msra.gmra.mxu2 %vm343_vm0, %v1211_v29  ;;  %v3184_v33 = vpop.f32.mrf.mxu2  ;;  %v3775_v29 = vld [vmem:[#allocation6_spill] sm:$0xff]  ;;  %1617 = vmatpush.bf16.msrb.mxu3 %v2449_v51 }
  0xcf   : > { %v3215_v50 = vpop.f32.mrf.mxu0  ;;  %v1075_v28 = vpack.c.bf16 %v3775_v29, %v3774_v4  ;;  %v3788_v4 = vld [vmem:[#allocation11_spill] sm:$0xff] }
  0xd0   : > { %v3789_v29 = vld [vmem:[#allocation15_spill] sm:$0xff] }
  0xd6   : > { %2322 = vmatmul.msk.bf16.vlgmr.msra.gmra.mxu0 %vm343_vm0, %v1063_v0  ;;  %v3208_v18 = vpop.f32.mrf.mxu2  ;;  %v3776_v0 = vpack.c.bf16 %v2942_v16, %v2954_v59 }
  0xd7   : > { %v3233_v45 = vpop.f32.mrf.mxu0 }
  0xdd   : > { %2293 = vmatmul.msk.bf16.gmra.mxu1 %vm343_vm0, %v780_v31  ;;  %2313 = vmatmul.msk.bf16.gmra.mxu3 %vm343_vm0, %v3770_v35 }
  0xde   : > { %2343 = vmatmul.msk.bf16.gmra.mxu2 %vm343_vm0, %v1212_v23  ;;  %v3228_v27 = vpop.f32.mrf.mxu2 }
  0xdf   : > { %v3242_v3 = vpop.f32.mrf.mxu0 }
  0xe6   : > { %2323 = vmatmul.msk.bf16.gmra.mxu0 %vm343_vm0, %v1064_v1  ;;  %v3238_v62 = vpop.f32.mrf.mxu2  ;;  %v3778_v1 = vld [vmem:[#allocation30_spill] sm:$0xff] }
  0xe7   : > { %v3780_v47 = vpack.c.bf16 %v3778_v1, %v3779_v56 }
  0xed   : > { %2294 = vmatmul.msk.bf16.gmra.mxu1 %vm343_vm0, %v781_v19  ;;  %2314 = vmatmul.msk.bf16.gmra.mxu3 %vm343_vm0, %v3771_v54  ;;  %v3782_v19 = vld [vmem:[#allocation10_spill] sm:$0xff] }
  0xee   : > { %2344 = vmatmul.msk.bf16.gmra.mxu2 %vm343_vm0, %v1213_v48  ;;  %v1076_v36 = vpack.c.bf16 %v3782_v19, %v3781_v42  ;;  %v3315_v42 = vld [vmem:[#allocation3 + $0x49] sm:$0xff]  ;;  %v3791_v19 = vld [vmem:[#allocation20_spill] sm:$0xff] }
  0xf6   : > { %2324 = vmatmul.msk.bf16.gmra.mxu0 %vm343_vm0, %v1065_v11 }
  0xfd   : > { %2295 = vmatmul.msk.bf16.gmra.mxu1 %vm343_vm0, %v782_v60  ;;  %2315 = vmatmul.msk.bf16.gmra.mxu3 %vm343_vm0, %v3772_v25  ;;  %v3785_v60 = vld [vmem:[#allocation32_spill] sm:$0xff] }
  0xfe   : > { %2345 = vmatmul.msk.bf16.gmra.mxu2 %vm343_vm0, %v1214_v14  ;;  %v3786_v14 = vld [vmem:[#allocation26_spill] sm:$0xff] }
  0xff   : > { %v3787_v25 = vpack.c.bf16 %v3785_v60, %v3786_v14 }
 0x106   : > { %2325 = vmatmul.msk.bf16.gmra.mxu0 %vm343_vm0, %v1066_v26 }
 0x10a   : > { %v577_v20 = vpop.f32.mrf.mxu1 }
 0x10b   : > { %v578_v31 = vadd.f32 %v577_v20, %v3128_v39 }
 0x10d   : > { %2332 = vmatmul.msk.bf16.vlgmr.msra.gmra.mxu1 %vm343_vm0, %v1075_v28  ;;  %2352 = vmatmul.msk.bf16.vlgmr.msra.gmra.mxu3 %vm343_vm0, %v3776_v0  ;;  %v1077_v28 = vpack.c.bf16 %v3789_v29, %v3788_v4  ;;  %v1233_v0 = vpack.c.bf16 %v1228_v34, %v3042_v46  ;;  %v3790_v46 = vld [vmem:[#allocation14_spill] sm:$0xff] }
 0x10e   : > { %2382 = vmatmul.msk.bf16.vlgmr.msrb.gmra.mxu2 %vm343_vm0, %v3777_v52 }
 0x110   : > { %v3251_v7 = vpop.f32.mrf.mxu3 }
 0x111   : > { %v969_v57 = vpop.f32.mrf.mxu2 }
 0x112   : > { %v579_v5 = vpop.f32.mrf.mxu1 }
 0x113   : > { %v813_v23 = vpop.f32.mrf.mxu0  ;;  %v580_v48 = vadd.f32 %v579_v5, %v3146_v12 }
 0x114   : > { %v833_v35 = vadd.f32 %v813_v23, %v578_v31 }
 0x116   : > { %2362 = vmatmul.msk.bf16.vlgmr.msrb.gmra.mxu0 %vm343_vm0, %v3780_v47  ;;  %v3258_v58 = vadd.f32 %v969_v57, %v833_v35  ;;  %v2447_v57 = vld [vmem:[%s3684_s4 + $0x30] sm:$0xff]  ;;  %v3313_v47 = vld [vmem:[#allocation3 + $0x48] sm:$0xff] }
 0x117   : > { %1477 = vmatpush.bf16.msrb.mxu1 %v2447_v57 }
 0x118   : > { %v3260_v59 = vpop.f32.mrf.mxu3 }
 0x119   : > { %v3262_v16 = vpop.f32.mrf.mxu2 }
 0x11a   : > { %v582_v30 = vpop.f32.mrf.mxu1 }
 0x11b   : > { %v815_v39 = vpop.f32.mrf.mxu0  ;;  %v583_v9 = vadd.f32 %v582_v30, %v3159_v43 }
 0x11c   : > { %v3267_v54 = vadd.f32 %v815_v39, %v580_v48  ;;  %v1230_v48 = vmul.f32 %v3315_v42, %v3117_v15  ;;  %v1514_v39 = vld [vmem:[#allocation2 + $0x50] sm:$0xff] }
 0x11d   : > { %2333 = vmatmul.msk.bf16.gmra.mxu1 %vm343_vm0, %v1076_v36  ;;  %2353 = vmatmul.msk.bf16.gmra.mxu3 %vm343_vm0, %v3783_v55  ;;  %v3792_v36 = vld [vmem:[#allocation18_spill] sm:$0xff] }
 0x11e   : > { %2383 = vmatmul.msk.bf16.gmra.mxu2 %vm343_vm0, %v3784_v24  ;;  %v3793_v30 = vpack.c.bf16 %v3791_v19, %v3792_v36  ;;  %v3801_v36 = vld [vmem:[#allocation8_spill] sm:$0xff] }
 0x120   : > { %v3276_v11 = vpop.f32.mrf.mxu3 }
 0x121   : > { %v974_v38 = vpop.f32.mrf.mxu2 }
 0x122   : > { %v584_v13 = vpop.f32.mrf.mxu1 }
 0x123   : > { %v818_v12 = vpop.f32.mrf.mxu0  ;;  %v585_v20 = vadd.f32 %v584_v13, %v3173_v6  ;;  %v2450_v6 = vld [vmem:[%s3683_s3 + $0x40] sm:$0xff] }
 0x124   : > { %v835_v49 = vadd.f32 %v818_v12, %v583_v9  ;;  %1715 = vmatpush.bf16.msra.mxu0 %v2450_v6  ;;  %v1229_v9 = vmul.f32 %v3048_v21, %v3120_v61  ;;  %v675_v6 = vadd.f32 %v3251_v7, %v3124_v10  ;;  %v677_v10 = vadd.f32 %v3260_v59, %v3138_v17 }
 0x125   : > { %v680_v17 = vadd.f32 %v3276_v11, %v3150_v22 }
 0x126   : > { %2363 = vmatmul.msk.bf16.gmra.mxu0 %vm343_vm0, %v3787_v25  ;;  %v3285_v41 = vadd.f32 %v974_v38, %v835_v49  ;;  %v3794_v38 = vld [vmem:[#allocation16_spill] sm:$0xff]  ;;  %v1518_v49 = vpack.c.bf16 %v1514_v39, %v3231_v44  ;;  %v1234_v14 = vpack.c.bf16 %v1230_v48, %v1229_v9  ;;  %v3802_v9 = vld [vmem:[#allocation34_spill] sm:$0xff] }
 0x127   : > { %v1078_v13 = vpack.c.bf16 %v3313_v47, %v3794_v38 }
 0x128   : > { %v3287_v8 = vpop.f32.mrf.mxu3 }
 0x129   : > { %v3289_v26 = vpop.f32.mrf.mxu2  ;;  %v682_v22 = vadd.f32 %v3287_v8, %v3169_v63 }
 0x12a   : > { %v587_v43 = vpop.f32.mrf.mxu1 }
 0x12b   : > { %v820_v52 = vpop.f32.mrf.mxu0  ;;  %v588_v35 = vadd.f32 %v587_v43, %v3203_v32 }
 0x12c   : > { %v3301_v2 = vadd.f32 %v820_v52, %v585_v20  ;;  %v3795_v20 = vld [vmem:[#allocation38_spill] sm:$0xff] }
 0x12d   : > { %2334 = vmatmul.msk.bf16.gmra.mxu1 %vm343_vm0, %v1077_v28  ;;  %2354 = vmatmul.msk.bf16.gmra.mxu3 %vm343_vm0, %v1233_v0  ;;  %v3796_v0 = vld [vmem:[#allocation22_spill] sm:$0xff] }
 0x12e   : > { %2384 = vmatmul.msk.bf16.gmra.mxu2 %vm343_vm0, %v3790_v46  ;;  %v3797_v52 = vpack.c.bf16 %v3795_v20, %v3796_v0  ;;  %v3808_v20 = vld [vmem:[#allocation12_spill] sm:$0xff] }
 0x130   : > { %v3310_v5 = vpop.f32.mrf.mxu3 }
 0x131   : > { %v979_v31 = vpop.f32.mrf.mxu2  ;;  %v685_v63 = vadd.f32 %v3310_v5, %v3184_v33  ;;  %v2451_v33 = vld [vmem:[%s3684_s4 + $0x40] sm:$0xff] }
 0x132   : > { %v589_v23 = vpop.f32.mrf.mxu1  ;;  %1773 = vmatpush.bf16.msra.mxu1 %v2451_v33 }
 0x133   : > { %v823_v1 = vpop.f32.mrf.mxu0  ;;  %v590_v60 = vadd.f32 %v589_v23, %v3215_v50 }
 0x134   : > { %v837_v56 = vadd.f32 %v823_v1, %v588_v35  ;;  %v3798_v1 = vld [vmem:[#allocation31_spill] sm:$0xff] }
 0x136   : > { %2364 = vmatmul.msk.bf16.gmra.mxu0 %vm343_vm0, %v3793_v30  ;;  %v3323_v55 = vadd.f32 %v979_v31, %v837_v56  ;;  %v3799_v56 = vld [vmem:[#allocation25_spill] sm:$0xff] }
 0x137   : > { %v3800_v19 = vpack.c.bf16 %v3798_v1, %v3799_v56 }
 0x138   : > { %v3325_v24 = vpop.f32.mrf.mxu3 }
 0x139   : > { %v3327_v32 = vpop.f32.mrf.mxu2 }
 0x13a   : > { %v592_v12 = vpop.f32.mrf.mxu1 }
 0x13b   : > { %v825_v25 = vpop.f32.mrf.mxu0  ;;  %v593_v21 = vadd.f32 %v592_v12, %v3233_v45  ;;  %v3803_v12 = vld [vmem:[#allocation36_spill] sm:$0xff] }
 0x13c   : > { %v3335_v34 = vadd.f32 %v825_v25, %v590_v60 }
 0x13d   : > { %2335 = vmatmul.msk.bf16.gmra.mxu1 %vm343_vm0, %v1078_v13  ;;  %2355 = vmatmul.msk.bf16.gmra.mxu3 %vm343_vm0, %v1234_v14 }
 0x13e   : > { %2385 = vmatmul.msk.bf16.gmra.mxu2 %vm343_vm0, %v1518_v49  ;;  %v3804_v49 = vpack.c.bf16 %v3802_v9, %v3803_v12 }
 0x140   : > { %v3340_v4 = vpop.f32.mrf.mxu3 }
 0x141   : > { %v984_v29 = vpop.f32.mrf.mxu2 }
 0x142   : > { %v594_v28 = vpop.f32.mrf.mxu1 }
 0x143   : > { %v595_v44 = vadd.f32 %v594_v28, %v3242_v3  ;;  %v828_v43 = vpop.f32.mrf.mxu0  ;;  %v990_v28 = vadd.f32 %v3262_v16, %v3267_v54 }
 0x144   : > { %v839_v50 = vadd.f32 %v828_v43, %v593_v21  ;;  %v3806_v43 = vld [vmem:[#allocation27_spill] sm:$0xff] }
 0x146   : > { %2365 = vmatmul.msk.bf16.gmra.mxu0 %vm343_vm0, %v3797_v52  ;;  %v3348_v57 = vadd.f32 %v984_v29, %v839_v50 }
 0x148   : > { %v691_v51 = vpop.f32.mrf.mxu3 }
 0x149   : > { %v3353_v46 = vadd.f32 %v691_v51, %v3238_v62  ;;  %v3355_v31 = vpop.f32.mrf.mxu2 }
 0x14a   : > { %v871_v45 = vpop.f32.mrf.mxu1 }
 0x14b   : > { %v891_v3 = vadd.f32 %v871_v45, %v675_v6  ;;  %v830_v23 = vpop.f32.mrf.mxu0  ;;  %v3809_v45 = vld [vmem:[#allocation28_spill] sm:$0xff] }
 0x14c   : > { %v3357_v35 = vadd.f32 %v830_v23, %v595_v44  ;;  %v3805_v44 = vld [vmem:[#allocation33_spill] sm:$0xff] }
 0x14d   : > { %2372 = vmatmul.msk.bf16.vlgmr.msrb.gmra.mxu1 %vm343_vm0, %v3800_v19  ;;  %2392 = vmatmul.msk.bf16.vlgmr.msrb.gmra.mxu3 %vm343_vm0, %v3801_v36  ;;  %v3807_v50 = vpack.c.bf16 %v3805_v44, %v3806_v43 }
 0x150   : > { %v1027_v30 = vpop.f32.mrf.mxu3 }
 0x151   : > { %v3367_v62 = vadd.f32 %v1027_v30, %v891_v3  ;;  %v1265_v7 = vpop.f32.mrf.mxu2  ;;  %v3810_v3 = vld [vmem:[#allocation39_spill] sm:$0xff]  ;;  %v992_v30 = vadd.f32 %v3289_v26, %v3301_v2  ;;  %v687_v26 = vadd.f32 %v3325_v24, %v3208_v18  ;;  %v690_v18 = vadd.f32 %v3340_v4, %v3228_v27 }
 0x152   : > { %v873_v48 = vpop.f32.mrf.mxu1  ;;  %v3811_v23 = vpack.c.bf16 %v3809_v45, %v3810_v3 }
 0x153   : > { %v3369_v39 = vadd.f32 %v873_v48, %v677_v10  ;;  %v1109_v38 = vpop.f32.mrf.mxu0  ;;  %v3813_v48 = vld [vmem:[#allocation19_spill] sm:$0xff] }
 0x154   : > { %v1129_v13 = vadd.f32 %v1109_v38, %v3258_v58 }
 0x156   : > { %2402 = vmatmul.msk.bf16.vlgmr.msra.gmra.mxu0 %vm343_vm0, %v3804_v49  ;;  %v3376_v60 = vadd.f32 %v1265_v7, %v1129_v13  ;;  %v3812_v7 = vld [vmem:[#allocation21_spill] sm:$0xff] }
 0x157   : > { %v3814_v38 = vpack.c.bf16 %v3812_v7, %v3813_v48  ;;  %v3815_v13 = vld [vmem:[#allocation17_spill] sm:$0xff] }
 0x158   : > { %v3378_v14 = vpop.f32.mrf.mxu3  ;;  %v3821_v48 = vld [vmem:[#allocation37_spill] sm:$0xff] }
 0x159   : > { %v3382_v59 = vpop.f32.mrf.mxu2 }
 0x15a   : > { %v876_v25 = vpop.f32.mrf.mxu1 }
 0x15b   : > { %v893_v29 = vadd.f32 %v876_v25, %v680_v17  ;;  %v1111_v58 = vpop.f32.mrf.mxu0 }
 0x15c   : > { %v3386_v21 = vadd.f32 %v1111_v58, %v990_v28  ;;  %v1526_v28 = vld [vmem:[#allocation3 + $0x50] sm:$0xff]  ;;  %v3816_v58 = vpack.c.bf16 %v3056_v40, %v3052_v53  ;;  %v3818_v40 = vld [vmem:[#allocation23_spill] sm:$0xff] }
 0x15d   : > { %2373 = vmatmul.msk.bf16.gmra.mxu1 %vm343_vm0, %v3807_v50  ;;  %2393 = vmatmul.msk.bf16.gmra.mxu3 %vm343_vm0, %v3808_v20  ;;  %v1530_v24 = vpack.c.bf16 %v1526_v28, %v3313_v47 }
 0x160   : > { %v1032_v0 = vpop.f32.mrf.mxu3 }
 0x161   : > { %v3396_v11 = vadd.f32 %v1032_v0, %v893_v29  ;;  %v1270_v52 = vpop.f32.mrf.mxu2  ;;  %v994_v0 = vadd.f32 %v3327_v32, %v3335_v34  ;;  %v1661_v34 = vmul.f32 %v3213_v37, %v3120_v61  ;;  %v3820_v37 = vld [vmem:[#allocation35_spill] sm:$0xff] }
 0x162   : > { %v878_v51 = vpop.f32.mrf.mxu1 }
 0x163   : > { %v3398_v16 = vadd.f32 %v878_v51, %v682_v22  ;;  %v1114_v54 = vpop.f32.mrf.mxu0  ;;  %v3817_v51 = vld [vmem:[#allocation40_spill] sm:$0xff] }
 0x164   : > { %v1131_v6 = vadd.f32 %v1114_v54, %v3285_v41  ;;  %v3819_v53 = vpack.c.bf16 %v3817_v51, %v3818_v40  ;;  %v1654_v54 = vld [vmem:[#allocation2 + $0x51] sm:$0xff] }
 0x165   : > { %v1662_v4 = vmul.f32 %v1654_v54, %v3117_v15  ;;  %v3827_v54 = vld [vmem:[#allocation42_spill] sm:$0xff] }
 0x166   : > { %2403 = vmatmul.msk.bf16.gmra.mxu0 %vm343_vm0, %v3811_v23  ;;  %v3405_v1 = vadd.f32 %v1270_v52, %v1131_v6 }
 0x168   : > { %v3407_v56 = vpop.f32.mrf.mxu3 }
 0x169   : > { %v1272_v8 = vpop.f32.mrf.mxu2 }
 0x16a   : > { %v881_v19 = vpop.f32.mrf.mxu1 }
 0x16b   : > { %v895_v36 = vadd.f32 %v881_v19, %v685_v63  ;;  %v1116_v10 = vpop.f32.mrf.mxu0  ;;  %v1666_v63 = vpack.c.bf16 %v1662_v4, %v1661_v34 }
 0x16c   : > { %v1132_v41 = vadd.f32 %v1116_v10, %v992_v30  ;;  %v996_v10 = vadd.f32 %v3355_v31, %v3357_v35 }
 0x16d   : > { %2374 = vmatmul.msk.bf16.gmra.mxu1 %vm343_vm0, %v3814_v38  ;;  %2394 = vmatmul.msk.bf16.gmra.mxu3 %vm343_vm0, %v3815_v13  ;;  %v3822_v38 = vpack.c.bf16 %v3820_v37, %v3821_v48  ;;  %v1048_v13 = vadd.f32 %v3378_v14, %v3369_v39  ;;  %v1050_v14 = vadd.f32 %v3407_v56, %v3398_v16 }
 0x16e   : > { %v3422_v5 = vadd.f32 %v1272_v8, %v1132_v41 }
 0x170   : > { %v1037_v9 = vpop.f32.mrf.mxu3 }
 0x171   : > { %v3426_v2 = vadd.f32 %v1037_v9, %v895_v36  ;;  %v1275_v12 = vpop.f32.mrf.mxu2 }
 0x172   : > { %v883_v49 = vpop.f32.mrf.mxu1 }
 0x173   : > { %v3428_v17 = vadd.f32 %v883_v49, %v687_v26  ;;  %v1119_v25 = vpop.f32.mrf.mxu0 }
 0x174   : > { %v1133_v29 = vadd.f32 %v1119_v25, %v3323_v55 }
 0x176   : > { %2404 = vmatmul.msk.bf16.gmra.mxu0 %vm343_vm0, %v3816_v58  ;;  %v3435_v44 = vadd.f32 %v1275_v12, %v1133_v29  ;;  %v1286_v29 = vadd.f32 %v3382_v59, %v3386_v21 }
 0x178   : > { %v1039_v43 = vpop.f32.mrf.mxu3 }
 0x179   : > { %v1277_v55 = vpop.f32.mrf.mxu2  ;;  %v1052_v56 = vadd.f32 %v1039_v43, %v3428_v17 }
 0x17a   : > { %v886_v50 = vpop.f32.mrf.mxu1 }
 0x17b   : > { %v897_v20 = vadd.f32 %v886_v50, %v690_v18  ;;  %v1121_v22 = vpop.f32.mrf.mxu0  ;;  %v3823_v18 = vld [vmem:[#allocation29_spill] sm:$0xff] }
 0x17c   : > { %v1134_v52 = vadd.f32 %v1121_v22, %v994_v0 }
 0x17d   : > { %2375 = vmatmul.msk.bf16.gmra.mxu1 %vm343_vm0, %v3819_v53  ;;  %2395 = vmatmul.msk.bf16.gmra.mxu3 %vm343_vm0, %v1530_v24  ;;  %v3824_v24 = vld [vmem:[#allocation41_spill] sm:$0xff]  ;;  %v3826_v53 = vld [vmem:[#allocation43_spill] sm:$0xff] }
 0x17e   : > { %v3447_v6 = vadd.f32 %v1277_v55, %v1134_v52  ;;  %v3825_v50 = vpack.c.bf16 %v3823_v18, %v3824_v24 }
 0x180   : > { %v1042_v27 = vpop.f32.mrf.mxu3 }
 0x181   : > { %v1053_v47 = vadd.f32 %v1042_v27, %v897_v20  ;;  %v1280_v8 = vpop.f32.mrf.mxu2  ;;  %v3828_v27 = vpack.c.bf16 %v3826_v53, %v3827_v54 }
 0x182   : > { %v888_v45 = vpop.f32.mrf.mxu1 }
 0x183   : > { %v3451_v32 = vadd.f32 %v888_v45, %v3353_v46  ;;  %v1124_v3 = vpop.f32.mrf.mxu0 }
 0x184   : > { %v1135_v23 = vadd.f32 %v1124_v3, %v3348_v57  ;;  %v1674_v3 = vld [vmem:[#allocation3 + $0x51] sm:$0xff] }
 0x186   : > { %2405 = vmatmul.msk.bf16.gmra.mxu0 %vm343_vm0, %v1666_v63  ;;  %v3457_v19 = vadd.f32 %v1280_v8, %v1135_v23 }
 0x188   : > { %v1044_v36 = vpop.f32.mrf.mxu3 }
 0x18a   : > { %v1167_v30 = vpop.f32.mrf.mxu1 }
 0x18b   : > { %v1187_v46 = vadd.f32 %v1167_v30, %v3367_v62  ;;  %v1126_v41 = vpop.f32.mrf.mxu0  ;;  %v3492_v30 = vpop.f32.mrf.mxu2 }
 0x18c   : > { %v3462_v7 = vadd.f32 %v1126_v41, %v996_v10 }
 0x18d   : > { %2412 = vmatmul.msk.bf16.vlgmr.msra.gmra.mxu1 %vm343_vm0, %v3822_v38 }
 0x190   : > { %v1323_v57 = vpop.f32.mrf.mxu3 }
 0x191   : > { %v1343_v33 = vadd.f32 %v1323_v57, %v1187_v46 }
 0x192   : > { %v1169_v9 = vpop.f32.mrf.mxu1 }
 0x193   : > { %v1188_v26 = vadd.f32 %v1169_v9, %v1048_v13  ;;  %v1421_v12 = vpop.f32.mrf.mxu0 }
 0x194   : > { %v1441_v31 = vadd.f32 %v1421_v12, %v3376_v60 }
 0x198   : > { %v1325_v35 = vpop.f32.mrf.mxu3 }
 0x199   : > { %v1344_v62 = vadd.f32 %v1325_v35, %v1188_v26 }
 0x19a   : > { %v1172_v49 = vpop.f32.mrf.mxu1 }
 0x19b   : > { %v1189_v25 = vadd.f32 %v1172_v49, %v3396_v11  ;;  %v1423_v28 = vpop.f32.mrf.mxu0 }
 0x19c   : > { %v1442_v58 = vadd.f32 %v1423_v28, %v1286_v29 }
 0x19d   : > { %2413 = vmatmul.msk.bf16.gmra.mxu1 %vm343_vm0, %v3825_v50 }
 0x1a0   : > { %v1328_v39 = vpop.f32.mrf.mxu3 }
 0x1a1   : > { %v1345_v60 = vadd.f32 %v1328_v39, %v1189_v25 }
 0x1a2   : > { %v1174_v20 = vpop.f32.mrf.mxu1 }
 0x1a3   : > { %v1190_v0 = vadd.f32 %v1174_v20, %v1050_v14  ;;  %v1426_v55 = vpop.f32.mrf.mxu0 }
 0x1a4   : > { %v1443_v11 = vadd.f32 %v1426_v55, %v3405_v1 }
 0x1a8   : > { %v1330_v22 = vpop.f32.mrf.mxu3 }
 0x1a9   : > { %v1346_v52 = vadd.f32 %v1330_v22, %v1190_v0 }
 0x1aa   : > { %v1177_v59 = vpop.f32.mrf.mxu1 }
 0x1ab   : > { %v1191_v21 = vadd.f32 %v1177_v59, %v3426_v2  ;;  %v1428_v51 = vpop.f32.mrf.mxu0  ;;  %v1682_v2 = vmul.f32 %v1674_v3, %v3117_v15  ;;  %v1561_v15 = vpop.f32.mrf.mxu2 }
 0x1ac   : > { %v1444_v40 = vadd.f32 %v1428_v51, %v3422_v5  ;;  %v1681_v5 = vmul.f32 %v3315_v42, %v3120_v61  ;;  %v1581_v25 = vadd.f32 %v1561_v15, %v1441_v31 }
 0x1ad   : > { %2414 = vmatmul.msk.bf16.gmra.mxu1 %vm343_vm0, %v3828_v27 }
 0x1ae   : > { %v1686_v41 = vpack.c.bf16 %v1682_v2, %v1681_v5 }
 0x1b0   : > { %v1333_v16 = vpop.f32.mrf.mxu3 }
 0x1b1   : > { %v1347_v4 = vadd.f32 %v1333_v16, %v1191_v21 }
 0x1b2   : > { %v1179_v45 = vpop.f32.mrf.mxu1 }
 0x1b3   : > { %v1192_v34 = vadd.f32 %v1179_v45, %v1052_v56  ;;  %v1431_v1 = vpop.f32.mrf.mxu0 }
 0x1b4   : > { %v1445_v23 = vadd.f32 %v1431_v1, %v3435_v44  ;;  %v1054_v44 = vadd.f32 %v1044_v36, %v3451_v32 }
 0x1b8   : > { %v1335_v63 = vpop.f32.mrf.mxu3 }
 0x1b9   : > { %v1348_v8 = vadd.f32 %v1335_v63, %v1192_v34 }
 0x1ba   : > { %v1182_v10 = vpop.f32.mrf.mxu1 }
 0x1bb   : > { %v1193_v46 = vadd.f32 %v1182_v10, %v1053_v47  ;;  %v1433_v17 = vpop.f32.mrf.mxu0  ;;  %v1563_v47 = vpop.f32.mrf.mxu2 }
 0x1bc   : > { %v1446_v43 = vadd.f32 %v1433_v17, %v3447_v6  ;;  %v1582_v29 = vadd.f32 %v1563_v47, %v1442_v58 }
 0x1bd   : > { %2415 = vmatmul.msk.bf16.gmra.mxu1 %vm343_vm0, %v1686_v41 }
 0x1c0   : > { %v1338_v37 = vpop.f32.mrf.mxu3 }
 0x1c1   : > { %v1349_v48 = vadd.f32 %v1338_v37, %v1193_v46 }
 0x1c2   : > { %v1184_v38 = vpop.f32.mrf.mxu1 }
 0x1c3   : > { %v3497_v57 = vadd.f32 %v1184_v38, %v1054_v44  ;;  %v1436_v13 = vpop.f32.mrf.mxu0  ;;  %v1566_v49 = vpop.f32.mrf.mxu2 }
 0x1c4   : > { %v1447_v61 = vadd.f32 %v1436_v13, %v3457_v19  ;;  %v1583_v20 = vadd.f32 %v1566_v49, %v1443_v11 }
 0x1c8   : > { %v3527_v11 = vpop.f32.mrf.mxu3 }
 0x1ca   : > { %v1479_v42 = vpop.f32.mrf.mxu1 }
 0x1cb   : > { %v3500_v9 = vadd.f32 %v1479_v42, %v1343_v33  ;;  %v1438_v26 = vpop.f32.mrf.mxu0 }
 0x1d0   : > { %v1619_v5 = vpop.f32.mrf.mxu3 }
 0x1d2   : > { %v1481_v12 = vpop.f32.mrf.mxu1 }
 0x1d3   : > { %v3502_v6 = vadd.f32 %v1481_v12, %v1344_v62  ;;  %v1717_v35 = vpop.f32.mrf.mxu0  ;;  %v1568_v62 = vpop.f32.mrf.mxu2 }
 0x1d4   : > { %v3504_v32 = vadd.f32 %v1717_v35, %v1581_v25  ;;  %v1584_v53 = vadd.f32 %v1568_v62, %v1444_v40 }
 0x1d6   : > { %v1803_v19 = vmul.f32 %v3504_v32, %v3504_v32 }
 0x1d8   : > { %v1811_v50 = vsel %vm343_vm0, %v1803_v19, 0.0  ;;  %v1621_v13 = vpop.f32.mrf.mxu3 }
 0x1da   : > { %v1484_v36 = vpop.f32.mrf.mxu1 }
 0x1db   : > { %v3506_v28 = vadd.f32 %v1484_v36, %v1345_v60  ;;  %v1719_v18 = vpop.f32.mrf.mxu0  ;;  %v1571_v59 = vpop.f32.mrf.mxu2 }
 0x1dc   : > { %v3510_v33 = vadd.f32 %v1719_v18, %v1582_v29  ;;  %v1585_v1 = vadd.f32 %v1571_v59, %v1445_v23 }
 0x1de   : > { %v1804_v24 = vmul.f32 %v3510_v33, %v3510_v33 }
 0x1e0   : > { %v1812_v31 = vsel %vm343_vm0, %v1804_v24, 0.0  ;;  %v1624_v62 = vpop.f32.mrf.mxu3 }
 0x1e1   : > { %v1813_v39 = vadd.f32 %v1812_v31, %v1811_v50 }
 0x1e2   : > { %v1486_v14 = vpop.f32.mrf.mxu1 }
 0x1e3   : > { %v3516_v58 = vadd.f32 %v1486_v14, %v1346_v52  ;;  %v1722_v60 = vpop.f32.mrf.mxu0  ;;  %v1573_v2 = vpop.f32.mrf.mxu2 }
 0x1e4   : > { %v3518_v0 = vadd.f32 %v1722_v60, %v1583_v20  ;;  %v1586_v17 = vadd.f32 %v1573_v2, %v1446_v43  ;;  %v1292_v43 = vadd.f32 %v3492_v30, %v3462_v7 }
 0x1e6   : > { %v1805_v55 = vmul.f32 %v3518_v0, %v3518_v0  ;;  %v1448_v49 = vadd.f32 %v1438_v26, %v1292_v43 }
 0x1e8   : > { %v1814_v22 = vsel %vm343_vm0, %v1805_v55, 0.0  ;;  %v1626_v20 = vpop.f32.mrf.mxu3 }
 0x1e9   : > { %v1815_v21 = vadd.f32 %v1814_v22, %v1813_v39 }
 0x1ea   : > { %v1489_v51 = vpop.f32.mrf.mxu1 }
 0x1eb   : > { %v3523_v54 = vadd.f32 %v1489_v51, %v1347_v4  ;;  %v1724_v27 = vpop.f32.mrf.mxu0  ;;  %v1576_v23 = vpop.f32.mrf.mxu2  ;;  %v1640_v51 = vadd.f32 %v1621_v13, %v3502_v6 }
 0x1ec   : > { %v3525_v16 = vadd.f32 %v1724_v27, %v1584_v53  ;;  %v1587_v12 = vadd.f32 %v1576_v23, %v1447_v61 }
 0x1ee   : > { %v1806_v52 = vmul.f32 %v3525_v16, %v3525_v16 }
 0x1f0   : > { %v1816_v56 = vsel %vm343_vm0, %v1806_v52, 0.0  ;;  %v1629_v53 = vpop.f32.mrf.mxu3  ;;  %v1639_v52 = vadd.f32 %v1619_v5, %v3500_v9 }
 0x1f1   : > { %v1817_v45 = vadd.f32 %v1816_v56, %v1815_v21  ;;  %v1641_v56 = vadd.f32 %v1624_v62, %v3506_v28  ;;  %v1643_v5 = vadd.f32 %v1629_v53, %v3523_v54 }
 0x1f2   : > { %v1491_v34 = vpop.f32.mrf.mxu1 }
 0x1f3   : > { %v3532_v3 = vadd.f32 %v1491_v34, %v1348_v8  ;;  %v1727_v63 = vpop.f32.mrf.mxu0  ;;  %v1578_v36 = vpop.f32.mrf.mxu2 }
 0x1f4   : > { %v3534_v40 = vadd.f32 %v1727_v63, %v1585_v1  ;;  %v1588_v24 = vadd.f32 %v1578_v36, %v1448_v49  ;;  %v1642_v1 = vadd.f32 %v1626_v20, %v3516_v58 }
 0x1f6   : > { %v1807_v4 = vmul.f32 %v3534_v40, %v3534_v40 }
 0x1f8   : > { %v1818_v10 = vsel %vm343_vm0, %v1807_v4, 0.0  ;;  %v1631_v58 = vpop.f32.mrf.mxu3 }
 0x1f9   : > { %v1819_v46 = vadd.f32 %v1818_v10, %v1817_v45  ;;  %v1644_v36 = vadd.f32 %v1631_v58, %v3532_v3 }
 0x1fa   : > { %v1494_v41 = vpop.f32.mrf.mxu1 }
 0x1fb   : > { %v3539_v37 = vadd.f32 %v1494_v41, %v1349_v48  ;;  %v1729_v44 = vpop.f32.mrf.mxu0 }
 0x1fc   : > { %v3541_v15 = vadd.f32 %v1729_v44, %v1586_v17 }
 0x1fe   : > { %v1808_v8 = vmul.f32 %v3541_v15, %v3541_v15 }
 0x200   : > { %v1820_v38 = vsel %vm343_vm0, %v1808_v8, 0.0 }
 0x201   : > { %v1821_v42 = vadd.f32 %v1820_v38, %v1819_v46 }
 0x202   : > { %v3546_v47 = vpop.f32.mrf.mxu1 }
 0x203   : > { %v1732_v35 = vpop.f32.mrf.mxu0 }
 0x204   : > { %v3550_v48 = vadd.f32 %v1732_v35, %v1587_v12 }
 0x206   : > { %v1809_v25 = vmul.f32 %v3550_v48, %v3550_v48 }
 0x208   : > { %v1822_v29 = vsel %vm343_vm0, %v1809_v25, 0.0 }
 0x209   : > { %v1823_v18 = vadd.f32 %v1822_v29, %v1821_v42 }
 0x20a   : > { %v1775_v19 = vpop.f32.mrf.mxu1 }
 0x20b   : > { %v1734_v50 = vpop.f32.mrf.mxu0  ;;  %v3562_v2 = vadd.f32 %v1775_v19, %v1639_v52  ;;  %v2524_v19 = vld [vmem:[%s3686_s6] ss:$0 sm:$0xff] }
 0x20c   : > { %v1744_v31 = vadd.f32 %v1734_v50, %v1588_v24 }
 0x20d   : > { %v1851_v9 = vmul.f32 %v3562_v2, %v3562_v2 }
 0x20e   : > { %v1810_v61 = vmul.f32 %v1744_v31, %v1744_v31 }
 0x20f   : > { %v1859_v38 = vsel %vm343_vm0, %v1851_v9, 0.0  ;;  %v1350_v9 = vadd.f32 %v3527_v11, %v3497_v57 }
 0x210   : > { %v1824_v39 = vsel %vm343_vm0, %v1810_v61, 0.0 }
 0x211   : > { %v1825_v14 = vadd.f32 %v1824_v39, %v1823_v18  ;;  %v1634_v39 = vpop.f32.mrf.mxu3 }
 0x212   : > { %v1777_v7 = vpop.f32.mrf.mxu1 }
 0x213   : > { %v1826_v30 = vrot.slane %v1825_v14, 4  ;;  %v3559_v45 = vadd.f32 %v1777_v7, %v1640_v51 }
 0x215   : > { %v1827_v26 = vadd.f32 %v1826_v30, %v1825_v14  ;;  %v1852_v4 = vmul.f32 %v3559_v45, %v3559_v45 }
 0x217   : > { %v1828_v60 = vrot.slane %v1827_v26, 2  ;;  %v1860_v41 = vsel %vm343_vm0, %v1852_v4, 0.0 }
 0x218   : > { %v1861_v12 = vadd.f32 %v1860_v41, %v1859_v38 }
 0x219   : > { %v1829_v55 = vadd.f32 %v1828_v60, %v1827_v26 }
 0x21a   : > { %v1780_v22 = vpop.f32.mrf.mxu1 }
 0x21b   : > { %v1830_v59 = vrot.slane %v1829_v55, 1  ;;  %v3564_v63 = vadd.f32 %v1780_v22, %v1641_v56 }
 0x21d   : > { %v1831_v21 = vadd.f32 %v1830_v59, %v1829_v55  ;;  %v1853_v28 = vmul.f32 %v3564_v63, %v3564_v63 }
 0x21f   : > { %v1832_v27 = vmax.f32 %v1831_v21, 1e-24  ;;  %v1862_v13 = vsel %vm343_vm0, %v1853_v28, 0.0  ;;  %v1636_v28 = vpop.f32.mrf.mxu3 }
 0x220   : > { %v1863_v49 = vadd.f32 %v1862_v13, %v1861_v12 }
 0x221   : > { %2525 = vrsqrt.f32 %v1832_v27  ;;  %vm1839_vm2 = vweird.f32 %v1832_v27 }
 0x222   : > { %v1782_v34 = vpop.f32.mrf.mxu1 }
 0x223   : > { %v3568_v6 = vadd.f32 %v1782_v34, %v1642_v1 }
 0x225   : > { %v1854_v17 = vmul.f32 %v3568_v6, %v3568_v6 }
 0x227   : > { %v2526_v10 = vpop.eup %2525  ;;  %v1864_v35 = vsel %vm343_vm0, %v1854_v17, 0.0 }
 0x228   : > { %v1834_v46 = vmul.f32 %v2526_v10, %v1832_v27  ;;  %vm1840_vm1 = vweird.f32 %v2526_v10  ;;  %v1865_v18 = vadd.f32 %v1864_v35, %v1863_v49 }
 0x229   : > { %vm1841_vm3 = vmor %vm1839_vm2, %vm1840_vm1 }
 0x22a   : > { %v1785_v44 = vpop.f32.mrf.mxu1  ;;  %v1835_v23 = vmul.f32 %v2526_v10, %v1834_v46 }
 0x22b   : > { %v3578_v8 = vadd.f32 %v1785_v44, %v1643_v5  ;;  %v1506_v5 = vadd.f32 %v3546_v47, %v1350_v9 }
 0x22c   : > { %v1836_v42 = vmul.f32 0.5, %v1835_v23 }
 0x22d   : > { %v1855_v54 = vmul.f32 %v3578_v8, %v3578_v8  ;;  %v1646_v58 = vadd.f32 %v1636_v28, %v1506_v5 }
 0x22e   : > { %v1837_v43 = vsub.f32 1.5, %v1836_v42 }
 0x22f   : > { %v1866_v25 = vsel %vm343_vm0, %v1855_v54, 0.0 }
 0x230   : > { %v1838_v29 = vmul.f32 %v2526_v10, %v1837_v43  ;;  %v1867_v50 = vadd.f32 %v1866_v25, %v1865_v18 }
 0x232   : > { %v1787_v24 = vpop.f32.mrf.mxu1  ;;  %v1842_v62 = vsel %vm1841_vm3, %v2526_v10, %v1838_v29  ;;  %vm2145_vm3 = vcmask 125952  }
 0x233   : > { %v3590_v61 = vadd.f32 %v1787_v24, %v1644_v36  ;;  %v1849_v14 = vmul.f32 %v1842_v62, %v3550_v48  ;;  %v1850_v7 = vmul.f32 %v1842_v62, %v1744_v31  ;;  %v1843_v30 = vmul.f32 %v1842_v62, %v3504_v32 }
 0x234   : > { %v1844_v3 = vmul.f32 %v1842_v62, %v3510_v33  ;;  %v1845_v26 = vmul.f32 %v1842_v62, %v3518_v0  ;;  %v1846_v60 = vmul.f32 %v1842_v62, %v3525_v16  ;;  %v1847_v55 = vmul.f32 %v1842_v62, %v3534_v40 }
 0x235   : > { %v1856_v20 = vmul.f32 %v3590_v61, %v3590_v61  ;;  %v1909_v22 = vmul.f32 %v2524_v19, %v1849_v14  ;;  %v1910_v59 = vmul.f32 %v2524_v19, %v1850_v7  ;;  %v1903_v21 = vmul.f32 %v2524_v19, %v1843_v30 }
 0x236   : > { %v1904_v51 = vmul.f32 %v2524_v19, %v1844_v3  ;;  %v1905_v31 = vmul.f32 %v2524_v19, %v1845_v26  ;;  %v1906_v53 = vmul.f32 %v2524_v19, %v1846_v60  ;;  %v1848_v32 = vmul.f32 %v1842_v62, %v3541_v15 }
 0x237   : > { %v1868_v48 = vsel %vm343_vm0, %v1856_v20, 0.0  ;;  %v1914_v33 = vpack.c.bf16 %v1910_v59, %v1909_v22  ;;  %v1907_v56 = vmul.f32 %v2524_v19, %v1847_v55  ;;  %v1645_v0 = vadd.f32 %v1634_v39, %v3539_v37  ;;  %v1953_v59 = vld [vmem:[%s3687_s7] sm:$0xff] }
 0x238   : > { %v1869_v27 = vadd.f32 %v1868_v48, %v1867_v50  ;;  %v1911_v52 = vpack.c.bf16 %v1904_v51, %v1903_v21  ;;  %v1912_v34 = vpack.c.bf16 %v1906_v53, %v1905_v31  ;;  %v1908_v16 = vmul.f32 %v2524_v19, %v1848_v32  ;;  %v1954_v31 = vld [vmem:[%s3687_s7 + $0x8] sm:$0xff] }
 0x239   : > { %v2009_v40 = vpack.c.bf16 %v3590_v61, %v3578_v8  ;;  %vm1955_vm8 = vcmp.gt.f32.partialorder %v1953_v59, 0.0  ;;  %vm1956_vm9 = vcmp.gt.f32.partialorder %v1954_v31, 0.0 }
 0x23a   : > { %1919 = vxpose.xlu1.c.b16.start [1/4] (short) (narrow) %v1911_v52, 16  ;;  %v1790_v1 = vpop.f32.mrf.mxu1  ;;  %v1913_v10 = vpack.c.bf16 %v1908_v16, %v1907_v56 }
 0x23b   : > { %v3605_v4 = vadd.f32 %v1790_v1, %v1645_v0 }
 0x23d   : > { %v1857_v15 = vmul.f32 %v3605_v4, %v3605_v4 }
 0x23f   : > { %v1870_v37 = vsel %vm343_vm0, %v1857_v15, 0.0 }
 0x240   : > { %v1871_v46 = vadd.f32 %v1870_v37, %v1869_v27  ;;  %v2007_v27 = vpack.c.bf16 %v3559_v45, %v3562_v2 }
 0x242   : > { %v1792_v41 = vpop.f32.mrf.mxu1 }
 0x243   : > { %v1802_v17 = vadd.f32 %v1792_v41, %v1646_v58 }
 0x245   : > { %v1858_v44 = vmul.f32 %v1802_v17, %v1802_v17  ;;  %v2010_v23 = vpack.c.bf16 %v1802_v17, %v3605_v4 }
 0x247   : > { %v1872_v38 = vsel %vm343_vm0, %v1858_v44, 0.0 }
 0x248   : > { %v1873_v13 = vadd.f32 %v1872_v38, %v1871_v46 }
 0x24a   : > { %v1874_v42 = vrot.slane %v1873_v13, 4  ;;  %1920 = vxpose.xlu1.c.b16.cont [2/4] (short) (narrow) %v1912_v34, 16 }
 0x24c   : > { %v1875_v57 = vadd.f32 %v1874_v42, %v1873_v13 }
 0x24e   : > { %v1876_v11 = vrot.slane %v1875_v57, 2 }
 0x250   : > { %v1877_v12 = vadd.f32 %v1876_v11, %v1875_v57 }
 0x252   : > { %v1878_v54 = vrot.slane %v1877_v12, 1 }
 0x254   : > { %v1879_v35 = vadd.f32 %v1878_v54, %v1877_v12 }
 0x256   : > { %v1880_v47 = vmax.f32 %v1879_v35, 1e-24 }
 0x258   : > { %2527 = vrsqrt.f32 %v1880_v47  ;;  %vm1887_vm5 = vweird.f32 %v1880_v47 }
 0x25a   : > { %1921 = vxpose.xlu1.c.b16.cont [3/4] (short) (narrow) %v1913_v10, 16 }
 0x25e   : > { %v2528_v43 = vpop.eup %2527 }
 0x25f   : > { %v1882_v49 = vmul.f32 %v2528_v43, %v1880_v47  ;;  %vm1888_vm4 = vweird.f32 %v2528_v43 }
 0x260   : > { %vm1889_vm6 = vmor %vm1887_vm5, %vm1888_vm4 }
 0x261   : > { %v1883_v25 = vmul.f32 %v2528_v43, %v1882_v49 }
 0x263   : > { %v1884_v36 = vmul.f32 0.5, %v1883_v25 }
 0x265   : > { %v1885_v29 = vsub.f32 1.5, %v1884_v36 }
 0x267   : > { %v1886_v18 = vmul.f32 %v2528_v43, %v1885_v29 }
 0x269   : > { %v1890_v19 = vsel %vm1889_vm6, %v2528_v43, %v1886_v18 }
 0x26a   : > { %v1897_v24 = vmul.f32 %v1890_v19, %v3605_v4  ;;  %v1898_v62 = vmul.f32 %v1890_v19, %v1802_v17  ;;  %1922 = vxpose.xlu1.c.b16.end [4/4] (short) (narrow) %v1914_v33, 16  ;;  %v1895_v50 = vmul.f32 %v1890_v19, %v3578_v8  ;;  %v1896_v39 = vmul.f32 %v1890_v19, %v3590_v61 }
 0x26b   : > { %v1893_v30 = vmul.f32 %v1890_v19, %v3564_v63  ;;  %v1894_v3 = vmul.f32 %v1890_v19, %v3568_v6  ;;  %v1891_v26 = vmul.f32 %v1890_v19, %v3562_v2  ;;  %v1892_v60 = vmul.f32 %v1890_v19, %v3559_v45  ;;  %v2452_v19 = vld [vmem:[%s3685_s5] sm:$0xff] }
 0x26c   : > { %v1918_v14 = vpack.c.bf16 %v1898_v62, %v1897_v24  ;;  %v1917_v7 = vpack.c.bf16 %v1896_v39, %v1895_v50  ;;  %v2008_v8 = vpack.c.bf16 %v3568_v6, %v3564_v63 }
 0x26d   : > { %v1916_v20 = vpack.c.bf16 %v1894_v3, %v1893_v30  ;;  %v1915_v55 = vpack.c.bf16 %v1892_v60, %v1891_v26 }
 0x26e   : > { %1943 = vmatpush.bf16.msra.mxu2 %v1918_v14 }
 0x272   : > { %1944 = vmatpush.bf16.msra.mxu2 %v1917_v7 }
 0x276   : > { %1945 = vmatpush.bf16.msra.mxu2 %v1916_v20 }
 0x27a   : > { %1946 = vmatpush.bf16.msra.mxu2 %v1915_v55 }
 0x27e   : > { %2115 = vmatpush.bf16.msrb.mxu2 %v2452_v19 }
 0x2e6   : > { %v1927_v22 = vpop.trf.xlu1 }
 0x2e7   : > { %2416 = vmatmul.msk.bf16.vlgmr.msra.gmra.mxu2 %vm1935_vm7, %v1927_v22  ;;  %v2486_v22 = vld [vmem:[%s2625_s22] sm:$0xff]  }
 0x2e8   : > { %v2487_v59 = vunpack.c.l.bf16 %v2486_v22  ;;  %v2488_v31 = vunpack.c.h.bf16 %v2486_v22 }
 0x36a   : > { %v1948_v21 = vpop.f32.mrf.mxu2 }
 0x36b   : > { %v1957_v51 = vsel %vm1955_vm8, %v1948_v21, -1e+30 }
 0x36c   : > { %v1959_v48 = vsel %vm343_vm0, %v1957_v51, -inf }
 0x36d   : > { %1960 = vmax.xlane.f32.xlu2 %v1959_v48 }
 0x372   : > { %v1950_v53 = vpop.f32.mrf.mxu2 }
 0x373   : > { %v1958_v32 = vsel %vm1956_vm9, %v1950_v53, -1e+30 }
 0x374   : > { %v1962_v33 = vsel %vm343_vm0, %v1958_v32, -inf }
 0x375   : > { %1963 = vmax.xlane.f32.xlu0 %v1962_v33  ;;  %v2507_v33 = vld [vmem:[%s2625_s22 + $0x8] sm:$0xff]  }
 0x389   : > { %2016 = vrot.lane.b32.xlu0 %v2007_v27, %s2547_s30 }
 0x391   : > { %2020 = vrot.lane.b32.xlu0 %v2009_v40, %s2547_s30 }
 0x399   : > { %2022 = vrot.lane.b32.xlu0 %v2010_v23, %s2547_s30 }
 0x3e0   : > { %v1961_v52 = vpop.xlane.xlu2 %1960 }
 0x3e1   : > { %v1965_v56 = vsub.f32 %v1957_v51, %v1961_v52  ;;  %v2491_v52 = vunpack.c.l.bf16 %v2507_v33 }
 0x3e3   : > { %v1967_v0 = vmul.f32 1.442695, %v1965_v56 }
 0x3e5   : > { %2529 = vpow2.f32 %v1967_v0 }
 0x3e8   : > { %v1964_v34 = vpop.xlane.xlu0 %1963 }
 0x3e9   : > { %v1966_v16 = vsub.f32 %v1958_v32, %v1964_v34 }
 0x3eb   : > { %v2530_v1 = vpop.eup %2529  ;;  %v1969_v4 = vmul.f32 1.442695, %v1966_v16  ;;  %v2492_v16 = vunpack.c.h.bf16 %v2507_v33 }
 0x3ec   : > { %v1971_v10 = vsel %vm343_vm0, %v2530_v1, 0.0 }
 0x3ed   : > { %2531 = vpow2.f32 %v1969_v4  ;;  %1972 = vadd.xlane.f32.xlu2 %v1971_v10  ;;  %v2508_v10 = vld [vmem:[%s2625_s22 + $0x10] sm:$0xff]  }
 0x3f3   : > { %v2532_v45 = vpop.eup %2531 }
 0x3f4   : > { %v1974_v2 = vsel %vm343_vm0, %v2532_v45, 0.0 }
 0x3f5   : > { %1975 = vadd.xlane.f32.xlu2 %v1974_v2  ;;  %v2495_v2 = vunpack.c.l.bf16 %v2508_v10 }
 0x3fb   : > { %v2017_v25 = vpop.permute.xlu0 %2016 }
 0x403   : > { %v2021_v29 = vpop.permute.xlu0 %2020 }
 0x40b   : > { %v2023_v18 = vpop.permute.xlu0 %2022 }
 0x40d   : > { %2018 = vrot.lane.b32.xlu2 %v2008_v8, %s2547_s30 }
 0x460   : > { %v1973_v61 = vpop.xlane.xlu2 %1972 }
 0x461   : > { %2533 = vrcp.f32 %v1973_v61  ;;  %v1988_v41 = vand.u32 2147483648, %v1973_v61  ;;  %vm1982_vm11 = vweird.f32 %v1973_v61  ;;  %v1986_v17 = vand.u32 2147483647, %v1973_v61 }
 0x463   : > { %v1989_v13 = vor.u32 1.1754944e-38, %v1988_v41  ;;  %vm1987_vm14 = vcmp.eq.f32.partialorder %v1986_v17, 8.507059e+37 }
 0x467   : > { %v2534_v40 = vpop.eup %2533 }
 0x468   : > { %v1978_v9 = vmul.f32 %v2534_v40, %v1973_v61  ;;  %v1976_v15 = vpop.xlane.xlu2 %1975  ;;  %vm1983_vm10 = vweird.f32 %v2534_v40 }
 0x469   : > { %2535 = vrcp.f32 %v1976_v15  ;;  %vm1984_vm12 = vmor %vm1982_vm11, %vm1983_vm10  ;;  %v2003_v23 = vand.u32 2147483648, %v1976_v15  ;;  %v2001_v6 = vand.u32 2147483647, %v1976_v15  ;;  %vm1997_vm15 = vweird.f32 %v1976_v15 }
 0x46a   : > { %v1979_v28 = vsub.f32 1.0, %v1978_v9  ;;  %v2496_v9 = vunpack.c.h.bf16 %v2508_v10 }
 0x46b   : > { %v2004_v57 = vor.u32 1.1754944e-38, %v2003_v23  ;;  %vm2002_vm2 = vcmp.eq.f32.partialorder %v2001_v6, 8.507059e+37 }
 0x46c   : > { %v1980_v5 = vmul.f32 %v2534_v40, %v1979_v28 }
 0x46e   : > { %v1981_v46 = vadd.f32 %v2534_v40, %v1980_v5  ;;  %v2509_v5 = vld [vmem:[%s2625_s22 + $0x18] sm:$0xff]  }
 0x46f   : > { %v2536_v37 = vpop.eup %2535 }
 0x470   : > { %v1993_v58 = vmul.f32 %v2536_v37, %v1976_v15  ;;  %vm1998_vm13 = vweird.f32 %v2536_v37  ;;  %v1985_v38 = vsel %vm1984_vm12, %v2534_v40, %v1981_v46  ;;  %v2019_v36 = vpop.permute.xlu2 %2018  ;;  %v2499_v46 = vunpack.c.l.bf16 %v2509_v5 }
 0x471   : > { %vm1999_vm1 = vmor %vm1997_vm15, %vm1998_vm13  ;;  %v1990_v11 = vsel %vm1987_vm14, %v1989_v13, %v1985_v38 }
 0x472   : > { %v1994_v44 = vsub.f32 1.0, %v1993_v58  ;;  %v1991_v35 = vmul.f32 %v2530_v1, %v1990_v11 }
 0x474   : > { %v1995_v63 = vmul.f32 %v2536_v37, %v1994_v44  ;;  %v2500_v44 = vunpack.c.h.bf16 %v2509_v5 }
 0x476   : > { %v1996_v42 = vadd.f32 %v2536_v37, %v1995_v63 }
 0x478   : > { %v2000_v12 = vsel %vm1999_vm1, %v2536_v37, %v1996_v42 }
 0x479   : > { %v2005_v54 = vsel %vm2002_vm2, %v2004_v57, %v2000_v12 }
 0x47a   : > { %v2006_v47 = vmul.f32 %v2532_v45, %v2005_v54 }
 0x47c   : > { %v2011_v43 = vpack.c.bf16 %v2006_v47, %v1991_v35 }
 0x47e   : > { %v2037_v49 = vsel %vm343_vm0, %v2011_v43, 0 }
 0x47f   : > { %2046 = vmatpush.bf16.xpose.msra.mxu3 %v2037_v49 }
 0x486   : > { %2417 = vmatmul.msk.bf16.vlgmr.msra.gmra.mxu3 %vm343_vm0, %v2017_v25 }
 0x496   : > { %2418 = vmatmul.msk.bf16.gmra.mxu3 %vm343_vm0, %v2019_v36 }
 0x4a6   : > { %2419 = vmatmul.msk.bf16.gmra.mxu3 %vm343_vm0, %v2021_v29 }
 0x4b6   : > { %2420 = vmatmul.msk.bf16.gmra.mxu3 %vm343_vm0, %v2023_v18 }
 0x509   : > { %v2048_v24 = vpop.f32.mrf.mxu3 }
 0x511   : > { %v2050_v62 = vpop.f32.mrf.mxu3 }
 0x512   : > { %v2068_v50 = vpack.c.bf16 %v2050_v62, %v2048_v24 }
 0x514   : > { %2425 = vmatmul.msk.bf16.vlgmr.msrb.gmra.mxu2 %vm343_vm0, %v2068_v50 }
 0x519   : > { %v2053_v39 = vpop.f32.mrf.mxu3 }
 0x521   : > { %v2055_v14 = vpop.f32.mrf.mxu3 }
 0x522   : > { %v2069_v7 = vpack.c.bf16 %v2055_v14, %v2053_v39 }
 0x524   : > { %2426 = vmatmul.msk.bf16.gmra.mxu2 %vm343_vm0, %v2069_v7 }
 0x529   : > { %v2058_v30 = vpop.f32.mrf.mxu3 }
 0x531   : > { %v2060_v3 = vpop.f32.mrf.mxu3 }
 0x532   : > { %v2070_v20 = vpack.c.bf16 %v2060_v3, %v2058_v30 }
 0x534   : > { %2427 = vmatmul.msk.bf16.gmra.mxu2 %vm343_vm0, %v2070_v20 }
 0x539   : > { %v2063_v26 = vpop.f32.mrf.mxu3 }
 0x541   : > { %v2065_v60 = vpop.f32.mrf.mxu3 }
 0x542   : > { %v2071_v55 = vpack.c.bf16 %v2065_v60, %v2063_v26 }
 0x544   : > { %2428 = vmatmul.msk.bf16.gmra.mxu2 %vm343_vm0, %v2071_v55 }
 0x597   : > { %v2117_v21 = vpop.f32.mrf.mxu2 }
 0x598   : > { %v2118_v51 = vadd.f32 %v2487_v59, %v2117_v21 }
 0x59a   : > { %v2137_v48 = vpack.c.bf16 %v2118_v51, %v2118_v51 }
 0x59c   : > { %2146 = vst.msk [vmem:[%s3656_s16] sm:$0xf] %vm2145_vm3, %v2137_v48 }
 0x59f   : > { %v2119_v53 = vpop.f32.mrf.mxu2 }
 0x5a0   : > { %v2120_v32 = vadd.f32 %v2488_v31, %v2119_v53 }
 0x5a2   : > { %v2138_v27 = vpack.c.bf16 %v2120_v32, %v2120_v32 }
 0x5a4   : > { %2147 = vst.msk [vmem:[%s3656_s16 + $0x4] sm:$0xf] %vm2145_vm3, %v2138_v27 }
 0x5a7   : > { %v2122_v56 = vpop.f32.mrf.mxu2 }
 0x5a8   : > { %v2123_v0 = vadd.f32 %v2491_v52, %v2122_v56 }
 0x5aa   : > { %v2139_v34 = vpack.c.bf16 %v2123_v0, %v2123_v0 }
 0x5ac   : > { %2148 = vst.msk [vmem:[%s3656_s16 + $0x8] sm:$0xf] %vm2145_vm3, %v2139_v34 }
 0x5af   : > { %v2124_v1 = vpop.f32.mrf.mxu2 }
 0x5b0   : > { %v2125_v4 = vadd.f32 %v2492_v16, %v2124_v1 }
 0x5b2   : > { %v2140_v45 = vpack.c.bf16 %v2125_v4, %v2125_v4 }
 0x5b4   : > { %2149 = vst.msk [vmem:[%s3656_s16 + $0xc] sm:$0xf] %vm2145_vm3, %v2140_v45 }
 0x5b7   : > { %v2127_v8 = vpop.f32.mrf.mxu2 }
 0x5b8   : > { %v2128_v61 = vadd.f32 %v2495_v2, %v2127_v8 }
 0x5ba   : > { %v2141_v40 = vpack.c.bf16 %v2128_v61, %v2128_v61 }
 0x5bc   : > { %2150 = vst.msk [vmem:[%s3656_s16 + $0x10] sm:$0xf] %vm2145_vm3, %v2141_v40 }
 0x5bf   : > { %v2129_v15 = vpop.f32.mrf.mxu2 }
 0x5c0   : > { %v2130_v28 = vadd.f32 %v2496_v9, %v2129_v15 }
 0x5c2   : > { %v2142_v37 = vpack.c.bf16 %v2130_v28, %v2130_v28 }
 0x5c4   : > { %2151 = vst.msk [vmem:[%s3656_s16 + $0x14] sm:$0xf] %vm2145_vm3, %v2142_v37 }
 0x5c7   : > { %v2132_v58 = vpop.f32.mrf.mxu2 }
 0x5c8   : > { %v2133_v41 = vadd.f32 %v2499_v46, %v2132_v58 }
 0x5ca   : > { %v2143_v17 = vpack.c.bf16 %v2133_v41, %v2133_v41 }
 0x5cc   : > { %2152 = vst.msk [vmem:[%s3656_s16 + $0x18] sm:$0xf] %vm2145_vm3, %v2143_v17 }
 0x5cf   : > { %v2134_v23 = vpop.f32.mrf.mxu2 }
 0x5d0   : > { %v2135_v63 = vadd.f32 %v2500_v44, %v2134_v23 }
 0x5d2   : > { %v2144_v6 = vpack.c.bf16 %v2135_v63, %v2135_v63 }
 0x5d4   : > { %2153 = vst.msk [vmem:[%s3656_s16 + $0x1c] sm:$0xf] %vm2145_vm3, %v2144_v6 }
 0x5d5 PF: > { %s18_s27 = sadd.s32 1, %s2543_s27  }
 0x5d6   : > { %p15_p4 = scmp.ge.s32.totalorder %s18_s27, 4  }
 0x5d8   :  { %17 = sbr.rel (!%p15_p4) target bundleno = 1 (0x1), region = 102 }

</bundles_post_ra>
